<compile_context>
chip_gen: v7x
topology: tpu7x:2x2x1
jax: 0.10.0
libtpu: 0.0.40
codegen_flags: <defaults>
</compile_context>

<pallas_src>
import jax
import jax.numpy as jnp
from jax.experimental import pallas as pl
from jax.experimental.pallas import tpu as pltpu


# ------------------------------------------------------------------ pass 1 --
def _conv_stats_kernel(x_ref, w_ref, y_ref, st_ref):
    # x_ref : (Cin, TB+2, Wu+2)  column-upsampled + padded rows for this tile (halo incl.)
    # w_ref : (Cout, 9*Cin)      conv weight, K ordered as (ky*3+kx)*Cin + ci
    # y_ref : (Cout, 2*TB*Wu)    un-normalized conv output, NCHW-flat (lane dense)
    # st_ref: (Cout, 2)          per-tile [sum, sum-of-squares] per channel
    cin, tbp2, wup2 = x_ref.shape
    tb, wu = tbp2 - 2, wup2 - 2
    so = 2 * tb                                   # output rows produced by this tile

    xt = x_ref[...]
    # Fused nearest-2x ROW upsample of the padded tile: up[r] = xt[(r + 1) // 2].
    up = jnp.repeat(xt, 2, axis=1)[:, 1:2 * tbp2 - 1, :]          # (Cin, 2*TB+2, Wu+2)

    # im2col over the 9 taps -> ONE K = 9*Cin contraction on the MXU.
    taps = [up[:, ky:ky + so, kx:kx + wu] for ky in range(3) for kx in range(3)]
    patch = jnp.concatenate(taps, axis=0).reshape(9 * cin, so * wu)

    acc = jnp.dot(w_ref[...], patch, preferred_element_type=jnp.float32)  # (Cout, 2*TB*Wu)

    y_ref[...] = acc
    st_ref[...] = jnp.concatenate(
        [jnp.sum(acc, axis=1, keepdims=True),
         jnp.sum(acc * acc, axis=1, keepdims=True)], axis=1)


# ------------------------------------------------------------------ pass 2 --
def _bn_lrelu_kernel(y_ref, scale_ref, shift_ref, o_ref):
    v = y_ref[...] * scale_ref[...] + shift_ref[...]
    o_ref[...] = jnp.where(v >= 0.0, v, 0.2 * v)


# ------------------------------------------------------------------ helpers -
def _pick_row_tile(h, w):
    tb = 8 if h % 8 == 0 else h
    if (4 * tb * w) % 128 != 0:       # output lane block must be a multiple of 128
        tb = h                        # fall back to a full-extent block (always legal)
    return tb


def _pick_lane_tile(total, cap=16384):
    best = None
    t = 128
    while t <= min(total, cap):
        if total % t == 0:
            best = t
        t += 128
    return best if best is not None else total


# ------------------------------------------------------------------ wrapper -
@jax.jit
def dfc_decoder_block(x_nchw, weight_oihw, gamma, beta):
    """x_nchw: (N, Cin, H, W) f32; weight_oihw: (Cout, Cin, 3, 3) f32."""
    N, Cin, H, W = x_nchw.shape
    Cout = weight_oihw.shape[0]
    Hu, Wu = 2 * H, 2 * W

    TB = _pick_row_tile(H, W)         # un-upsampled rows per grid step
    RB = H // TB
    SBLK = 2 * TB * Wu                # flat NCHW spatial elements per output tile

    x = x_nchw.astype(jnp.float32)

    # Pad in the ORIGINAL resolution and nearest-upsample along W only.
    # Equivalent to pad(upsample2x(x)) because up_pad[R, C] == xpad[(R+1)//2, (C+1)//2].
    xp = jnp.pad(x, ((0, 0), (0, 0), (1, 1), (1, 1)))                    # (N,Cin,H+2,W+2)
    col_idx = (jnp.arange(Wu + 2) + 1) // 2
    xpc = jnp.take(xp, col_idx, axis=3)                                  # (N,Cin,H+2,Wu+2)

    # Halo row blocks: tile t needs padded rows [t*TB, t*TB + TB + 2).
    row_idx = (jnp.arange(RB)[:, None] * TB + jnp.arange(TB + 2)[None, :]).reshape(-1)
    xblk = jnp.take(xpc, row_idx, axis=2).reshape(N, Cin, RB, TB + 2, Wu + 2)

    # Conv weight (Cout, Cin, 3, 3) -> (Cout, 9*Cin), K ordered (ky*3+kx)*Cin + ci.
    w2 = jnp.transpose(weight_oihw.astype(jnp.float32), (0, 2, 3, 1)).reshape(Cout, 9 * Cin)

    in_blk = Cin * (TB + 2) * (Wu + 2) * 4
    out_blk = Cout * SBLK * 4
    vmem_p1 = int(min(32 * 2 ** 20, max(8 * 2 ** 20, 8 * (in_blk + out_blk))))

    y, stats = pl.pallas_call(
        _conv_stats_kernel,
        out_shape=(jax.ShapeDtypeStruct((N, Cout, Hu * Wu), jnp.float32),
                   jax.ShapeDtypeStruct((N, RB, Cout, 2), jnp.float32)),
        grid=(N, RB),
        in_specs=[
            pl.BlockSpec((None, Cin, None, TB + 2, Wu + 2), lambda n, t: (n, 0, t, 0, 0)),
            pl.BlockSpec((Cout, 9 * Cin), lambda n, t: (0, 0)),
        ],
        out_specs=(
            pl.BlockSpec((None, Cout, SBLK), lambda n, t: (n, 0, t)),
            pl.BlockSpec((None, None, Cout, 2), lambda n, t: (n, t, 0, 0)),
        ),
        compiler_params=pltpu.CompilerParams(
            dimension_semantics=("parallel", "parallel"),
            vmem_limit_bytes=vmem_p1),
    )(xblk, w2)

    # Global training-mode BatchNorm stats (biased) + fused affine (tiny, O(Cout)).
    cnt = jnp.float32(N * Hu * Wu)
    s = jnp.sum(stats, axis=(0, 1))                                      # (Cout, 2)
    mean = s[:, 0] / cnt
    var = jnp.maximum(s[:, 1] / cnt - mean * mean, 0.0)
    scale = gamma.astype(jnp.float32) * jax.lax.rsqrt(var + 1e-5)
    shift = beta.astype(jnp.float32) - mean * scale
    scale2 = scale.reshape(Cout, 1)
    shift2 = shift.reshape(Cout, 1)

    TS = _pick_lane_tile(Hu * Wu)
    SP = (Hu * Wu) // TS
    vmem_p2 = int(min(32 * 2 ** 20, max(8 * 2 ** 20, 8 * Cout * TS * 4)))

    out_flat = pl.pallas_call(
        _bn_lrelu_kernel,
        out_shape=jax.ShapeDtypeStruct((N, Cout, Hu * Wu), jnp.float32),
        grid=(N, SP),
        in_specs=[
            pl.BlockSpec((None, Cout, TS), lambda n, sidx: (n, 0, sidx)),
            pl.BlockSpec((Cout, 1), lambda n, sidx: (0, 0)),
            pl.BlockSpec((Cout, 1), lambda n, sidx: (0, 0)),
        ],
        out_specs=pl.BlockSpec((None, Cout, TS), lambda n, sidx: (n, 0, sidx)),
        input_output_aliases={0: 0},
        compiler_params=pltpu.CompilerParams(
            dimension_semantics=("parallel", "parallel"),
            vmem_limit_bytes=vmem_p2),
    )(y, scale2, shift2)

    # NCHW-flat -> NCHW: pure reshape, no transpose pass.
    return out_flat.reshape(N, Cout, Hu, Wu)


# ---------------------------------------------------------------- reference -
def _reference(x, w, gamma, beta):
    x_up = jnp.repeat(jnp.repeat(x, 2, axis=2), 2, axis=3)
    y = jax.lax.conv_general_dilated(
        x_up, w, window_strides=(1, 1), padding="SAME",
        dimension_numbers=("NCHW", "OIHW", "NCHW"))
    mean = jnp.mean(y, axis=(0, 2, 3), keepdims=True)
    var = jnp.mean((y - mean) ** 2, axis=(0, 2, 3), keepdims=True)
    yn = (y - mean) * jax.lax.rsqrt(var + 1e-5)
    yn = yn * gamma.reshape(1, -1, 1, 1) + beta.reshape(1, -1, 1, 1)
    return jnp.where(yn >= 0, yn, 0.2 * yn)


if __name__ == "__main__":
    key = jax.random.PRNGKey(0)
    k_x, k_w, k_g = jax.random.split(key, 3)

    N, Cin, Cout, H, W = 2, 4, 8, 16, 16

    x = jax.random.normal(k_x, (N, Cin, H, W), dtype=jnp.float32)
    # init_layers: conv weight ~ N(0, 0.02), BN weight ~ N(1, 0.02), BN bias = 0.
    weight = 0.02 * jax.random.normal(k_w, (Cout, Cin, 3, 3), dtype=jnp.float32)
    gamma = 1.0 + 0.02 * jax.random.normal(k_g, (Cout,), dtype=jnp.float32)
    beta = jnp.zeros((Cout,), dtype=jnp.float32)

    out = jax.block_until_ready(dfc_decoder_block(x, weight, gamma, beta))

    ref = _reference(x, weight, gamma, beta)
    assert out.shape == (N, Cout, 2 * H, 2 * W)
    err = float(jnp.max(jnp.abs(out - ref)))
    assert bool(jnp.allclose(out, ref, atol=2e-4, rtol=2e-4)), err

    print("KERNEL_OK")
</pallas_src>

<mosaic_0001>
module attributes {stable_mosaic.version = 11 : i64} {
  func.func @_conv_stats_kernel(%arg0: i32, %arg1: i32, %arg2: memref<1x4x1x10x34xf32, #tpu.memory_space<vmem>>, %arg3: memref<8x36xf32, #tpu.memory_space<vmem>>, %arg4: memref<1x8x512xf32, #tpu.memory_space<vmem>>, %arg5: memref<1x1x8x2xf32, #tpu.memory_space<vmem>>) attributes {dimension_semantics = [#tpu.dimension_semantics<parallel>, #tpu.dimension_semantics<parallel>], iteration_bounds = array<i64: 2, 2>, scalar_prefetch = 0 : i64, scratch_operands = 0 : i64, tpu.core_type = #tpu.core_type<tc>, window_params = [{transform_indices = @transform_0, window_bounds = array<i64: 1, 4, 1, 10, 34>}, {pipeline_mode = #tpu.pipeline_mode<synchronous>, transform_indices = @transform_1, window_bounds = array<i64: 8, 36>}, {transform_indices = @transform_2, window_bounds = array<i64: 1, 8, 512>}, {transform_indices = @transform_3, window_bounds = array<i64: 1, 1, 8, 2>}]} {
    %c0 = arith.constant 0 : index
    %c0_0 = arith.constant 0 : index
    %c0_1 = arith.constant 0 : index
    %c0_2 = arith.constant 0 : index
    %c0_3 = arith.constant 0 : index
    %0 = vector.load %arg2[%c0, %c0_0, %c0_1, %c0_2, %c0_3] : memref<1x4x1x10x34xf32, #tpu.memory_space<vmem>>, vector<1x4x1x10x34xf32>
    %1 = vector.shape_cast %0 : vector<1x4x1x10x34xf32> to vector<4x10x34xf32>
    %2 = vector.shape_cast %1 : vector<4x10x34xf32> to vector<4x10x1x34xf32>
    %3 = vector.broadcast %2 : vector<4x10x1x34xf32> to vector<4x10x2x34xf32>
    %4 = vector.shape_cast %3 : vector<4x10x2x34xf32> to vector<4x20x34xf32>
    %5 = vector.extract_strided_slice %4 {offsets = [0, 1, 0], sizes = [4, 18, 34], strides = [1, 1, 1]} : vector<4x20x34xf32> to vector<4x18x34xf32>
    %6 = vector.extract_strided_slice %5 {offsets = [0, 0, 0], sizes = [4, 16, 32], strides = [1, 1, 1]} : vector<4x18x34xf32> to vector<4x16x32xf32>
    %7 = vector.extract_strided_slice %5 {offsets = [0, 0, 1], sizes = [4, 16, 32], strides = [1, 1, 1]} : vector<4x18x34xf32> to vector<4x16x32xf32>
    %8 = vector.extract_strided_slice %5 {offsets = [0, 0, 2], sizes = [4, 16, 32], strides = [1, 1, 1]} : vector<4x18x34xf32> to vector<4x16x32xf32>
    %9 = vector.extract_strided_slice %5 {offsets = [0, 1, 0], sizes = [4, 16, 32], strides = [1, 1, 1]} : vector<4x18x34xf32> to vector<4x16x32xf32>
    %10 = vector.extract_strided_slice %5 {offsets = [0, 1, 1], sizes = [4, 16, 32], strides = [1, 1, 1]} : vector<4x18x34xf32> to vector<4x16x32xf32>
    %11 = vector.extract_strided_slice %5 {offsets = [0, 1, 2], sizes = [4, 16, 32], strides = [1, 1, 1]} : vector<4x18x34xf32> to vector<4x16x32xf32>
    %12 = vector.extract_strided_slice %5 {offsets = [0, 2, 0], sizes = [4, 16, 32], strides = [1, 1, 1]} : vector<4x18x34xf32> to vector<4x16x32xf32>
    %13 = vector.extract_strided_slice %5 {offsets = [0, 2, 1], sizes = [4, 16, 32], strides = [1, 1, 1]} : vector<4x18x34xf32> to vector<4x16x32xf32>
    %14 = vector.extract_strided_slice %5 {offsets = [0, 2, 2], sizes = [4, 16, 32], strides = [1, 1, 1]} : vector<4x18x34xf32> to vector<4x16x32xf32>
    %15 = tpu.concatenate %6, %7, %8, %9, %10, %11, %12, %13, %14 in 0 : vector<4x16x32xf32>, vector<4x16x32xf32>, vector<4x16x32xf32>, vector<4x16x32xf32>, vector<4x16x32xf32>, vector<4x16x32xf32>, vector<4x16x32xf32>, vector<4x16x32xf32>, vector<4x16x32xf32> -> vector<36x16x32xf32>
    %16 = vector.shape_cast %15 : vector<36x16x32xf32> to vector<36x512xf32>
    %c0_4 = arith.constant 0 : index
    %c0_5 = arith.constant 0 : index
    %17 = vector.load %arg3[%c0_4, %c0_5] : memref<8x36xf32, #tpu.memory_space<vmem>>, vector<8x36xf32>
    %cst = arith.constant dense<0.000000e+00> : vector<8x512xf32>
    %18 = tpu.matmul %17, %16, %cst {dimension_numbers = #tpu.dot_dimension_numbers<[1], [0], [0], [1], [0, 0, 1, 1], [], []>} : vector<8x36xf32>, vector<36x512xf32>, vector<8x512xf32> -> vector<8x512xf32>
    %c0_6 = arith.constant 0 : index
    %c0_7 = arith.constant 0 : index
    %c0_8 = arith.constant 0 : index
    %19 = vector.load %arg4[%c0_6, %c0_7, %c0_8] : memref<1x8x512xf32, #tpu.memory_space<vmem>>, vector<1x8x512xf32>
    %20 = vector.shape_cast %19 : vector<1x8x512xf32> to vector<8x512xf32>
    %21 = vector.shape_cast %18 : vector<8x512xf32> to vector<1x8x512xf32>
    tpu.vector_store %arg4[%c0_6, %c0_7, %c0_8], %21 {strides = array<i32>} : memref<1x8x512xf32, #tpu.memory_space<vmem>>, vector<1x8x512xf32>,
    %cst_9 = arith.constant dense<0.000000e+00> : vector<8xf32>
    %22 = vector.multi_reduction <add>, %18, %cst_9 [1] : vector<8x512xf32> to vector<8xf32>
    %23 = vector.shape_cast %22 : vector<8xf32> to vector<8x1xf32>
    %24 = arith.mulf %18, %18 : vector<8x512xf32>
    %cst_10 = arith.constant dense<0.000000e+00> : vector<8xf32>
    %25 = vector.multi_reduction <add>, %24, %cst_10 [1] : vector<8x512xf32> to vector<8xf32>
    %26 = vector.shape_cast %25 : vector<8xf32> to vector<8x1xf32>
    %27 = tpu.concatenate %23, %26 in 1 : vector<8x1xf32>, vector<8x1xf32> -> vector<8x2xf32>
    %c0_11 = arith.constant 0 : index
    %c0_12 = arith.constant 0 : index
    %c0_13 = arith.constant 0 : index
    %c0_14 = arith.constant 0 : index
    %28 = vector.load %arg5[%c0_11, %c0_12, %c0_13, %c0_14] : memref<1x1x8x2xf32, #tpu.memory_space<vmem>>, vector<1x1x8x2xf32>
    %29 = vector.shape_cast %28 : vector<1x1x8x2xf32> to vector<8x2xf32>
    %30 = vector.shape_cast %27 : vector<8x2xf32> to vector<1x1x8x2xf32>
    tpu.vector_store %arg5[%c0_11, %c0_12, %c0_13, %c0_14], %30 {strides = array<i32>} : memref<1x1x8x2xf32, #tpu.memory_space<vmem>>, vector<1x1x8x2xf32>,
    return
  }
  func.func @transform_0(%arg0: i32, %arg1: i32) -> (i32, i32, i32, i32, i32) {
    %c0_i32 = arith.constant 0 : i32
    %c0_i32_0 = arith.constant 0 : i32
    %c0_i32_1 = arith.constant 0 : i32
    %c0_i32_2 = arith.constant 0 : i32
    return %arg0, %c0_i32, %arg1, %c0_i32_0, %c0_i32_1 : i32, i32, i32, i32, i32
  }
  func.func @transform_1(%arg0: i32, %arg1: i32) -> (i32, i32) {
    %c0_i32 = arith.constant 0 : i32
    %c0_i32_0 = arith.constant 0 : i32
    %c0_i32_1 = arith.constant 0 : i32
    return %c0_i32, %c0_i32_0 : i32, i32
  }
  func.func @transform_2(%arg0: i32, %arg1: i32) -> (i32, i32, i32) {
    %c0_i32 = arith.constant 0 : i32
    %c0_i32_0 = arith.constant 0 : i32
    return %arg0, %c0_i32, %arg1 : i32, i32, i32
  }
  func.func @transform_3(%arg0: i32, %arg1: i32) -> (i32, i32, i32, i32) {
    %c0_i32 = arith.constant 0 : i32
    %c0_i32_0 = arith.constant 0 : i32
    %c0_i32_1 = arith.constant 0 : i32
    return %arg0, %arg1, %c0_i32, %c0_i32_0 : i32, i32, i32, i32
  }
}

module attributes {stable_mosaic.version = 11 : i64} {
  func.func @_bn_lrelu_kernel(%arg0: i32, %arg1: i32, %arg2: memref<1x8x1024xf32, #tpu.memory_space<vmem>>, %arg3: memref<8x1xf32, #tpu.memory_space<vmem>>, %arg4: memref<8x1xf32, #tpu.memory_space<vmem>>, %arg5: memref<1x8x1024xf32, #tpu.memory_space<vmem>>) attributes {dimension_semantics = [#tpu.dimension_semantics<parallel>, #tpu.dimension_semantics<parallel>], iteration_bounds = array<i64: 2, 1>, scalar_prefetch = 0 : i64, scratch_operands = 0 : i64, tpu.core_type = #tpu.core_type<tc>, window_params = [{transform_indices = @transform_0, window_bounds = array<i64: 1, 8, 1024>}, {pipeline_mode = #tpu.pipeline_mode<synchronous>, transform_indices = @transform_1, window_bounds = array<i64: 8, 1>}, {pipeline_mode = #tpu.pipeline_mode<synchronous>, transform_indices = @transform_2, window_bounds = array<i64: 8, 1>}, {transform_indices = @transform_3, window_bounds = array<i64: 1, 8, 1024>}]} {
    %c0 = arith.constant 0 : index
    %c0_0 = arith.constant 0 : index
    %c0_1 = arith.constant 0 : index
    %0 = vector.load %arg2[%c0, %c0_0, %c0_1] : memref<1x8x1024xf32, #tpu.memory_space<vmem>>, vector<1x8x1024xf32>
    %1 = vector.shape_cast %0 : vector<1x8x1024xf32> to vector<8x1024xf32>
    %c0_2 = arith.constant 0 : index
    %c0_3 = arith.constant 0 : index
    %2 = vector.load %arg3[%c0_2, %c0_3] : memref<8x1xf32, #tpu.memory_space<vmem>>, vector<8x1xf32>
    %3 = vector.broadcast %2 : vector<8x1xf32> to vector<8x1024xf32>
    %4 = arith.mulf %1, %3 : vector<8x1024xf32>
    %c0_4 = arith.constant 0 : index
    %c0_5 = arith.constant 0 : index
    %5 = vector.load %arg4[%c0_4, %c0_5] : memref<8x1xf32, #tpu.memory_space<vmem>>, vector<8x1xf32>
    %6 = vector.broadcast %5 : vector<8x1xf32> to vector<8x1024xf32>
    %7 = arith.addf %4, %6 : vector<8x1024xf32>
    %cst = arith.constant 0.000000e+00 : f32
    %8 = vector.broadcast %cst : f32 to vector<8x1024xf32>
    %9 = arith.cmpf oge, %7, %8 : vector<8x1024xf32>
    %cst_6 = arith.constant 2.000000e-01 : f32
    %10 = vector.broadcast %cst_6 : f32 to vector<8x1024xf32>
    %11 = arith.mulf %10, %7 : vector<8x1024xf32>
    %12 = arith.select %9, %7, %11 : vector<8x1024xi1>, vector<8x1024xf32>
    %c0_7 = arith.constant 0 : index
    %c0_8 = arith.constant 0 : index
    %c0_9 = arith.constant 0 : index
    %13 = vector.load %arg5[%c0_7, %c0_8, %c0_9] : memref<1x8x1024xf32, #tpu.memory_space<vmem>>, vector<1x8x1024xf32>
    %14 = vector.shape_cast %13 : vector<1x8x1024xf32> to vector<8x1024xf32>
    %15 = vector.shape_cast %12 : vector<8x1024xf32> to vector<1x8x1024xf32>
    tpu.vector_store %arg5[%c0_7, %c0_8, %c0_9], %15 {strides = array<i32>} : memref<1x8x1024xf32, #tpu.memory_space<vmem>>, vector<1x8x1024xf32>,
    return
  }
  func.func @transform_0(%arg0: i32, %arg1: i32) -> (i32, i32, i32) {
    %c0_i32 = arith.constant 0 : i32
    %c0_i32_0 = arith.constant 0 : i32
    return %arg0, %c0_i32, %arg1 : i32, i32, i32
  }
  func.func @transform_1(%arg0: i32, %arg1: i32) -> (i32, i32) {
    %c0_i32 = arith.constant 0 : i32
    %c0_i32_0 = arith.constant 0 : i32
    %c0_i32_1 = arith.constant 0 : i32
    return %c0_i32, %c0_i32_0 : i32, i32
  }
  func.func @transform_2(%arg0: i32, %arg1: i32) -> (i32, i32) {
    %c0_i32 = arith.constant 0 : i32
    %c0_i32_0 = arith.constant 0 : i32
    %c0_i32_1 = arith.constant 0 : i32
    return %c0_i32, %c0_i32_0 : i32, i32
  }
  func.func @transform_3(%arg0: i32, %arg1: i32) -> (i32, i32, i32) {
    %c0_i32 = arith.constant 0 : i32
    %c0_i32_0 = arith.constant 0 : i32
    return %arg0, %c0_i32, %arg1 : i32, i32, i32
  }
}

</mosaic_0001>

<bundles_post_ra>
// kernel: dfc_decoder_block.3
= control target key start
LH: loop header
LB: loop body
LE: loop exit
PB: predicated region body
PF: predicated region fallthrough
CT: control target
= control target key end

     0   :  { %s449_s12 = smov 0   ;;  %s451_s13 = smov 0   ;;  %s503_s0 = inlined_call_operand.vmem [shape: f32[2,8,1024], index: 0, kind: input, shape index: {}, may-alias: {0,3}]   ;;  %s504_s1 = inlined_call_operand.vmem [shape: f32[8,1], index: 1, kind: input, shape index: {}]   ;;  %s505_s2 = inlined_call_operand.vmem [shape: f32[8,1], index: 2, kind: input, shape index: {}]   ;;  %s506_s3 = inlined_call_operand.vmem [shape: f32[2,8,1024], index: 3, kind: output, shape index: {}, may-alias: {0,3}]  }
   0x1   :  { %s453_s14 = smov 0  }
   0x2 LB: > { %s25_s15 = sadd.s32 1, %s422_s13  ;;  %p369_p0 = scmp.ge.s32.totalorder %s426_s14, 1  ;;  %s426_s14 = sphi %s453_s14, %s13_s14   ;;  %s422_s13 = sphi %s451_s13, %s508_s13   ;;  %s418_s12 = sphi %s449_s12, %s507_s12  }
   0x3   : > { %p27_p1 = scmp.ge.s32.totalorder %s25_s15, 2  ;;  %p158_p2 = scmp.lt.s32.totalorder %s426_s14, 3 }
   0x5   : > { %s510_s15 = smov (%p27_p1, %s25_s15), 0  ;;  %p159_p3 = pnand %p369_p0, %p158_p2 }
   0x6   : > { %v218_v0 = vld [vmem:[%s504_s1] sm:$0xff] (!%p159_p3)  ;;  %v428_v1 = vmov (!%p159_p3), 0   ;;  %p191_p4 = scmp.lt.s32.totalorder (!%p159_p3), %s418_s12, 1 }
   0x7   : > { %162 = sbr.rel (%p159_p3) target bundleno = 152 (0x98), region = 32  ;;  %403 = vset.pattern.permute.xlu0 (!%p159_p3), %v428_v1  ;;  %v232_v2 = vld [vmem:[%s505_s2] sm:$0xff] (!%p159_p3) }
   0x8   : > { %221 = vperm.xlu0 (!%p159_p3), %403, %v218_v0  }
   0xc   : > { %235 = vperm.xlu0 (!%p159_p3), %403, %v232_v2  }
   0xe   : > { %s512_s12 = smov (!%p191_p4, %s418_s12), 1 }
   0xf   : > { %s376_s20 = sshll.u32 %s512_s12, 6 }
  0x10   : > { %s198_s23 = scalar_lea.vmem %s503_s0, %s376_s20  ;;  %s208_s26 = scalar_lea.vmem %s506_s3, %s376_s20 }
  0x11   : > { %v210_v3 = vld [vmem:[%s198_s23] sm:$0xff]  ;;  %v211_v4 = vld [vmem:[%s198_s23 + $0x8] sm:$0xff]  ;;  %v212_v6 = vld [vmem:[%s198_s23 + $0x10] sm:$0xff] }
  0x12   : > { %v213_v7 = vld [vmem:[%s198_s23 + $0x18] sm:$0xff]  ;;  %v214_v8 = vld [vmem:[%s198_s23 + $0x20] sm:$0xff]  ;;  %v215_v9 = vld [vmem:[%s198_s23 + $0x28] sm:$0xff] }
  0x13   : > { %v216_v10 = vld [vmem:[%s198_s23 + $0x30] sm:$0xff]  ;;  %v217_v11 = vld [vmem:[%s198_s23 + $0x38] sm:$0xff] }
  0x87   : > { %v222_v5 = vpop.permute.xlu0 %221 }
  0x88   : > { %v224_v12 = vmul.f32 %v222_v5, %v210_v3  ;;  %v225_v13 = vmul.f32 %v222_v5, %v211_v4  ;;  %v226_v14 = vmul.f32 %v222_v5, %v212_v6  ;;  %v227_v15 = vmul.f32 %v222_v5, %v213_v7 }
  0x89   : > { %v228_v17 = vmul.f32 %v222_v5, %v214_v8  ;;  %v229_v18 = vmul.f32 %v222_v5, %v215_v9  ;;  %v230_v19 = vmul.f32 %v222_v5, %v216_v10  ;;  %v231_v20 = vmul.f32 %v222_v5, %v217_v11 }
  0x8b   : > { %v236_v16 = vpop.permute.xlu0 %235 }
  0x8c   : > { %v238_v21 = vadd.f32 %v236_v16, %v224_v12  ;;  %v239_v22 = vadd.f32 %v236_v16, %v225_v13  ;;  %v240_v23 = vadd.f32 %v236_v16, %v226_v14  ;;  %v241_v24 = vadd.f32 %v236_v16, %v227_v15 }
  0x8d   : > { %v242_v25 = vadd.f32 %v236_v16, %v228_v17  ;;  %v243_v26 = vadd.f32 %v236_v16, %v229_v18  ;;  %v244_v27 = vadd.f32 %v236_v16, %v230_v19  ;;  %v245_v28 = vadd.f32 %v236_v16, %v231_v20 }
  0x8e   : > { %vm246_vm0 = vcmp.ge.f32.partialorder %v238_v21, 0.0  ;;  %vm247_vm1 = vcmp.ge.f32.partialorder %v239_v22, 0.0  ;;  %vm248_vm2 = vcmp.ge.f32.partialorder %v240_v23, 0.0  ;;  %vm249_vm3 = vcmp.ge.f32.partialorder %v241_v24, 0.0 }
  0x8f   : > { %vm250_vm4 = vcmp.ge.f32.partialorder %v242_v25, 0.0  ;;  %vm251_vm5 = vcmp.ge.f32.partialorder %v243_v26, 0.0  ;;  %vm252_vm6 = vcmp.ge.f32.partialorder %v244_v27, 0.0  ;;  %vm253_vm7 = vcmp.ge.f32.partialorder %v245_v28, 0.0 }
  0x90   : > { %v254_v29 = vmul.f32 0.2, %v238_v21  ;;  %v255_v30 = vmul.f32 0.2, %v239_v22  ;;  %v256_v31 = vmul.f32 0.2, %v240_v23 }
  0x91   : > { %v257_v32 = vmul.f32 0.2, %v241_v24  ;;  %v258_v33 = vmul.f32 0.2, %v242_v25  ;;  %v259_v34 = vmul.f32 0.2, %v243_v26 }
  0x92   : > { %v260_v35 = vmul.f32 0.2, %v244_v27  ;;  %v261_v36 = vmul.f32 0.2, %v245_v28  ;;  %v262_v37 = vsel %vm246_vm0, %v238_v21, %v254_v29  ;;  %v263_v38 = vsel %vm247_vm1, %v239_v22, %v255_v30 }
  0x93   : > { %v264_v39 = vsel %vm248_vm2, %v240_v23, %v256_v31  ;;  %v265_v40 = vsel %vm249_vm3, %v241_v24, %v257_v32  ;;  %v266_v41 = vsel %vm250_vm4, %v242_v25, %v258_v33  ;;  %v267_v42 = vsel %vm251_vm5, %v243_v26, %v259_v34  ;;  %270 = vst [vmem:[%s208_s26] sm:$0xff] %v262_v37 }
  0x94   : > { %271 = vst [vmem:[%s208_s26 + $0x8] sm:$0xff] %v263_v38  ;;  %v268_v43 = vsel %vm252_vm6, %v244_v27, %v260_v35  ;;  %v269_v44 = vsel %vm253_vm7, %v245_v28, %v261_v36  ;;  %272 = vst [vmem:[%s208_s26 + $0x10] sm:$0xff] %v264_v39 }
  0x95   : > { %273 = vst [vmem:[%s208_s26 + $0x18] sm:$0xff] %v265_v40  ;;  %274 = vst [vmem:[%s208_s26 + $0x20] sm:$0xff] %v266_v41 }
  0x96   : > { %275 = vst [vmem:[%s208_s26 + $0x28] sm:$0xff] %v267_v42  ;;  %276 = vst [vmem:[%s208_s26 + $0x30] sm:$0xff] %v268_v43 }
  0x97   : > { %277 = vst [vmem:[%s208_s26 + $0x38] sm:$0xff] %v269_v44 }
  0x98 PF: > { %s13_s14 = sadd.s32 1, %s426_s14   ;;  %s507_s12 = smov %s422_s13 }
  0x99   : > { %p10_p5 = scmp.ge.s32.totalorder %s13_s14, 4   ;;  %s508_s13 = smov %s510_s15 }
  0x9b   :  { %12 = sbr.rel (!%p10_p5) target bundleno = 2 (0x2), region = 62 }

// kernel: dfc_decoder_block.2
= control target key start
LH: loop header
LB: loop body
LE: loop exit
PB: predicated region body
PF: predicated region fallthrough
CT: control target
= control target key end

     0   :  { %s4858_s12 = smov 0   ;;  %s4860_s13 = smov 0   ;;  %s8053_s0 = inlined_call_operand.vmem [shape: f32[2,4,2,10,34], index: 0, kind: input, shape index: {}]   ;;  %s8054_s1 = inlined_call_operand.vmem [shape: f32[8,36], index: 1, kind: input, shape index: {}]   ;;  %s8055_s2 = inlined_call_operand.vmem [shape: f32[2,8,1024], index: 2, kind: output, shape index: {0}]   ;;  %s8056_s3 = inlined_call_operand.vmem [shape: f32[2,2,8,2], index: 3, kind: output, shape index: {1}]  }
   0x1   :  { %s4862_s14 = smov 0   ;;  %s4864_s15 = smov 0  }
   0x2   :  { %s4866_s16 = smov 0   ;;  %s4868_s17 = smov 0  }
   0x3   :  { %s4870_s18 = smov 0  }
   0x4 LB: > { %s23_s19 = sadd.s32 1, %s4819_s16  ;;  %s26_s20 = sadd.s32 1, %s4823_s17  ;;  %s4827_s18 = sphi %s4870_s18, %s14_s18   ;;  %s4823_s17 = sphi %s4868_s17, %s8953_s17   ;;  %s4819_s16 = sphi %s4866_s16, %s8952_s16   ;;  %s4815_s15 = sphi %s4864_s15, %s8951_s15   ;;  %s4811_s14 = sphi %s4862_s14, %s8950_s14   ;;  %s4807_s13 = sphi %s4860_s13, %s8949_s13   ;;  %s4803_s12 = sphi %s4858_s12, %s8948_s12  }
   0x5   : > { %p24_p0 = scmp.ge.s32.totalorder %s23_s19, 2  ;;  %p42_p1 = scmp.ne.s32.totalorder %s4807_s13, %s4803_s12 }
   0x6   : > { %p43_p2 = scmp.eq.s32.totalorder %s4827_s18, 0  ;;  %s35_s24 = sadd.s32 1, %s4807_s13 }
   0x7   : > { %s8955_s19 = smov (%p24_p0, %s23_s19), 0  ;;  %s8957_s20 = smov (!%p24_p0, %s26_s20), %s4823_s17 }
   0x8   : > { %p44_p3 = por %p43_p2, %p42_p1  ;;  %p28_p4 = scmp.ge.s32.totalorder %s8957_s20, 2 }
   0x9   : > { %s31_s21 = ssub.s32 %s4819_s16, %s8955_s19  ;;  %p4469_p6 = scmp.ge.s32.totalorder %s4827_s18, 4 }
   0xa   : > { %s8959_s20 = smov (%p28_p4, %s8957_s20), 0 }
   0xb   : > { %s30_s22 = ssub.s32 %s4823_s17, %s8959_s20  ;;  %148 = sbr.rel (%p4469_p6) target bundleno = 29 (0x1d), region = 20 }
   0xc   : > { %s32_s23 = sor.u32 %s31_s21, %s30_s22 }
   0xd   : > { %p33_p5 = scmp.eq.s32.totalorder %s32_s23, 0 }
   0xf   : > { %s4909_s25 = scalar_select %p33_p5, %s4807_s13, %s35_s24  }
  0x12   : > { %151 = sbr.rel (!%p44_p3) target bundleno = 29 (0x1d), region = 24  ;;  %s153_s26 = sand.u32 (%p44_p3), 1, %s4807_s13  }
  0x13   : > { %s4471_s27 = sshll.u32 (%p44_p3), %s4819_s16, 1  ;;  %s4470_s28 = sshll.u32 (%p44_p3), %s153_s26, 6 }
  0x14   : > { %s4472_s29 = sshll.u32 (%p44_p3), %s4823_s17, 4  ;;  %s155_s8 = scalar_lea.vmem (%p44_p3), [#allocation2], %s4470_s28 }
  0x15   : > { %s158_s30 = sadd.s32 (%p44_p3), %s4472_s29, %s4471_s27 }
  0x16   : > { %s4473_s4 = sshll.u32 (%p44_p3), %s158_s30, 3 }
  0x17   : > { %s160_s7 = scalar_lea.vmem (%p44_p3), %s8053_s0, %s4473_s4 }
  0x18   : > { %v202_v0 = vld [vmem:[%s160_s7] sm:$0xff] (%p44_p3)  ;;  %v204_v1 = vld [vmem:[%s160_s7 + $0x8] sm:$0xff] (%p44_p3) }
  0x19   : > { %v206_v2 = vld [vmem:[%s160_s7 + $0x20] sm:$0xff]  ;;  %203 = vst [vmem:[%s155_s8] sm:$0xff] %v202_v0  ;;  %205 = vst [vmem:[%s155_s8 + $0x8] sm:$0xff] %v204_v1  ;;  %v208_v3 = vld [vmem:[%s160_s7 + $0x28] sm:$0xff] }
  0x1a   : > { %207 = vst [vmem:[%s155_s8 + $0x10] sm:$0xff] %v206_v2  ;;  %v210_v4 = vld [vmem:[%s160_s7 + $0x40] sm:$0xff]  ;;  %v212_v5 = vld [vmem:[%s160_s7 + $0x48] sm:$0xff]  ;;  %209 = vst [vmem:[%s155_s8 + $0x18] sm:$0xff] %v208_v3 }
  0x1b   : > { %211 = vst [vmem:[%s155_s8 + $0x20] sm:$0xff] %v210_v4  ;;  %213 = vst [vmem:[%s155_s8 + $0x28] sm:$0xff] %v212_v5  ;;  %v214_v6 = vld [vmem:[%s160_s7 + $0x60] sm:$0xff]  ;;  %v216_v7 = vld [vmem:[%s160_s7 + $0x68] sm:$0xff] }
  0x1c   : > { %215 = vst [vmem:[%s155_s8 + $0x30] sm:$0xff] %v214_v6  ;;  %217 = vst [vmem:[%s155_s8 + $0x38] sm:$0xff] %v216_v7 }
  0x1d PF: > { %p4474_p7 = scmp.ge.s32.totalorder %s4827_s18, 1  ;;  %p222_p8 = scmp.lt.s32.totalorder %s4827_s18, 5 }
  0x1f   : > { %p223_p9 = pnand %p4474_p7, %p222_p8 }
  0x21   : > { %226 = sbr.rel (%p223_p9) target bundleno = 1017 (0x3f9), region = 62 }
  0x28   : > { %s229_s9 = sand.u32 1, %s4803_s12   ;;  %v302_v8 = vlaneseq  ;;  %v4829_v9 = vmov 1966171168   ;;  %s4830_s12 = smov 127   ;;  %vm886_vm0 = vcmask 1040384   ;;  %vm887_vm1 = vcmask 1042434  }
  0x29   : > { %s4475_s10 = sshll.u32 %s229_s9, 6  ;;  %v300_v10 = vunpack.c.l.s4 %v4829_v9  ;;  %vm888_vm2 = vmor %vm886_vm0, %vm887_vm1  ;;  %vm889_vm3 = vcmask 1044484   ;;  %s4831_s21 = smov 126   ;;  %v4832_v47 = vmov 1934713408   ;;  %vm891_vm5 = vcmask 1046534  }
  0x2a   : > { %v4921_v11 = vshrl.u32 %v302_v8, 7  ;;  %s4923_s11 = scalar_lea.vmem [#allocation2], %s4475_s10  ;;  %v1895_v48 = vunpack.c.l.s4 %v4832_v47  ;;  %vm5010_vm4 = vmor %vm888_vm2, %vm889_vm3  ;;  %s4834_s22 = smov 32   ;;  %vm4081_vm7 = vcmask 261120   ;;  %vm4087_vm8 = vcmask 523264  }
  0x2b   : > { %v4926_v12 = vld [vmem:[%s4923_s11 + $0x20] sm:$0xff]  ;;  %v301_v13 = vunpack.c.0.s8 %v300_v10  ;;  %v4930_v15 = vld [vmem:[%s4923_s11 + $0x30] sm:$0xff]  ;;  %vm5038_vm6 = vmor %vm5010_vm4, %vm891_vm5  ;;  %s4835_s23 = smov 64   ;;  %s4836_s24 = smov 96   ;;  %vm4093_vm9 = vcmask 785408   ;;  %vm4149_vm10 = vcmask 1043456  }
  0x2c   : > { %v282_v14 = vld [vmem:[%s4923_s11] sm:$0xff]  ;;  %v4933_v16 = vld [vmem:[%s4923_s11 + $0x10] sm:$0xff]  ;;  %v4946_v22 = vsub.s32 0, %v4921_v11  ;;  %v440_v52 = vcombine.high %v4926_v12, %v4926_v12  ;;  %v511_v56 = vcombine.high %v4930_v15, %v4930_v15  ;;  %v1896_v61 = vunpack.c.0.s8 %v1895_v48  ;;  %s4476_s28 = sshll.u32 %s4811_s14, 2  ;;  %p265_p10 = scmp.lt.s32.totalorder %s4815_s15, 1 }
  0x2d   : > { %v4936_v17 = vsub.s32 %v301_v13, %v4921_v11  ;;  %v298_v43 = vcombine.high %v282_v14, %v282_v14  ;;  %v369_v51 = vcombine.high %v4933_v16, %v4933_v16  ;;  %vm4145_vm11 = vcmask 293888   ;;  %p267_p11 = scmp.lt.s32.totalorder %s4476_s28, 7  ;;  %p276_p12 = scmp.lt.s32.totalorder %s4811_s14, 1 }
  0x2e   : > { %8347 = vst [vmem:[#allocation4_spill] sm:$0xff] %v4946_v22  ;;  %s8961_s15 = smov (!%p265_p10, %s4815_s15), 1  ;;  %vm4322_vm12 = vcmask 7168   ;;  %vm4324_vm13 = vcmask 15360  }
  0x2f   : > { %8346 = vst [vmem:[#allocation3_spill] sm:$0xff] %v4936_v17  ;;  %v447_v18 = vrot.slane %v4926_v12, %v4936_v17  ;;  %v305_v19 = vrot.slane %v282_v14, %v4936_v17  ;;  %v518_v20 = vrot.slane %v4930_v15, %v4936_v17  ;;  %v376_v21 = vrot.slane %v4933_v16, %v4936_v17  ;;  %s8963_s28 = smov (!%p267_p11, %s4476_s28), 7  ;;  %s4477_s29 = sshll.u32 %s8961_s15, 3 }
  0x30   : > { %v5023_v55 = vrot.slane %v298_v43, %v4936_v17  ;;  %v5044_v0 = vrot.slane %v369_v51, %v4936_v17  ;;  %v5050_v4 = vrot.slane %v440_v52, %v4936_v17  ;;  %v5053_v5 = vrot.slane %v511_v56, %v4936_v17  ;;  %s270_s30 = sadd.s32 %s4477_s29, %s8963_s28  ;;  %s8965_s14 = smov (!%p276_p12, %s4811_s14), 1 }
  0x31   : > { %v4949_v23 = vrot.slane %v447_v18, %v4936_v17  ;;  %v4952_v24 = vrot.slane %v305_v19, %v4936_v17  ;;  %v4955_v25 = vrot.slane %v518_v20, %v4936_v17  ;;  %v4958_v26 = vrot.slane %v376_v21, %v4936_v17  ;;  %s4478_s4 = sshll.u32 %s270_s30, 3  ;;  %s4479_s8 = sshll.u32 %s8961_s15, 1 }
  0x32   : > { %v384_v33 = vcombine.high %v376_v21, %v376_v21  ;;  %v313_v36 = vcombine.high %v305_v19, %v305_v19  ;;  %v526_v37 = vcombine.high %v518_v20, %v518_v20  ;;  %v455_v38 = vcombine.high %v447_v18, %v447_v18  ;;  %s272_s7 = scalar_lea.vmem %s8055_s2, %s4478_s4  ;;  %s279_s9 = sadd.s32 %s4479_s8, %s8965_s14 }
  0x33   : > { %v485_v27 = vcombine.high %v4949_v23, %v4949_v23  ;;  %v343_v28 = vcombine.high %v4952_v24, %v4952_v24  ;;  %v556_v29 = vcombine.high %v4955_v25, %v4955_v25  ;;  %v414_v30 = vcombine.high %v4958_v26, %v4958_v26  ;;  %s4480_s10 = sshll.u32 %s279_s9, 3 }
  0x34   : > { %v4989_v39 = vrot.slane %v384_v33, %v4936_v17  ;;  %v4992_v40 = vrot.slane %v313_v36, %v4936_v17  ;;  %v4995_v41 = vrot.slane %v526_v37, %v4936_v17  ;;  %v4998_v42 = vrot.slane %v455_v38, %v4936_v17 }
  0x35   : > { %v4969_v31 = vrot.slane %v485_v27, %v4946_v22  ;;  %v4972_v32 = vrot.slane %v343_v28, %v4946_v22  ;;  %v4979_v34 = vrot.slane %v556_v29, %v4946_v22  ;;  %v4982_v35 = vrot.slane %v414_v30, %v4946_v22 }
  0x36   : > { %v416_v45 = vcombine.high %v4989_v39, %v4989_v39  ;;  %v345_v46 = vcombine.high %v4992_v40, %v4992_v40  ;;  %v558_v53 = vcombine.high %v4995_v41, %v4995_v41  ;;  %v487_v54 = vcombine.high %v4998_v42, %v4998_v42 }
  0x37   : > { %782 = vrot.lane.b32.xlu1 %v4969_v31, %s4830_s12  ;;  %746 = vrot.lane.b32.xlu0 %v4972_v32, %s4830_s12  ;;  %v918_v44 = vrot.slane %v4982_v35, 7  ;;  %v895_v49 = vrot.slane %v4972_v32, 7  ;;  %v964_v57 = vrot.slane %v4979_v34, 7  ;;  %v941_v63 = vrot.slane %v4969_v31, 7 }
  0x38   : > { %v637_v58 = vrot.slane %v416_v45, %v4946_v22  ;;  %v597_v59 = vrot.slane %v345_v46, %v4946_v22  ;;  %v717_v3 = vrot.slane %v558_v53, %v4946_v22  ;;  %v677_v7 = vrot.slane %v487_v54, %v4946_v22 }
  0x39   : > { %v920_v60 = vrot.slane %v918_v44, 2  ;;  %v897_v2 = vrot.slane %v895_v49, 2  ;;  %v5060_v8 = vrot.slane %v5023_v55, %v4936_v17  ;;  %v966_v10 = vrot.slane %v964_v57, 2 }
  0x3a   : > { %v921_v1 = vrot.slane %v637_v58, 7  ;;  %v898_v6 = vrot.slane %v597_v59, 7  ;;  %v5074_v13 = vrot.slane %v5044_v0, %v4936_v17  ;;  %v967_v15 = vrot.slane %v717_v3, 7 }
  0x3b   : > { %800 = vrot.lane.b32.xlu1 %v4979_v34, %s4830_s12  ;;  %764 = vrot.lane.b32.xlu0 %v4982_v35, %s4830_s12  ;;  %v943_v16 = vrot.slane %v941_v63, 2  ;;  %v5081_v18 = vsub.s32 %v1896_v61, %v4921_v11  ;;  %v5085_v19 = vrot.slane %v5050_v4, %v4936_v17  ;;  %v5089_v20 = vrot.slane %v5053_v5, %v4936_v17 }
  0x3c   : > { %v5064_v9 = vsel %vm5038_vm6, %v920_v60, %v921_v1  ;;  %v5070_v12 = vsel %vm5038_vm6, %v897_v2, %v898_v6  ;;  %v944_v21 = vrot.slane %v677_v7, 7  ;;  %v5095_v27 = vrot.slane %v5060_v8, %v4946_v22 }
  0x3d   : > { %8352 = vst [vmem:[#allocation5_spill] sm:$0xff] %v5064_v9  ;;  %8353 = vst [vmem:[#allocation6_spill] sm:$0xff] %v5070_v12  ;;  %v2109_v14 = vcombine.low %v5070_v12, %v5064_v9  ;;  %v5099_v28 = vrot.slane %v5074_v13, %v4946_v22  ;;  %v8061_v29 = vrot.slane %v5064_v9, 7  ;;  %v5104_v30 = vsel %vm5038_vm6, %v966_v10, %v967_v15 }
  0x3e   : > { %8354 = vst [vmem:[#allocation7_spill] sm:$0xff] %v5104_v30  ;;  %v5108_v33 = vrot.slane %v5089_v20, %v4946_v22  ;;  %v8059_v36 = vrot.slane %v5070_v12, 7  ;;  %v5116_v38 = vsel %vm5038_vm6, %v943_v16, %v944_v21  ;;  %v8058_v43 = vrot.slane %v5104_v30, 7 }
  0x3f   : > { %836 = vrot.lane.b32.xlu1 %v4982_v35, %s4831_s21  ;;  %818 = vrot.lane.b32.xlu0 %v4972_v32, %s4831_s21  ;;  %v5112_v37 = vrot.slane %v2109_v14, %v5081_v18  ;;  %8355 = vst [vmem:[#allocation8_spill] sm:$0xff] %v5116_v38  ;;  %v8057_v45 = vrot.slane %v5116_v38, 7  ;;  %v2118_v46 = vcombine.low %v5116_v38, %v5104_v30  ;;  %v923_v47 = vrot.slane %v921_v1, 2 }
  0x40   : > { %v5124_v48 = vrot.slane %v5085_v19, %v4946_v22  ;;  %v8072_v50 = vrot.slane %v5099_v28, 7  ;;  %v900_v51 = vrot.slane %v898_v6, 2  ;;  %v8073_v52 = vrot.slane %v5095_v27, 7 }
  0x41   : > { %v1389_v53 = vrot.slane %v8061_v29, 2  ;;  %v5133_v54 = vrot.slane %v2118_v46, %v5081_v18  ;;  %v969_v56 = vrot.slane %v967_v15, 2  ;;  %v8065_v60 = vrot.slane %v5108_v33, 7 }
  0x42   : > { %v5140_v61 = vsel %vm5038_vm6, %v923_v47, %v8072_v50  ;;  %v8066_v1 = vrot.slane %v5124_v48, 7  ;;  %v1364_v2 = vrot.slane %v8059_v36, 2  ;;  %v1439_v6 = vrot.slane %v8058_v43, 2 }
  0x43   : > { %872 = vrot.lane.b32.xlu1 %v4979_v34, %s4831_s21  ;;  %854 = vrot.lane.b32.xlu0 %v4969_v31, %s4831_s21  ;;  %v1414_v10 = vrot.slane %v8057_v45, 2  ;;  %v8064_v15 = vrot.slane %v5140_v61, 7  ;;  %v629_v47 = vrot.slane %v4989_v39, %v4946_v22  ;;  %v5423_v50 = vld.sshfl [vmem:[%s4923_s11 + $0x38] sm:$0x11 pattern:$0x75316420] }
  0x44   : > { %8361 = vst [vmem:[#allocation14_spill] sm:$0xff] %v5423_v50 }
  0x45   : > { %v5242_v36 = vrot.slane %v629_v47, 7 }
  0x47   : > { %766 = vrot.lane.b32.xlu1 %v637_v58, %s4830_s12  ;;  %748 = vrot.lane.b32.xlu0 %v597_v59, %s4830_s12  ;;  %8356 = vst [vmem:[#allocation9_spill] sm:$0xff] %v5242_v36 }
  0x4b   : > { %802 = vrot.lane.b32.xlu1 %v717_v3, %s4830_s12  ;;  %784 = vrot.lane.b32.xlu0 %v677_v7, %s4830_s12 }
  0x4f   : > { %838 = vrot.lane.b32.xlu1 %v637_v58, %s4831_s21  ;;  %820 = vrot.lane.b32.xlu0 %v597_v59, %s4831_s21  ;;  %v5146_v58 = vsel %vm5038_vm6, %v900_v51, %v8073_v52  ;;  %v946_v59 = vrot.slane %v944_v21, 2  ;;  %v5163_v21 = vsel %vm5038_vm6, %v969_v56, %v8065_v60  ;;  %v589_v51 = vrot.slane %v4992_v40, %v4946_v22 }
  0x50   : > { %v8063_v16 = vrot.slane %v5146_v58, 7  ;;  %v8060_v45 = vrot.slane %v5163_v21, 7 }
  0x51   : > { %v5169_v46 = vsel %vm5038_vm6, %v946_v59, %v8066_v1  ;;  %v1391_v59 = vsel %vm5038_vm6, %v1389_v53, %v8064_v15  ;;  %v669_v53 = vrot.slane %v4998_v42, %v4946_v22  ;;  %v585_v42 = vrot.slane %v4952_v24, %v4946_v22 }
  0x52   : > { %v8062_v56 = vrot.slane %v5169_v46, 7  ;;  %v1441_v39 = vsel %vm5038_vm6, %v1439_v6, %v8060_v45  ;;  %v5233_v24 = vrot.slane %v4949_v23, %v4946_v22  ;;  %v5244_v45 = vrot.slane %v589_v51, 7 }
  0x53   : > { %874 = vrot.lane.b32.xlu1 %v717_v3, %s4831_s21  ;;  %856 = vrot.lane.b32.xlu0 %v677_v7, %s4831_s21  ;;  %v1366_v3 = vsel %vm5038_vm6, %v1364_v2, %v8063_v16  ;;  %v709_v7 = vrot.slane %v4995_v41, %v4946_v22  ;;  %v5248_v29 = vrot.slane %v669_v53, 7  ;;  %v4498_v41 = vrot.slane %v5242_v36, 9 }
  0x54   : > { %v1416_v40 = vsel %vm5038_vm6, %v1414_v10, %v8062_v56  ;;  %v2163_v2 = vcombine.low %v1366_v3, %v1391_v59  ;;  %v344_v59 = vcombine.high %v5060_v8, %v5060_v8  ;;  %v415_v3 = vcombine.high %v5074_v13, %v5074_v13 }
  0x55   : > { %v2172_v43 = vcombine.low %v1416_v40, %v1441_v39  ;;  %v5237_v8 = vrot.slane %v4955_v25, %v4946_v22  ;;  %v4487_v13 = vrot.slane %v5233_v24, 9  ;;  %8358 = vst [vmem:[#allocation11_spill] sm:$0xff] %v5248_v29  ;;  %v4497_v14 = vrot.slane %v5244_v45, 9 }
  0x56   : > { %v5204_v6 = vrot.slane %v2163_v2, %v5081_v18  ;;  %v5229_v39 = vrot.slane %v344_v59, %v4946_v22  ;;  %v5246_v59 = vrot.slane %v709_v7, 7  ;;  %v5255_v23 = vrot.slane %v415_v3, %v4946_v22 }
  0x57   : > { %762 = vrot.lane.b32.xlu1 %v629_v47, %s4830_s12  ;;  %744 = vrot.lane.b32.xlu0 %v589_v51, %s4830_s12  ;;  %v5207_v10 = vrot.slane %v2172_v43, %v5081_v18  ;;  %v5221_v43 = vrot.slane %v4958_v26, %v4946_v22  ;;  %v4485_v26 = vrot.slane %v585_v42, 9  ;;  %v4488_v2 = vrot.slane %v5237_v8, 9 }
  0x58   : > { %8357 = vst [vmem:[#allocation10_spill] sm:$0xff] %v5246_v59  ;;  %v8071_v15 = vrot.slane %v5255_v23, 7  ;;  %v4500_v60 = vrot.slane %v5246_v59, 9  ;;  %v4499_v1 = vrot.slane %v5248_v29, 9 }
  0x59   : > { %v4486_v40 = vrot.slane %v5221_v43, 9  ;;  %v1147_v25 = vsel %vm5038_vm6, %v4485_v26, %v5244_v45 }
  0x5b   : > { %798 = vrot.lane.b32.xlu1 %v709_v7, %s4830_s12  ;;  %780 = vrot.lane.b32.xlu0 %v669_v53, %s4830_s12 }
  0x5f   : > { %834 = vrot.lane.b32.xlu1 %v629_v47, %s4831_s21  ;;  %816 = vrot.lane.b32.xlu0 %v589_v51, %s4831_s21  ;;  %v1150_v47 = vsel %vm5038_vm6, %v4486_v40, %v5242_v36  ;;  %v1153_v51 = vsel %vm5038_vm6, %v4487_v13, %v5248_v29  ;;  %v557_v13 = vcombine.high %v5089_v20, %v5089_v20 }
  0x60   : > { %v1893_v3 = vcombine.low %v1147_v25, %v1150_v47  ;;  %v314_v25 = vcombine.high %v5023_v55, %v5023_v55 }
  0x61   : > { %v5299_v20 = vrot.slane %v557_v13, %v4946_v22  ;;  %v963_v13 = vrot.slane %v5246_v59, 2 }
  0x62   : > { %v5287_v56 = vrot.slane %v1893_v3, %v5081_v18  ;;  %v917_v3 = vrot.slane %v5242_v36, 2 }
  0x63   : > { %870 = vrot.lane.b32.xlu1 %v709_v7, %s4831_s21  ;;  %852 = vrot.lane.b32.xlu0 %v669_v53, %s4831_s21  ;;  %v1156_v7 = vsel %vm5038_vm6, %v4488_v2, %v5246_v59  ;;  %v486_v53 = vcombine.high %v5085_v19, %v5085_v19  ;;  %v385_v2 = vcombine.high %v5044_v0, %v5044_v0 }
  0x64   : > { %v1902_v26 = vcombine.low %v1153_v51, %v1156_v7  ;;  %v5307_v51 = vrot.slane %v314_v25, %v4936_v17  ;;  %v527_v7 = vcombine.high %v5053_v5, %v5053_v5  ;;  %v8074_v25 = vrot.slane %v5229_v39, 7 }
  0x65   : > { %v5280_v40 = vrot.slane %v486_v53, %v4946_v22  ;;  %v5302_v0 = vrot.slane %v385_v2, %v4936_v17  ;;  %v456_v53 = vcombine.high %v5050_v4, %v5050_v4  ;;  %v940_v2 = vrot.slane %v5248_v29, 2 }
  0x66   : > { %v5290_v19 = vrot.slane %v1902_v26, %v5081_v18  ;;  %v894_v26 = vrot.slane %v5244_v45, 2  ;;  %v346_v16 = vcombine.high %v5307_v51, %v5307_v51  ;;  %v5334_v5 = vrot.slane %v527_v7, %v4936_v17 }
  0x67   : > { %742 = vrot.lane.b32.xlu0 %v585_v42, %s4830_s12  ;;  %750 = vrot.lane.b32.xlu1 %v5095_v27, %s4830_s12  ;;  %v417_v55 = vcombine.high %v5302_v0, %v5302_v0  ;;  %v5337_v47 = vrot.slane %v456_v53, %v4936_v17  ;;  %v5359_v7 = vsel %vm5038_vm6, %v963_v13, %v964_v57  ;;  %v932_v13 = vrot.slane %v8071_v15, 2 }
  0x68   : > { %v5365_v35 = vsel %vm5038_vm6, %v940_v2, %v941_v63  ;;  %v8068_v53 = vrot.slane %v5359_v7, 7  ;;  %v5376_v31 = vrot.slane %v346_v16, %v4946_v22  ;;  %v559_v34 = vcombine.high %v5334_v5, %v5334_v5 }
  0x69   : > { %v5331_v4 = vrot.slane %v417_v55, %v4946_v22  ;;  %v5353_v55 = vsel %vm5038_vm6, %v894_v26, %v895_v49  ;;  %v8067_v49 = vrot.slane %v5365_v35, 7  ;;  %v488_v57 = vcombine.high %v5337_v47, %v5337_v47 }
  0x6a   : > { %v8069_v32 = vrot.slane %v5353_v55, 7  ;;  %v1435_v16 = vsel %vm5038_vm6, %v4500_v60, %v8068_v53  ;;  %v909_v26 = vrot.slane %v8074_v25, 2  ;;  %v8077_v2 = vrot.slane %v5280_v40, 7 }
  0x6b   : > { %760 = vrot.lane.b32.xlu1 %v5221_v43, %s4830_s12  ;;  %754 = vrot.lane.b32.xlu0 %v5229_v39, %s4830_s12  ;;  %v8078_v60 = vrot.slane %v5299_v20, 7  ;;  %v5417_v53 = vld.sshfl [vmem:[%s4923_s11 + $0x18] sm:$0x11 pattern:$0x75316420] }
  0x6c   : > { %8359 = vst [vmem:[#allocation12_spill] sm:$0xff] %v5417_v53 }
  0x6d   : > { %v978_v59 = vrot.slane %v8078_v60, 2 }
  0x6f   : > { %772 = vrot.lane.b32.xlu1 %v5255_v23, %s4830_s12  ;;  %768 = vrot.lane.b32.xlu0 %v5099_v28, %s4830_s12 }
  0x73   : > { %786 = vrot.lane.b32.xlu1 %v5124_v48, %s4830_s12  ;;  %778 = vrot.lane.b32.xlu0 %v5233_v24, %s4830_s12 }
  0x77   : > { %796 = vrot.lane.b32.xlu1 %v5237_v8, %s4830_s12  ;;  %790 = vrot.lane.b32.xlu0 %v5280_v40, %s4830_s12 }
  0x7b   : > { %808 = vrot.lane.b32.xlu1 %v5299_v20, %s4830_s12  ;;  %804 = vrot.lane.b32.xlu0 %v5108_v33, %s4830_s12 }
  0x7f   : > { %822 = vrot.lane.b32.xlu1 %v5095_v27, %s4831_s21  ;;  %814 = vrot.lane.b32.xlu0 %v585_v42, %s4831_s21  ;;  %v5347_v42 = vsel %vm5038_vm6, %v917_v3, %v918_v44  ;;  %v1410_v3 = vsel %vm5038_vm6, %v4499_v1, %v8067_v49  ;;  %v5411_v1 = vrot.slane %v559_v34, %v4946_v22  ;;  %v955_v34 = vrot.slane %v8077_v2, 2 }
  0x80   : > { %v8070_v44 = vrot.slane %v5347_v42, 7  ;;  %v5414_v49 = vrot.slane %v488_v57, %v4946_v22  ;;  %v1956_v15 = vcombine.low %v1410_v3, %v1435_v16 }
  0x82   : > { %v1385_v63 = vsel %vm5038_vm6, %v4498_v41, %v8070_v44  ;;  %v910_v41 = vrot.slane %v5376_v31, 7  ;;  %v956_v57 = vrot.slane %v5414_v49, 7 }
  0x83   : > { %832 = vrot.lane.b32.xlu1 %v5221_v43, %s4831_s21  ;;  %826 = vrot.lane.b32.xlu0 %v5229_v39, %s4831_s21  ;;  %v1360_v43 = vsel %vm5038_vm6, %v4497_v14, %v8069_v32  ;;  %v933_v14 = vrot.slane %v5331_v4, 7  ;;  %v5420_v32 = vld.sshfl [vmem:[%s4923_s11 + $0x8] sm:$0x11 pattern:$0x75316420] }
  0x84   : > { %8360 = vst [vmem:[#allocation13_spill] sm:$0xff] %v5420_v32  ;;  %v1947_v44 = vcombine.low %v1360_v43, %v1385_v63  ;;  %v5427_v52 = vsel %vm5038_vm6, %v909_v26, %v910_v41  ;;  %v979_v63 = vrot.slane %v5411_v1, 7  ;;  %v5444_v43 = vld.sshfl [vmem:[%s4923_s11 + $0x28] sm:$0x11 pattern:$0x75316420]  ;;  %v5452_v26 = vrot.slane %v1956_v15, %v5081_v18 }
  0x85   : > { %8362 = vst [vmem:[#allocation15_spill] sm:$0xff] %v5427_v52  ;;  %v5431_v25 = vsel %vm5038_vm6, %v932_v13, %v933_v14  ;;  %8364 = vst [vmem:[#allocation17_spill] sm:$0xff] %v5444_v43  ;;  %v432_v13 = vrot.slane %v5417_v53, %v4936_v17  ;;  %v361_v2 = vrot.slane %v5420_v32, %v4936_v17 }
  0x86   : > { %8363 = vst [vmem:[#allocation16_spill] sm:$0xff] %v5431_v25  ;;  %v2541_v16 = vcombine.low %v5427_v52, %v5431_v25  ;;  %v5449_v3 = vrot.slane %v1947_v44, %v5081_v18  ;;  %8366 = vst [vmem:[#allocation19_spill] sm:$0xff] %v5452_v26  ;;  %v503_v60 = vrot.slane %v5444_v43, %v4936_v17  ;;  %v8101_v43 = vrot.slane %v5427_v52, 7 }
  0x87   : > { %844 = vrot.lane.b32.xlu1 %v5255_v23, %s4831_s21  ;;  %840 = vrot.lane.b32.xlu0 %v5099_v28, %s4831_s21  ;;  %v5464_v29 = vsel %vm5038_vm6, %v955_v34, %v956_v57  ;;  %v5468_v15 = vsel %vm5038_vm6, %v978_v59, %v979_v63  ;;  %v5490_v32 = vrot.slane %v361_v2, %v4946_v22  ;;  %v8373_v59 = vrot.slane %v5431_v25, 7 }
  0x88   : > { %8365 = vst [vmem:[#allocation18_spill] sm:$0xff] %v5449_v3  ;;  %8367 = vst [vmem:[#allocation20_spill] sm:$0xff] %v5464_v29  ;;  %v5475_v44 = vrot.slane %v2541_v16, %v5081_v18  ;;  %v5496_v53 = vrot.slane %v503_v60, %v4946_v22  ;;  %v1376_v60 = vrot.slane %v8101_v43, 2  ;;  %v912_v26 = vrot.slane %v910_v41, 2 }
  0x89   : > { %8368 = vst [vmem:[#allocation21_spill] sm:$0xff] %v5468_v15  ;;  %8372 = vst [vmem:[#allocation25_spill] sm:$0xff] %v5490_v32  ;;  %v1401_v34 = vrot.slane %v8373_v59, 2  ;;  %v8102_v3 = vrot.slane %v5490_v32, 7  ;;  %v981_v36 = vrot.slane %v979_v63, 2  ;;  %v958_v2 = vrot.slane %v956_v57, 2 }
  0x8a   : > { %8369 = vst [vmem:[#allocation22_spill] sm:$0xff] %v5475_v44  ;;  %v8109_v59 = vrot.slane %v5496_v53, 7  ;;  %v8377_v57 = vrot.slane %v5464_v29, 7 }
  0x8b   : > { %858 = vrot.lane.b32.xlu1 %v5124_v48, %s4831_s21  ;;  %850 = vrot.lane.b32.xlu0 %v5233_v24, %s4831_s21  ;;  %v574_v24 = vrot.slane %v5423_v50, %v4936_v17  ;;  %v2550_v17 = vcombine.low %v5464_v29, %v5468_v15  ;;  %v5484_v50 = vrot.slane %v432_v13, %v4946_v22  ;;  %v935_v13 = vrot.slane %v933_v14, 2 }
  0x8c   : > { %v5526_v41 = vsel %vm5038_vm6, %v912_v26, %v8102_v3  ;;  %v1426_v63 = vrot.slane %v8377_v57, 2  ;;  %v5547_v3 = vsel %vm5038_vm6, %v958_v2, %v8109_v59  ;;  %v4833_v59 = vmov 1983009808  }
  0x8d   : > { %8370 = vst [vmem:[#allocation23_spill] sm:$0xff] %v5484_v50  ;;  %v5493_v16 = vrot.slane %v574_v24, %v4946_v22  ;;  %v8103_v24 = vrot.slane %v5484_v50, 7  ;;  %8376 = vst [vmem:[#allocation27_spill] sm:$0xff] %v5526_v41 }
  0x8f   : > { %868 = vrot.lane.b32.xlu1 %v5237_v8, %s4831_s21  ;;  %862 = vrot.lane.b32.xlu0 %v5280_v40, %s4831_s21  ;;  %v5487_v8 = vrot.slane %v2550_v17, %v5081_v18  ;;  %v5516_v17 = vsel %vm5038_vm6, %v935_v13, %v8103_v24  ;;  %v8104_v14 = vrot.slane %v5493_v16, 7 }
  0x90   : > { %8374 = vst [vmem:[#allocation26_spill] sm:$0xff] %v5516_v17  ;;  %v8106_v43 = vrot.slane %v5516_v17, 7 }
  0x91   : > { %8371 = vst [vmem:[#allocation24_spill] sm:$0xff] %v5487_v8  ;;  %v8375_v8 = vrot.slane %v5468_v15, 7  ;;  %v5540_v13 = vsel %vm5038_vm6, %v981_v36, %v8104_v14  ;;  %v8108_v36 = vrot.slane %v5547_v3, 7 }
  0x92   : > { %v8107_v26 = vrot.slane %v5540_v13, 7  ;;  %v1403_v57 = vsel %vm5038_vm6, %v1401_v34, %v8106_v43  ;;  %v5621_v43 = vrot.slane %v5334_v5, %v4946_v22 }
  0x93   : > { %880 = vrot.lane.b32.xlu1 %v5299_v20, %s4831_s21  ;;  %876 = vrot.lane.b32.xlu0 %v5108_v33, %s4831_s21  ;;  %v1451_v44 = vrot.slane %v8375_v8, 2  ;;  %v8105_v8 = vrot.slane %v5526_v41, 7  ;;  %v1428_v34 = vsel %vm5038_vm6, %v1426_v63, %v8108_v36  ;;  %v5633_v41 = vunpack.c.l.s4 %v4833_v59 }
  0x94   : > { %v8390_v59 = vrot.slane %v5108_v33, 7 }
  0x95   : > { %v1378_v24 = vsel %vm5038_vm6, %v1376_v60, %v8105_v8  ;;  %v1453_v14 = vsel %vm5038_vm6, %v1451_v44, %v8107_v26  ;;  %v8386_v26 = vrot.slane %v5229_v39, 7 }
  0x96   : > { %v2595_v2 = vcombine.low %v1378_v24, %v1403_v57  ;;  %v2604_v60 = vcombine.low %v1428_v34, %v1453_v14  ;;  %v5625_v24 = vrot.slane %v5337_v47, %v4946_v22  ;;  %v8388_v47 = vrot.slane %v5099_v28, 7 }
  0x97   : > { %774 = vrot.lane.b32.xlu1 %v5331_v4, %s4830_s12  ;;  %756 = vrot.lane.b32.xlu0 %v5376_v31, %s4830_s12  ;;  %v972_v17 = vrot.slane %v8390_v59, 2 }
  0x98   : > { %v5575_v44 = vrot.slane %v2595_v2, %v5081_v18  ;;  %v5578_v8 = vrot.slane %v2604_v60, %v5081_v18  ;;  %v926_v60 = vrot.slane %v8388_v47, 2 }
  0x9a   : > { %8378 = vst [vmem:[#allocation28_spill] sm:$0xff] %v5575_v44  ;;  %8379 = vst [vmem:[#allocation29_spill] sm:$0xff] %v5578_v8  ;;  %v973_v8 = vrot.slane %v5621_v43, 7 }
  0x9b   : > { %810 = vrot.lane.b32.xlu1 %v5411_v1, %s4830_s12  ;;  %792 = vrot.lane.b32.xlu0 %v5414_v49, %s4830_s12 }
  0x9c   : > { %v5675_v59 = vsel %vm5038_vm6, %v972_v17, %v973_v8  ;;  %v975_v47 = vrot.slane %v973_v8, 2 }
  0x9d   : > { %8394 = vst [vmem:[#allocation39_spill] sm:$0xff] %v5675_v59 }
  0x9f   : > { %846 = vrot.lane.b32.xlu1 %v5331_v4, %s4831_s21  ;;  %828 = vrot.lane.b32.xlu0 %v5376_v31, %s4831_s21 }
  0xa3   : > { %882 = vrot.lane.b32.xlu1 %v5411_v1, %s4831_s21  ;;  %864 = vrot.lane.b32.xlu0 %v5414_v49, %s4831_s21  ;;  %v5600_v49 = vrot.slane %v5307_v51, %v4946_v22  ;;  %v645_v51 = vrot.slane %v5302_v0, %v4946_v22  ;;  %v8387_v0 = vrot.slane %v5095_v27, 7  ;;  %v8389_v22 = vrot.slane %v5124_v48, 7 }
  0xa5   : > { %v904_v63 = vrot.slane %v5600_v49, 7  ;;  %v903_v5 = vrot.slane %v8387_v0, 2  ;;  %v927_v39 = vrot.slane %v645_v51, 7  ;;  %v2833_v0 = vunpack.c.0.s8 %v5633_v41 }
  0xa7   : > { %1007 = vrot.lane.b32.xlu1 %v5064_v9, %s4830_s12  ;;  %989 = vrot.lane.b32.xlu0 %v5070_v12, %s4830_s12  ;;  %v906_v57 = vrot.slane %v904_v63, 2  ;;  %v5665_v33 = vsel %vm5038_vm6, %v926_v60, %v927_v39 }
  0xa8   : > { %v8402_v60 = vrot.slane %v5665_v33, 7 }
  0xa9   : > { %v5590_v4 = vpop.permute.xlu1 %782  ;;  %v5592_v31 = vpop.permute.xlu0 %746  ;;  %v5631_v36 = vsel %vm5038_vm6, %v906_v57, %v8386_v26  ;;  %v949_v26 = vrot.slane %v8389_v22, 2  ;;  %v950_v57 = vrot.slane %v5625_v24, 7  ;;  %v5661_v22 = vsel %vm5038_vm6, %v903_v5, %v904_v63 }
  0xaa   : > { %8380 = vst [vmem:[#allocation30_spill] sm:$0xff] %v5590_v4  ;;  %8381 = vst [vmem:[#allocation31_spill] sm:$0xff] %v5592_v31  ;;  %v8124_v44 = vrot.slane %v5592_v31, 7 }
  0xab   : > { %1043 = vrot.lane.b32.xlu1 %v5104_v30, %s4830_s12  ;;  %1025 = vrot.lane.b32.xlu0 %v5116_v38, %s4830_s12  ;;  %v5671_v41 = vsel %vm5038_vm6, %v949_v26, %v950_v57  ;;  %v952_v31 = vrot.slane %v950_v57, 2 }
  0xac   : > { %8393 = vst [vmem:[#allocation38_spill] sm:$0xff] %v5671_v41  ;;  %v1164_v63 = vrot.slane %v8124_v44, 2  ;;  %v8398_v44 = vrot.slane %v5661_v22, 7 }
  0xad   : > { %v5602_v1 = vpop.permute.xlu1 %800  ;;  %v5604_v14 = vpop.permute.xlu0 %764 }
  0xae   : > { %8382 = vst [vmem:[#allocation32_spill] sm:$0xff] %v5602_v1  ;;  %8383 = vst [vmem:[#allocation33_spill] sm:$0xff] %v5604_v14  ;;  %v8397_v26 = vrot.slane %v5604_v14, 7  ;;  %v1370_v28 = vrot.slane %v8398_v44, 2  ;;  %v8399_v14 = vrot.slane %v5590_v4, 7  ;;  %v8406_v4 = vrot.slane %v5255_v23, 7 }
  0xaf   : > { %1079 = vrot.lane.b32.xlu1 %v5064_v9, %s4831_s21  ;;  %1061 = vrot.lane.b32.xlu0 %v5070_v12, %s4831_s21  ;;  %v929_v9 = vrot.slane %v927_v39, 2 }
  0xb0   : > { %v1214_v15 = vrot.slane %v8399_v14, 2 }
  0xb1   : > { %v5611_v34 = vpop.permute.xlu1 %836  ;;  %v5613_v2 = vpop.permute.xlu0 %818  ;;  %v5727_v25 = vsel %vm5038_vm6, %v929_v9, %v8406_v4 }
  0xb2   : > { %8384 = vst [vmem:[#allocation34_spill] sm:$0xff] %v5611_v34  ;;  %8385 = vst [vmem:[#allocation35_spill] sm:$0xff] %v5613_v2 }
  0xb3   : > { %1115 = vrot.lane.b32.xlu1 %v5104_v30, %s4831_s21  ;;  %1097 = vrot.lane.b32.xlu0 %v5116_v38, %s4831_s21  ;;  %v1189_v30 = vrot.slane %v8397_v26, 2 }
  0xb5   : > { %v5650_v38 = vpop.permute.xlu1 %872  ;;  %v5652_v27 = vpop.permute.xlu0 %854 }
  0xb6   : > { %8391 = vst [vmem:[#allocation36_spill] sm:$0xff] %v5650_v38  ;;  %8392 = vst [vmem:[#allocation37_spill] sm:$0xff] %v5652_v27  ;;  %v8143_v9 = vrot.slane %v5650_v38, 7 }
  0xb7   : > { %770 = vrot.lane.b32.xlu1 %v645_v51, %s4830_s12  ;;  %752 = vrot.lane.b32.xlu0 %v5600_v49, %s4830_s12 }
  0xb9   : > { %v5681_v5 = vpop.permute.xlu1 %766  ;;  %v5683_v48 = vpop.permute.xlu0 %748 }
  0xba   : > { %8395 = vst [vmem:[#allocation40_spill] sm:$0xff] %v5681_v5  ;;  %8396 = vst [vmem:[#allocation41_spill] sm:$0xff] %v5683_v48  ;;  %v8132_v12 = vrot.slane %v5681_v5, 7  ;;  %v8134_v17 = vrot.slane %v5683_v48, 7  ;;  %v1395_v5 = vrot.slane %v8402_v60, 2  ;;  %v8404_v48 = vrot.slane %v5675_v59, 7 }
  0xbb   : > { %806 = vrot.lane.b32.xlu1 %v5621_v43, %s4830_s12  ;;  %788 = vrot.lane.b32.xlu0 %v5625_v24, %s4830_s12  ;;  %v8407_v60 = vrot.slane %v5611_v34, 7 }
  0xbc   : > { %v1191_v26 = vsel %vm5038_vm6, %v1189_v30, %v8132_v12  ;;  %v1166_v39 = vsel %vm5038_vm6, %v1164_v63, %v8134_v17  ;;  %v8403_v30 = vrot.slane %v5671_v41, 7  ;;  %v1445_v63 = vrot.slane %v8404_v48, 2 }
  0xbd   : > { %v5709_v29 = vpop.permute.xlu1 %802  ;;  %v5711_v8 = vpop.permute.xlu0 %784  ;;  %v8405_v17 = vrot.slane %v5602_v1, 7  ;;  %v1289_v41 = vrot.slane %v8407_v60, 2  ;;  %v2127_v48 = vcombine.low %v1166_v39, %v1191_v26 }
  0xbe   : > { %8400 = vst [vmem:[#allocation42_spill] sm:$0xff] %v5709_v29  ;;  %8401 = vst [vmem:[#allocation43_spill] sm:$0xff] %v5711_v8  ;;  %v1420_v12 = vrot.slane %v8403_v30, 2  ;;  %v8147_v57 = vrot.slane %v5709_v29, 7  ;;  %v8142_v14 = vrot.slane %v5711_v8, 7  ;;  %v8408_v30 = vrot.slane %v5613_v2, 7 }
  0xbf   : > { %v1239_v44 = vrot.slane %v8405_v17, 2  ;;  %842 = vrot.lane.b32.xlu1 %v645_v51, %s4831_s21  ;;  %824 = vrot.lane.b32.xlu0 %v5600_v49, %s4831_s21  ;;  %v8409_v17 = vrot.slane %v5299_v20, 7  ;;  %v8411_v49 = vrot.slane %v5280_v40, 7 }
  0xc0   : > { %v1264_v59 = vrot.slane %v8408_v30, 2  ;;  %v1216_v51 = vsel %vm5038_vm6, %v1214_v15, %v8142_v14  ;;  %v8150_v30 = vrot.slane %v5631_v36, 7  ;;  %v1339_v14 = vrot.slane %v8143_v9, 2 }
  0xc1   : > { %v5740_v23 = vsel %vm5038_vm6, %v975_v47, %v8409_v17  ;;  %v1241_v4 = vsel %vm5038_vm6, %v1239_v44, %v8147_v57  ;;  %v5755_v20 = vsel %vm5038_vm6, %v952_v31, %v8411_v49  ;;  %v8144_v47 = vrot.slane %v5652_v27, 7  ;;  %v5758_v39 = vpop.permute.xlu1 %838  ;;  %v5760_v60 = vpop.permute.xlu0 %820 }
  0xc2   : > { %8410 = vst [vmem:[#allocation44_spill] sm:$0xff] %v5740_v23  ;;  %8412 = vst [vmem:[#allocation45_spill] sm:$0xff] %v5755_v20  ;;  %v2136_v26 = vcombine.low %v1216_v51, %v1241_v4  ;;  %v8151_v44 = vrot.slane %v5727_v25, 7  ;;  %v8146_v17 = vrot.slane %v5758_v39, 7  ;;  %v8145_v15 = vrot.slane %v5760_v60, 7 }
  0xc3   : > { %8413 = vst [vmem:[#allocation46_spill] sm:$0xff] %v5758_v39  ;;  %8414 = vst [vmem:[#allocation47_spill] sm:$0xff] %v5760_v60  ;;  %v8149_v40 = vrot.slane %v5740_v23, 7  ;;  %v8148_v31 = vrot.slane %v5755_v20, 7  ;;  %v5769_v49 = vsub.s32 %v2833_v0, %v4921_v11  ;;  %v5772_v4 = vrot.slane %v2127_v48, %v5081_v18  ;;  %878 = vrot.lane.b32.xlu1 %v5621_v43, %s4831_s21 }
  0xc4   : > { %v5775_v51 = vrot.slane %v2136_v26, %v5081_v18  ;;  %860 = vrot.lane.b32.xlu0 %v5625_v24, %s4831_s21  ;;  %v1291_v11 = vsel %vm5038_vm6, %v1289_v41, %v8146_v17  ;;  %v1266_v0 = vsel %vm5038_vm6, %v1264_v59, %v8145_v15  ;;  %v1314_v48 = vrot.slane %v8144_v47, 2 }
  0xc5   : > { %v5795_v24 = vpop.permute.xlu1 %874  ;;  %v5797_v26 = vpop.permute.xlu0 %856  ;;  %v1397_v41 = vsel %vm5038_vm6, %v1395_v5, %v8151_v44  ;;  %v1372_v59 = vsel %vm5038_vm6, %v1370_v28, %v8150_v30  ;;  %v1447_v15 = vsel %vm5038_vm6, %v1445_v63, %v8149_v40  ;;  %v1422_v17 = vsel %vm5038_vm6, %v1420_v12, %v8148_v31 }
  0xc6   : > { %v3058_v43 = vcombine.low %v5772_v4, %v5775_v51  ;;  %8415 = vst [vmem:[#allocation48_spill] sm:$0xff] %v5795_v24  ;;  %8416 = vst [vmem:[#allocation49_spill] sm:$0xff] %v5797_v26  ;;  %v8154_v9 = vrot.slane %v5795_v24, 7  ;;  %v8153_v47 = vrot.slane %v5797_v26, 7  ;;  %v2145_v5 = vcombine.low %v1266_v0, %v1291_v11 }
  0xc7   : > { %1009 = vrot.lane.b32.xlu1 %v5140_v61, %s4830_s12  ;;  %v8417_v28 = vcombine.low %v5112_v37, %v5133_v54  ;;  %v2379_v40 = vcombine.low %v1372_v59, %v1397_v41  ;;  %v2388_v30 = vcombine.low %v1422_v17, %v1447_v15  ;;  %v8485_v39 = vrot.slane %v5347_v42, 7 }
  0xc8   : > { %991 = vrot.lane.b32.xlu0 %v5146_v58, %s4830_s12  ;;  %v1341_v63 = vsel %vm5038_vm6, %v1339_v14, %v8154_v9  ;;  %v1316_v12 = vsel %vm5038_vm6, %v1314_v48, %v8153_v47  ;;  %v3072_v44 = vrot.slane %v3058_v43, %v5769_v49  ;;  %v8436_v47 = vrot.slane %v5496_v53, 7 }
  0xc9   : > { %v3065_v57 = vrot.slane %v8417_v28, %v5769_v49  ;;  %v2154_v11 = vcombine.low %v1316_v12, %v1341_v63  ;;  %v5833_v0 = vpop.permute.xlu1 %762  ;;  %v5835_v31 = vpop.permute.xlu0 %744  ;;  %v5839_v28 = vrot.slane %v2145_v5, %v5081_v18  ;;  %v5855_v17 = vrot.slane %v2379_v40, %v5081_v18 }
  0xca   : > { %8418 = vst [vmem:[#allocation50_spill] sm:$0xff] %v5833_v0  ;;  %8419 = vst [vmem:[#allocation51_spill] sm:$0xff] %v5835_v31  ;;  %v5858_v15 = vrot.slane %v2388_v30, %v5081_v18  ;;  %v5905_v9 = vrot.slane %v8436_v47, 2  ;;  %v8443_v47 = vrot.slane %v5540_v13, 7 }
  0xcb   : > { %8420 = vst [vmem:[#allocation52_spill] sm:$0xff] %v5839_v28  ;;  %v5842_v27 = vrot.slane %v2154_v11, %v5081_v18  ;;  %1045 = vrot.lane.b32.xlu1 %v5163_v21, %s4830_s12  ;;  %v5848_v14 = vcombine.low %v3065_v57, %v3072_v44  ;;  %8425 = vst [vmem:[#allocation57_spill] sm:$0xff] %v5855_v17  ;;  %v8427_v57 = vcombine.low %v5204_v6, %v5207_v10 }
  0xcc   : > { %1027 = vrot.lane.b32.xlu0 %v5169_v46, %s4830_s12  ;;  %8426 = vst [vmem:[#allocation58_spill] sm:$0xff] %v5858_v15  ;;  %8437 = vst [vmem:[#allocation67_spill] sm:$0xff] %v5905_v9  ;;  %v1430_v38 = vrot.slane %v5905_v9, 7  ;;  %v1454_v2 = vrot.slane %v8443_v47, 2  ;;  %v8175_v47 = vrot.slane %v5833_v0, 7  ;;  %v8484_v0 = vrot.slane %v5140_v61, 7 }
  0xcd   : > { %8421 = vst [vmem:[#allocation53_spill] sm:$0xff] %v5842_v27  ;;  %8422 = vst [vmem:[#allocation54_spill] sm:$0xff] %v5848_v14  ;;  %v5850_v48 = vpop.permute.xlu1 %798  ;;  %v5852_v41 = vpop.permute.xlu0 %780  ;;  %v3074_v43 = vcombine.low %v5839_v28, %v5842_v27  ;;  %v5870_v44 = vrot.slane %v8427_v57, %v5769_v49  ;;  %v8439_v14 = vrot.slane %v5493_v16, 7 }
  0xce   : > { %8423 = vst [vmem:[#allocation55_spill] sm:$0xff] %v5850_v48  ;;  %8424 = vst [vmem:[#allocation56_spill] sm:$0xff] %v5852_v41 }
  0xcf   : > { %1081 = vrot.lane.b32.xlu1 %v5140_v61, %s4831_s21  ;;  %8428 = vst [vmem:[#allocation59_spill] sm:$0xff] %v5870_v44  ;;  %v5873_v40 = vrot.slane %v3074_v43, %v5769_v49  ;;  %v8438_v44 = vrot.slane %v5547_v3, 7 }
  0xd0   : > { %1063 = vrot.lane.b32.xlu0 %v5146_v58, %s4831_s21 }
  0xd1   : > { %8429 = vst [vmem:[#allocation60_spill] sm:$0xff] %v5873_v40  ;;  %v5875_v30 = vpop.permute.xlu1 %834  ;;  %v5877_v59 = vpop.permute.xlu0 %816  ;;  %v1429_v40 = vrot.slane %v8438_v44, 2 }
  0xd2   : > { %8430 = vst [vmem:[#allocation61_spill] sm:$0xff] %v5875_v30  ;;  %8431 = vst [vmem:[#allocation62_spill] sm:$0xff] %v5877_v59 }
  0xd3   : > { %1117 = vrot.lane.b32.xlu1 %v5163_v21, %s4831_s21 }
  0xd4   : > { %1099 = vrot.lane.b32.xlu0 %v5169_v46, %s4831_s21 }
  0xd5   : > { %v5887_v12 = vpop.permute.xlu1 %870  ;;  %v5889_v11 = vpop.permute.xlu0 %852 }
  0xd6   : > { %8432 = vst [vmem:[#allocation63_spill] sm:$0xff] %v5887_v12  ;;  %8433 = vst [vmem:[#allocation64_spill] sm:$0xff] %v5889_v11  ;;  %v8199_v26 = vrot.slane %v5887_v12, 7 }
  0xd7   : > { %776 = vrot.lane.b32.xlu1 %v5484_v50, %s4830_s12 }
  0xd8   : > { %758 = vrot.lane.b32.xlu0 %v5490_v32, %s4830_s12 }
  0xd9   : > { %v743_v43 = vpop.permute.xlu0 %742  ;;  %v5895_v57 = vpop.permute.xlu1 %750 }
  0xda   : > { %8434 = vst [vmem:[#allocation65_spill] sm:$0xff] %v5895_v57  ;;  %v5915_v57 = vrot.slane %v8439_v14, 2  ;;  %v5931_v14 = vsel %vm5038_vm6, %v1429_v40, %v1430_v38  ;;  %v8178_v38 = vrot.slane %v5835_v31, 7 }
  0xdb   : > { %812 = vrot.lane.b32.xlu1 %v5493_v16, %s4830_s12  ;;  %8444 = vst [vmem:[#allocation71_spill] sm:$0xff] %v5931_v14 }
  0xdc   : > { %794 = vrot.lane.b32.xlu0 %v5496_v53, %s4830_s12  ;;  %8440 = vst [vmem:[#allocation68_spill] sm:$0xff] %v5915_v57  ;;  %v1455_v34 = vrot.slane %v5915_v57, 7  ;;  %v4489_v57 = vrot.slane %v743_v43, 9  ;;  %v8176_v43 = vrot.slane %v5852_v41, 7  ;;  %v8195_v41 = vrot.slane %v5877_v59, 7 }
  0xdd   : > { %v761_v63 = vpop.permute.xlu1 %760  ;;  %v5901_v5 = vpop.permute.xlu0 %754 }
  0xde   : > { %8435 = vst [vmem:[#allocation66_spill] sm:$0xff] %v5901_v5  ;;  %v4490_v44 = vrot.slane %v761_v63, 9  ;;  %v8177_v63 = vrot.slane %v5850_v48, 7 }
  0xdf   : > { %848 = vrot.lane.b32.xlu1 %v5484_v50, %s4831_s21 }
  0xe0   : > { %830 = vrot.lane.b32.xlu0 %v5490_v32, %s4831_s21 }
  0xe1   : > { %v5918_v15 = vpop.permute.xlu1 %772  ;;  %v5920_v17 = vpop.permute.xlu0 %768 }
  0xe2   : > { %8441 = vst [vmem:[#allocation69_spill] sm:$0xff] %v5918_v15  ;;  %8442 = vst [vmem:[#allocation70_spill] sm:$0xff] %v5920_v17  ;;  %v5937_v17 = vsel %vm5038_vm6, %v1454_v2, %v1455_v34  ;;  %v8476_v50 = vrot.slane %v5918_v15, 7 }
  0xe3   : > { %884 = vrot.lane.b32.xlu1 %v5493_v16, %s4831_s21  ;;  %8446 = vst [vmem:[#allocation73_spill] sm:$0xff] %v5937_v17  ;;  %v1160_v16 = vsel %vm5038_vm6, %v4489_v57, %v8178_v38 }
  0xe4   : > { %866 = vrot.lane.b32.xlu0 %v5496_v53, %s4831_s21  ;;  %v1185_v53 = vsel %vm5038_vm6, %v4490_v44, %v8175_v47  ;;  %v1201_v31 = vrot.slane %v8476_v50, 2 }
  0xe5   : > { %v5933_v9 = vpop.permute.xlu1 %786  ;;  %v779_v1 = vpop.permute.xlu0 %778  ;;  %v1911_v14 = vcombine.low %v1160_v16, %v1185_v53 }
  0xe6   : > { %8445 = vst [vmem:[#allocation72_spill] sm:$0xff] %v5933_v9  ;;  %v4491_v34 = vrot.slane %v779_v1, 9  ;;  %v8460_v9 = vld [vmem:[#allocation16_spill] sm:$0xff] }
  0xe7   : > { %1005 = vrot.lane.b32.xlu1 %v5347_v42, %s4830_s12  ;;  %v5976_v53 = vrot.slane %v1911_v14, %v5081_v18  ;;  %v8452_v14 = vcombine.low %v5287_v56, %v5290_v19 }
  0xe8   : > { %987 = vrot.lane.b32.xlu0 %v5353_v55, %s4830_s12  ;;  %v1210_v1 = vsel %vm5038_vm6, %v4491_v34, %v8176_v43 }
  0xe9   : > { %v797_v2 = vpop.permute.xlu1 %796  ;;  %v5951_v40 = vpop.permute.xlu0 %790  ;;  %8450 = vst [vmem:[#allocation77_spill] sm:$0xff] %v5976_v53 }
  0xea   : > { %8447 = vst [vmem:[#allocation74_spill] sm:$0xff] %v5951_v40  ;;  %v4492_v17 = vrot.slane %v797_v2, 9 }
  0xeb   : > { %1041 = vrot.lane.b32.xlu1 %v5359_v7, %s4830_s12 }
  0xec   : > { %1023 = vrot.lane.b32.xlu0 %v5365_v35, %s4830_s12  ;;  %v1235_v44 = vsel %vm5038_vm6, %v4492_v17, %v8177_v63 }
  0xed   : > { %v1920_v47 = vcombine.low %v1210_v1, %v1235_v44  ;;  %v5971_v57 = vpop.permute.xlu1 %808  ;;  %v5973_v16 = vpop.permute.xlu0 %804  ;;  %v5993_v44 = vrot.slane %v8452_v14, %v5769_v49 }
  0xee   : > { %8448 = vst [vmem:[#allocation75_spill] sm:$0xff] %v5971_v57  ;;  %8449 = vst [vmem:[#allocation76_spill] sm:$0xff] %v5973_v16 }
  0xef   : > { %v5979_v2 = vrot.slane %v1920_v47, %v5081_v18  ;;  %1077 = vrot.lane.b32.xlu1 %v5347_v42, %s4831_s21  ;;  %8453 = vst [vmem:[#allocation79_spill] sm:$0xff] %v5993_v44 }
  0xf0   : > { %1059 = vrot.lane.b32.xlu0 %v5353_v55, %s4831_s21 }
  0xf1   : > { %8451 = vst [vmem:[#allocation78_spill] sm:$0xff] %v5979_v2  ;;  %v2830_v17 = vcombine.low %v5976_v53, %v5979_v2  ;;  %v5987_v34 = vpop.permute.xlu1 %822  ;;  %v815_v1 = vpop.permute.xlu0 %814  ;;  %v8458_v2 = vld [vmem:[#allocation9_spill] sm:$0xff] }
  0xf2   : > { %v4493_v44 = vrot.slane %v815_v1, 9  ;;  %v8198_v1 = vrot.slane %v5889_v11, 7 }
  0xf3   : > { %1113 = vrot.lane.b32.xlu1 %v5359_v7, %s4831_s21  ;;  %v6000_v47 = vrot.slane %v2830_v17, %v5769_v49 }
  0xf4   : > { %1095 = vrot.lane.b32.xlu0 %v5365_v35, %s4831_s21  ;;  %v1260_v24 = vsel %vm5038_vm6, %v4493_v44, %v8195_v41  ;;  %v8204_v44 = vrot.slane %v5901_v5, 7  ;;  %v8473_v41 = vld [vmem:[#allocation19_spill] sm:$0xff] }
  0xf5   : > { %8454 = vst [vmem:[#allocation80_spill] sm:$0xff] %v6000_v47  ;;  %v833_v43 = vpop.permute.xlu1 %832  ;;  %v6002_v63 = vpop.permute.xlu0 %826  ;;  %v8194_v47 = vrot.slane %v5875_v30, 7  ;;  %v8462_v30 = vld [vmem:[#allocation38_spill] sm:$0xff] }
  0xf6   : > { %8455 = vst [vmem:[#allocation81_spill] sm:$0xff] %v6002_v63  ;;  %v4494_v17 = vrot.slane %v833_v43, 9 }
  0xf7   : > { %993 = vrot.lane.b32.xlu1 %v5661_v22, %s4830_s12 }
  0xf8   : > { %985 = vrot.lane.b32.xlu0 %v5244_v45, %s4830_s12  ;;  %v1285_v48 = vsel %vm5038_vm6, %v4494_v17, %v8194_v47  ;;  %v8463_v17 = vld [vmem:[#allocation11_spill] sm:$0xff] }
  0xf9   : > { %v6010_v14 = vpop.permute.xlu1 %844  ;;  %v6012_v53 = vpop.permute.xlu0 %840 }
  0xfa   : > { %8456 = vst [vmem:[#allocation82_spill] sm:$0xff] %v6010_v14  ;;  %8457 = vst [vmem:[#allocation83_spill] sm:$0xff] %v6012_v53  ;;  %v2001_v53 = vcombine.low %v5353_v55, %v5347_v42 }
  0xfb   : > { %1003 = vrot.lane.b32.xlu1 %v8458_v2, %s4830_s12 }
  0xfc   : > { %997 = vrot.lane.b32.xlu0 %v5427_v52, %s4830_s12 }
  0xfd   : > { %v6018_v16 = vpop.permute.xlu1 %858  ;;  %v851_v38 = vpop.permute.xlu0 %850 }
  0xfe   : > { %8459 = vst [vmem:[#allocation9_spill] sm:$0xff] %v6018_v16  ;;  %v4495_v43 = vrot.slane %v851_v38, 9  ;;  %v1929_v16 = vcombine.low %v1260_v24, %v1285_v48 }
  0xff   : > { %1015 = vrot.lane.b32.xlu1 %v8460_v9, %s4830_s12 }
 0x100   : > { %1011 = vrot.lane.b32.xlu0 %v5665_v33, %s4830_s12  ;;  %v1310_v38 = vsel %vm5038_vm6, %v4495_v43, %v8198_v1  ;;  %v6057_v59 = vrot.slane %v1929_v16, %v5081_v18  ;;  %v8468_v43 = vld [vmem:[#allocation10_spill] sm:$0xff] }
 0x101   : > { %v869_v28 = vpop.permute.xlu1 %868  ;;  %v6030_v27 = vpop.permute.xlu0 %862 }
 0x102   : > { %8461 = vst [vmem:[#allocation16_spill] sm:$0xff] %v6030_v27  ;;  %v4496_v32 = vrot.slane %v869_v28, 9  ;;  %8466 = vst [vmem:[#allocation84_spill] sm:$0xff] %v6057_v59 }
 0x103   : > { %1029 = vrot.lane.b32.xlu1 %v8462_v30, %s4830_s12 }
 0x104   : > { %1021 = vrot.lane.b32.xlu0 %v8463_v17, %s4830_s12  ;;  %v1335_v47 = vsel %vm5038_vm6, %v4496_v32, %v8199_v26  ;;  %v8469_v32 = vld [vmem:[#allocation20_spill] sm:$0xff] }
 0x105   : > { %v1938_v28 = vcombine.low %v1310_v38, %v1335_v47  ;;  %v6051_v24 = vpop.permute.xlu1 %880  ;;  %v6053_v48 = vpop.permute.xlu0 %876  ;;  %v1176_v47 = vrot.slane %v8204_v44, 2  ;;  %v8480_v44 = vrot.slane %v5951_v40, 7 }
 0x106   : > { %8464 = vst [vmem:[#allocation38_spill] sm:$0xff] %v6051_v24  ;;  %8465 = vst [vmem:[#allocation11_spill] sm:$0xff] %v6053_v48 }
 0x107   : > { %v6060_v11 = vrot.slane %v1938_v28, %v5081_v18  ;;  %1039 = vrot.lane.b32.xlu1 %v8468_v43, %s4830_s12  ;;  %v8472_v28 = vld [vmem:[#allocation18_spill] sm:$0xff]  ;;  %v1226_v15 = vrot.slane %v8480_v44, 2 }
 0x108   : > { %1033 = vrot.lane.b32.xlu0 %v8469_v32, %s4830_s12  ;;  %v8474_v12 = vcombine.low %v8472_v28, %v8473_v41 }
 0x109   : > { %8467 = vst [vmem:[#allocation85_spill] sm:$0xff] %v6060_v11  ;;  %v2846_v1 = vcombine.low %v6057_v59, %v6060_v11  ;;  %v6071_v26 = vpop.permute.xlu1 %774  ;;  %v6073_v16 = vpop.permute.xlu0 %756  ;;  %v8477_v59 = vld [vmem:[#allocation21_spill] sm:$0xff]  ;;  %v8478_v11 = vld [vmem:[#allocation39_spill] sm:$0xff] }
 0x10a   : > { %8470 = vst [vmem:[#allocation10_spill] sm:$0xff] %v6071_v26  ;;  %8471 = vst [vmem:[#allocation86_spill] sm:$0xff] %v6073_v16  ;;  %v6079_v48 = vrot.slane %v8474_v12, %v5769_v49  ;;  %v8215_v38 = vrot.slane %v6071_v26, 7  ;;  %v8216_v5 = vrot.slane %v6073_v16, 7  ;;  %v8483_v26 = vrot.slane %v5971_v57, 7 }
 0x10b   : > { %1051 = vrot.lane.b32.xlu1 %v8477_v59, %s4830_s12  ;;  %v6091_v60 = vrot.slane %v2846_v1, %v5769_v49 }
 0x10c   : > { %8475 = vst [vmem:[#allocation18_spill] sm:$0xff] %v6079_v48  ;;  %1047 = vrot.lane.b32.xlu0 %v8478_v11, %s4830_s12  ;;  %v1203_v50 = vsel %vm5038_vm6, %v1201_v31, %v8215_v38  ;;  %v1178_v12 = vsel %vm5038_vm6, %v1176_v47, %v8216_v5  ;;  %v1251_v29 = vrot.slane %v8483_v26, 2  ;;  %v1392_v26 = vrot.slane %v8484_v0, 2 }
 0x10d   : > { %8479 = vst [vmem:[#allocation19_spill] sm:$0xff] %v6091_v60  ;;  %v6105_v8 = vpop.permute.xlu1 %810  ;;  %v6107_v1 = vpop.permute.xlu0 %792  ;;  %v2559_v5 = vcombine.low %v1178_v12, %v1203_v50  ;;  %v1386_v31 = vrot.slane %v8485_v39, 2  ;;  %v8488_v12 = vrot.slane %v5146_v58, 7  ;;  %v8490_v0 = vrot.slane %v6010_v14, 7 }
 0x10e   : > { %8481 = vst [vmem:[#allocation39_spill] sm:$0xff] %v6105_v8  ;;  %8482 = vst [vmem:[#allocation87_spill] sm:$0xff] %v6107_v1  ;;  %v8486_v38 = vrot.slane %v6105_v8, 7  ;;  %v8487_v44 = vrot.slane %v6107_v1, 7 }
 0x10f   : > { %1065 = vrot.lane.b32.xlu1 %v5661_v22, %s4831_s21  ;;  %v1367_v48 = vrot.slane %v8488_v12, 2  ;;  %v1301_v40 = vrot.slane %v8490_v0, 2  ;;  %v8493_v12 = vrot.slane %v5169_v46, 7  ;;  %v8496_v0 = vld [vmem:[#allocation5_spill] sm:$0xff] }
 0x110   : > { %1057 = vrot.lane.b32.xlu0 %v5244_v45, %s4831_s21  ;;  %v1253_v47 = vsel %vm5038_vm6, %v1251_v29, %v8486_v38  ;;  %v1228_v50 = vsel %vm5038_vm6, %v1226_v15, %v8487_v44  ;;  %v8489_v45 = vrot.slane %v6002_v63, 7  ;;  %v8497_v38 = vrot.slane %v8496_v0, 7 }
 0x111   : > { %v2568_v39 = vcombine.low %v1228_v50, %v1253_v47  ;;  %v6139_v57 = vpop.permute.xlu1 %846  ;;  %v6141_v8 = vpop.permute.xlu0 %828  ;;  %v1417_v63 = vrot.slane %v8493_v12, 2  ;;  %v6152_v47 = vrot.slane %v2559_v5, %v5081_v18  ;;  %v8498_v29 = vrot.slane %v5353_v55, 7 }
 0x112   : > { %v1276_v60 = vrot.slane %v8489_v45, 2  ;;  %8491 = vst [vmem:[#allocation88_spill] sm:$0xff] %v6139_v57  ;;  %8492 = vst [vmem:[#allocation89_spill] sm:$0xff] %v6141_v8  ;;  %v8225_v15 = vrot.slane %v6139_v57, 7  ;;  %v8228_v44 = vrot.slane %v6141_v8, 7  ;;  %v2226_v45 = vcombine.low %v5169_v46, %v5163_v21 }
 0x113   : > { %8494 = vst [vmem:[#allocation90_spill] sm:$0xff] %v6152_v47  ;;  %v6155_v50 = vrot.slane %v2568_v39, %v5081_v18  ;;  %1075 = vrot.lane.b32.xlu1 %v8458_v2, %s4831_s21  ;;  %v1388_v12 = vsel %vm5038_vm6, %v1386_v31, %v8497_v38  ;;  %v1361_v46 = vrot.slane %v8498_v29, 2  ;;  %v8499_v39 = vrot.slane %v5359_v7, 7 }
 0x114   : > { %1069 = vrot.lane.b32.xlu0 %v5427_v52, %s4831_s21  ;;  %v1303_v5 = vsel %vm5038_vm6, %v1301_v40, %v8225_v15  ;;  %v1278_v2 = vsel %vm5038_vm6, %v1276_v60, %v8228_v44  ;;  %v8500_v0 = vrot.slane %v5365_v35, 7  ;;  %v8501_v40 = vld [vmem:[#allocation22_spill] sm:$0xff]  ;;  %v8502_v15 = vld [vmem:[#allocation24_spill] sm:$0xff]  ;;  %v8504_v60 = vrot.slane %v6030_v27, 7 }
 0x115   : > { %8495 = vst [vmem:[#allocation91_spill] sm:$0xff] %v6155_v50  ;;  %v1436_v14 = vrot.slane %v8499_v39, 2  ;;  %v3662_v31 = vcombine.low %v6152_v47, %v6155_v50  ;;  %v6181_v29 = vpop.permute.xlu1 %882  ;;  %v6183_v38 = vpop.permute.xlu0 %864  ;;  %v8503_v8 = vcombine.low %v8501_v40, %v8502_v15  ;;  %v8505_v39 = vrot.slane %v6051_v24, 7 }
 0x116   : > { %v1411_v52 = vrot.slane %v8500_v0, 2  ;;  %v1326_v44 = vrot.slane %v8504_v60, 2  ;;  %v8237_v0 = vrot.slane %v6181_v29, 7  ;;  %v8506_v47 = vrot.slane %v5163_v21, 7  ;;  %v8507_v60 = vld [vmem:[#allocation6_spill] sm:$0xff] }
 0x117   : > { %v3669_v57 = vrot.slane %v8503_v8, %v5769_v49  ;;  %v1351_v1 = vrot.slane %v8505_v39, 2  ;;  %v2577_v20 = vcombine.low %v1278_v2, %v1303_v5  ;;  %1087 = vrot.lane.b32.xlu1 %v8460_v9, %s4831_s21  ;;  %v3676_v8 = vrot.slane %v3662_v31, %v5769_v49  ;;  %v8510_v5 = vld [vmem:[#allocation7_spill] sm:$0xff] }
 0x118   : > { %v1442_v50 = vrot.slane %v8506_v47, 2  ;;  %1083 = vrot.lane.b32.xlu0 %v5665_v33, %s4831_s21  ;;  %v8508_v39 = vrot.slane %v8507_v60, 7  ;;  %v2010_v21 = vcombine.low %v5365_v35, %v5359_v7  ;;  %v8509_v55 = vrot.slane %v6183_v38, 7  ;;  %v8512_v60 = vld [vmem:[#allocation8_spill] sm:$0xff] }
 0x119   : > { %v1353_v42 = vsel %vm5038_vm6, %v1351_v1, %v8237_v0  ;;  %v8511_v2 = vrot.slane %v8510_v5, 7  ;;  %v6228_v27 = vpop.permute.xlu0 %989  ;;  %v6230_v1 = vcombine.low %v3669_v57, %v3676_v8  ;;  %v8518_v5 = vrot.slane %v5665_v33, 7 }
 0x11a   : > { %v1363_v16 = vsel %vm5038_vm6, %v1361_v46, %v8508_v39  ;;  %v1328_v47 = vsel %vm5038_vm6, %v1326_v44, %v8509_v55  ;;  %v8513_v46 = vrot.slane %v8512_v60, 7  ;;  %v6226_v39 = vpop.permute.xlu1 %1007  ;;  %8515 = vst [vmem:[#allocation22_spill] sm:$0xff] %v6228_v27  ;;  %v4521_v44 = vcombine.high %v5112_v37, %v5133_v54 }
 0x11b   : > { %v1438_v31 = vsel %vm5038_vm6, %v1436_v14, %v8511_v2  ;;  %v2586_v35 = vcombine.low %v1328_v47, %v1353_v42  ;;  %8514 = vst [vmem:[#allocation5_spill] sm:$0xff] %v6226_v39  ;;  %8516 = vst [vmem:[#allocation24_spill] sm:$0xff] %v6230_v1  ;;  %v8517_v55 = vrot.slane %v5661_v22, 7  ;;  %v8519_v42 = vrot.slane %v8462_v30, 7  ;;  %1101 = vrot.lane.b32.xlu1 %v8462_v30, %s4831_s21 }
 0x11c   : > { %v1413_v7 = vsel %vm5038_vm6, %v1411_v52, %v8513_v46  ;;  %v1394_v52 = vsel %vm5038_vm6, %v1392_v26, %v8518_v5  ;;  %v8520_v57 = vrot.slane %v8478_v11, 7  ;;  %v6251_v54 = vrot.slane %v2577_v20, %v5081_v18  ;;  %1093 = vrot.lane.b32.xlu0 %v8463_v17, %s4831_s21 }
 0x11d   : > { %v1369_v14 = vsel %vm5038_vm6, %v1367_v48, %v8517_v55  ;;  %v1419_v47 = vsel %vm5038_vm6, %v1417_v63, %v8519_v42  ;;  %v6254_v48 = vrot.slane %v2586_v35, %v5081_v18  ;;  %v8523_v63 = vcombine.low %v5146_v58, %v5140_v61  ;;  %v6273_v35 = vpop.permute.xlu0 %1025  ;;  %v8526_v61 = vld [vmem:[#allocation28_spill] sm:$0xff]  ;;  %v8527_v58 = vld [vmem:[#allocation29_spill] sm:$0xff] }
 0x11e   : > { %v1444_v37 = vsel %vm5038_vm6, %v1442_v50, %v8520_v57  ;;  %8521 = vst [vmem:[#allocation6_spill] sm:$0xff] %v6251_v54  ;;  %v6267_v50 = vrot.slane %v2226_v45, %v5081_v18  ;;  %v2055_v20 = vcombine.low %v1363_v16, %v1388_v12  ;;  %v2064_v8 = vcombine.low %v1413_v7, %v1438_v31  ;;  %v6271_v46 = vpop.permute.xlu1 %1043 }
 0x11f   : > { %8522 = vst [vmem:[#allocation7_spill] sm:$0xff] %v6254_v48  ;;  %v6264_v26 = vrot.slane %v8523_v63, %v5081_v18  ;;  %v2008_v2 = vrot.slane %v2001_v53, %v5081_v18  ;;  %v2017_v60 = vrot.slane %v2010_v21, %v5081_v18  ;;  %8524 = vst [vmem:[#allocation8_spill] sm:$0xff] %v6271_v46  ;;  %1111 = vrot.lane.b32.xlu1 %v8468_v43, %s4831_s21 }
 0x120   : > { %8525 = vst [vmem:[#allocation92_spill] sm:$0xff] %v6273_v35  ;;  %v3678_v17 = vcombine.low %v6251_v54, %v6254_v48  ;;  %v8528_v55 = vcombine.low %v8526_v61, %v8527_v58  ;;  %v2271_v45 = vcombine.low %v1369_v14, %v1394_v52  ;;  %v2280_v16 = vcombine.low %v1419_v47, %v1444_v37 }
 0x121   : > { %1105 = vrot.lane.b32.xlu0 %v8469_v32, %s4831_s21  ;;  %v4524_v53 = vcombine.high %v5204_v6, %v5207_v10  ;;  %v3213_v21 = vcombine.low %v6264_v26, %v6267_v50  ;;  %v4527_v31 = vcombine.high %v6264_v26, %v6267_v50  ;;  %v2062_v7 = vrot.slane %v2055_v20, %v5081_v18  ;;  %v6300_v47 = vpop.permute.xlu0 %1061  ;;  %v8533_v50 = vld [vmem:[#allocation12_spill] sm:$0xff] }
 0x122   : > { %v6281_v5 = vrot.slane %v8528_v55, %v5769_v49  ;;  %v6290_v12 = vrot.slane %v3678_v17, %v5769_v49  ;;  %v2071_v14 = vrot.slane %v2064_v8, %v5081_v18  ;;  %v2880_v43 = vcombine.low %v2008_v2, %v2017_v60  ;;  %v6298_v42 = vpop.permute.xlu1 %1079  ;;  %8532 = vst [vmem:[#allocation94_spill] sm:$0xff] %v6300_v47  ;;  %v8534_v8 = vld [vmem:[#allocation13_spill] sm:$0xff]  ;;  %v8537_v17 = vld [vmem:[#allocation26_spill] sm:$0xff]  ;;  %v8538_v55 = vld [vmem:[#allocation27_spill] sm:$0xff] }
 0x123   : > { %v4515_v52 = vcombine.high %v2008_v2, %v2017_v60  ;;  %8531 = vst [vmem:[#allocation93_spill] sm:$0xff] %v6298_v42  ;;  %v6303_v6 = vrot.slane %v4521_v44, %v5769_v49  ;;  %v2278_v57 = vrot.slane %v2271_v45, %v5081_v18  ;;  %v2325_v37 = vcombine.low %v5661_v22, %v5665_v33  ;;  %v8535_v22 = vld [vmem:[#allocation14_spill] sm:$0xff]  ;;  %v8536_v60 = vld [vmem:[#allocation17_spill] sm:$0xff] }
 0x124   : > { %8529 = vst [vmem:[#allocation28_spill] sm:$0xff] %v6281_v5  ;;  %8530 = vst [vmem:[#allocation29_spill] sm:$0xff] %v6290_v12  ;;  %v2287_v63 = vrot.slane %v2280_v16, %v5081_v18  ;;  %v2334_v26 = vcombine.low %v8462_v30, %v8478_v11  ;;  %1123 = vrot.lane.b32.xlu1 %v8477_v59, %s4831_s21  ;;  %v6322_v2 = vrot.slane %v4524_v53, %v5769_v49 }
 0x125   : > { %1119 = vrot.lane.b32.xlu0 %v8478_v11, %s4831_s21  ;;  %v2649_v45 = vcombine.low %v8538_v55, %v8537_v17  ;;  %v3031_v16 = vcombine.low %v2062_v7, %v2071_v14  ;;  %v6332_v0 = vpop.permute.xlu0 %1097  ;;  %v4509_v11 = vcombine.high %v5287_v56, %v5290_v19  ;;  %v6337_v53 = vrot.slane %v2880_v43, %v5769_v49 }
 0x126   : > { %v6330_v10 = vpop.permute.xlu1 %1115  ;;  %8540 = vst [vmem:[#allocation13_spill] sm:$0xff] %v6332_v0  ;;  %v6340_v44 = vrot.slane %v4515_v52, %v5769_v49  ;;  %v4518_v33 = vcombine.high %v2062_v7, %v2071_v14  ;;  %v6343_v30 = vrot.slane %v2325_v37, %v5081_v18  ;;  %v6346_v20 = vrot.slane %v2334_v26, %v5081_v18 }
 0x127   : > { %8539 = vst [vmem:[#allocation12_spill] sm:$0xff] %v6330_v10  ;;  %8541 = vst [vmem:[#allocation14_spill] sm:$0xff] %v6337_v53  ;;  %v4512_v5 = vcombine.high %v8472_v28, %v8473_v41  ;;  %v3333_v12 = vcombine.low %v2278_v57, %v2287_v63  ;;  %v4545_v56 = vcombine.high %v8501_v40, %v8502_v15  ;;  %v8553_v26 = vrot.slane %v5727_v25, 7 }
 0x128   : > { %8542 = vst [vmem:[#allocation17_spill] sm:$0xff] %v6340_v44  ;;  %8543 = vst [vmem:[#allocation26_spill] sm:$0xff] %v6343_v30  ;;  %1017 = vrot.lane.b32.xlu1 %v8537_v17, %s4830_s12  ;;  %v4530_v19 = vcombine.high %v2278_v57, %v2287_v63  ;;  %v4548_v7 = vcombine.high %v8526_v61, %v8527_v58  ;;  %v6359_v14 = vrot.slane %v2649_v45, %v5081_v18  ;;  %v8566_v63 = vld [vmem:[#allocation40_spill] sm:$0xff]  ;;  %v8577_v44 = vld [vmem:[#allocation43_spill] sm:$0xff] }
 0x129   : > { %8544 = vst [vmem:[#allocation27_spill] sm:$0xff] %v6346_v20  ;;  %999 = vrot.lane.b32.xlu0 %v8538_v55, %s4830_s12  ;;  %v8545_v41 = vcombine.low %v5547_v3, %v5540_v13  ;;  %v2433_v15 = vcombine.low %v5631_v36, %v5727_v25  ;;  %v6370_v40 = vrot.slane %v3031_v16, %v5769_v49  ;;  %v6374_v52 = vpop.permute.xlu0 %752  ;;  %v1398_v45 = vrot.slane %v8553_v26, 2  ;;  %v8575_v20 = vld [vmem:[#allocation42_spill] sm:$0xff] }
 0x12a   : > { %v6372_v43 = vpop.permute.xlu1 %770  ;;  %8548 = vst [vmem:[#allocation97_spill] sm:$0xff] %v6374_v52  ;;  %v6377_v61 = vrot.slane %v4509_v11, %v5769_v49  ;;  %v6380_v58 = vrot.slane %v3213_v21, %v5769_v49  ;;  %v6383_v57 = vrot.slane %v4518_v33, %v5769_v49  ;;  %v6386_v37 = vrot.slane %v4527_v31, %v5769_v49  ;;  %v8604_v52 = vld [vmem:[#allocation52_spill] sm:$0xff] }
 0x12b   : > { %v6365_v28 = vrot.slane %v8545_v41, %v5081_v18  ;;  %8546 = vst [vmem:[#allocation95_spill] sm:$0xff] %v6370_v40  ;;  %8547 = vst [vmem:[#allocation96_spill] sm:$0xff] %v6372_v43  ;;  %v6393_v16 = vrot.slane %v4512_v5, %v5769_v49  ;;  %v6396_v11 = vrot.slane %v3333_v12, %v5769_v49  ;;  %v8556_v21 = vrot.slane %v8537_v17, 7  ;;  %v8605_v43 = vld [vmem:[#allocation33_spill] sm:$0xff] }
 0x12c   : > { %8549 = vst [vmem:[#allocation98_spill] sm:$0xff] %v6377_v61  ;;  %8550 = vst [vmem:[#allocation99_spill] sm:$0xff] %v6380_v58  ;;  %1053 = vrot.lane.b32.xlu1 %v5540_v13, %s4830_s12  ;;  %v6407_v31 = vrot.slane %v4530_v19, %v5769_v49  ;;  %v6410_v33 = vrot.slane %v4545_v56, %v5769_v49  ;;  %v6413_v5 = vrot.slane %v4548_v7, %v5769_v49  ;;  %v8591_v58 = vld [vmem:[#allocation9_spill] sm:$0xff] }
 0x12d   : > { %8551 = vst [vmem:[#allocation100_spill] sm:$0xff] %v6383_v57  ;;  %8552 = vst [vmem:[#allocation101_spill] sm:$0xff] %v6386_v37  ;;  %v6400_v41 = vrot.slane %v8556_v21, 2  ;;  %1035 = vrot.lane.b32.xlu0 %v5547_v3, %s4830_s12  ;;  %v8560_v12 = vrot.slane %v8538_v55, 7  ;;  %v6424_v1 = vrot.slane %v2433_v15, %v5081_v18  ;;  %v4522_v56 = vcombine.high %v5772_v4, %v5775_v51  ;;  %v6431_v24 = vpop.permute.xlu0 %788  ;;  %v8565_v21 = vld [vmem:[#allocation45_spill] sm:$0xff] }
 0x12e   : > { %8554 = vst [vmem:[#allocation102_spill] sm:$0xff] %v6393_v16  ;;  %8555 = vst [vmem:[#allocation103_spill] sm:$0xff] %v6396_v11  ;;  %v6429_v7 = vpop.permute.xlu1 %806  ;;  %v8567_v30 = vrot.slane %v8566_v63, 7  ;;  %v8569_v4 = vrot.slane %v8460_v9, 7  ;;  %v8571_v19 = vrot.slane %v5740_v23, 7  ;;  %v8576_v63 = vrot.slane %v8575_v20, 7 }
 0x12f   : > { %8557 = vst [vmem:[#allocation104_spill] sm:$0xff] %v6407_v31  ;;  %8558 = vst [vmem:[#allocation105_spill] sm:$0xff] %v6410_v33  ;;  %v6417_v26 = vrot.slane %v8560_v12, 2  ;;  %v8563_v12 = vrot.slane %v5631_v36, 7  ;;  %v8578_v33 = vrot.slane %v8577_v44, 7  ;;  %v8579_v9 = vld [vmem:[#allocation50_spill] sm:$0xff] }
 0x130   : > { %8559 = vst [vmem:[#allocation106_spill] sm:$0xff] %v6413_v5  ;;  %8561 = vst [vmem:[#allocation107_spill] sm:$0xff] %v6424_v1  ;;  %v6441_v15 = vrot.slane %v8567_v30, 2  ;;  %v8568_v1 = vld [vmem:[#allocation83_spill] sm:$0xff]  ;;  %v6448_v51 = vsel %vm5038_vm6, %v1398_v45, %v8569_v4  ;;  %v6452_v59 = vrot.slane %v8571_v19, 2  ;;  %v6460_v30 = vrot.slane %v8576_v63, 2  ;;  %1089 = vrot.lane.b32.xlu1 %v8537_v17, %s4831_s21 }
 0x131   : > { %8562 = vst [vmem:[#allocation108_spill] sm:$0xff] %v6431_v24  ;;  %v6435_v32 = vrot.slane %v8563_v12, 2  ;;  %8570 = vst [vmem:[#allocation40_spill] sm:$0xff] %v6448_v51  ;;  %v8573_v12 = vld [vmem:[#allocation41_spill] sm:$0xff]  ;;  %v8580_v31 = vrot.slane %v8579_v9, 7  ;;  %1071 = vrot.lane.b32.xlu0 %v8538_v55, %s4831_s21  ;;  %v8581_v19 = vld [vmem:[#allocation46_spill] sm:$0xff] }
 0x132   : > { %8572 = vst [vmem:[#allocation83_spill] sm:$0xff] %v6452_v59  ;;  %v8574_v5 = vrot.slane %v8573_v12, 7  ;;  %v8583_v20 = vld [vmem:[#allocation47_spill] sm:$0xff]  ;;  %v8590_v17 = vrot.slane %v5987_v34, 7  ;;  %v6489_v53 = vpop.permute.xlu1 %842  ;;  %v8599_v55 = vld [vmem:[#allocation48_spill] sm:$0xff]  ;;  %v8601_v61 = vld [vmem:[#allocation49_spill] sm:$0xff] }
 0x133   : > { %8564 = vst [vmem:[#allocation109_spill] sm:$0xff] %v6435_v32  ;;  %v6464_v32 = vrot.slane %v8578_v33, 2  ;;  %v1186_v45 = vrot.slane %v8580_v31, 2  ;;  %v8584_v12 = vrot.slane %v8583_v20, 7  ;;  %v8585_v44 = vld [vmem:[#allocation51_spill] sm:$0xff]  ;;  %8592 = vst [vmem:[#allocation42_spill] sm:$0xff] %v6489_v53 }
 0x134   : > { %v6456_v37 = vrot.slane %v8574_v5, 2  ;;  %v8582_v5 = vrot.slane %v8581_v19, 7  ;;  %v8586_v33 = vrot.slane %v8585_v44, 7  ;;  %v8587_v51 = vld [vmem:[#allocation23_spill] sm:$0xff]  ;;  %v1270_v57 = vrot.slane %v8590_v17, 2  ;;  %v6491_v19 = vpop.permute.xlu0 %824  ;;  %1125 = vrot.lane.b32.xlu1 %v5540_v13, %s4831_s21 }
 0x135   : > { %v6478_v63 = vrot.slane %v8584_v12, 2  ;;  %v8588_v9 = vrot.slane %v8587_v51, 7  ;;  %8593 = vst [vmem:[#allocation43_spill] sm:$0xff] %v6491_v19  ;;  %v3150_v44 = vrot.slane %v4522_v56, %v5769_v49  ;;  %v8256_v48 = vrot.slane %v6489_v53, 7  ;;  %1107 = vrot.lane.b32.xlu0 %v5547_v3, %s4831_s21 }
 0x136   : > { %v6474_v4 = vrot.slane %v8582_v5, 2  ;;  %v1161_v59 = vrot.slane %v8586_v33, 2  ;;  %v8594_v5 = vld [vmem:[#allocation25_spill] sm:$0xff]  ;;  %v8597_v33 = vrot.slane %v8568_v1, 7  ;;  %v8600_v11 = vrot.slane %v8599_v55, 7 }
 0x137   : > { %v6484_v31 = vrot.slane %v8588_v9, 2  ;;  %v8595_v20 = vrot.slane %v8594_v5, 7  ;;  %v8598_v9 = vld [vmem:[#allocation11_spill] sm:$0xff]  ;;  %v8602_v16 = vrot.slane %v8601_v61, 7  ;;  %v8606_v24 = vrot.slane %v8605_v43, 7 }
 0x138   : > { %v1295_v51 = vrot.slane %v8597_v33, 2  ;;  %v6505_v40 = vrot.slane %v8600_v11, 2  ;;  %v8607_v11 = vld [vmem:[#allocation31_spill] sm:$0xff]  ;;  %1013 = vrot.lane.b32.xlu1 %v5727_v25, %s4830_s12 }
 0x139   : > { %8589 = vst [vmem:[#allocation41_spill] sm:$0xff] %v6484_v31  ;;  %v6495_v12 = vrot.slane %v8595_v20, 2  ;;  %v6509_v5 = vrot.slane %v8602_v16, 2  ;;  %v8603_v20 = vld [vmem:[#allocation53_spill] sm:$0xff]  ;;  %v1188_v33 = vsel %vm5038_vm6, %v1186_v45, %v8606_v24  ;;  %v8608_v55 = vrot.slane %v8607_v11, 7  ;;  %v8609_v16 = vld [vmem:[#allocation55_spill] sm:$0xff]  ;;  %995 = vrot.lane.b32.xlu0 %v5631_v36, %s4830_s12 }
 0x13a   : > { %v4523_v56 = vcombine.high %v8604_v52, %v8603_v20  ;;  %v8610_v54 = vrot.slane %v8609_v16, 7  ;;  %v1297_v43 = vsel %vm5038_vm6, %v1295_v51, %v8256_v48  ;;  %v8611_v24 = vrot.slane %v6491_v19, 7  ;;  %v8612_v52 = vld [vmem:[#allocation56_spill] sm:$0xff] }
 0x13b   : > { %8596 = vst [vmem:[#allocation50_spill] sm:$0xff] %v6495_v12  ;;  %v1163_v61 = vsel %vm5038_vm6, %v1161_v59, %v8608_v55  ;;  %v8613_v3 = vrot.slane %v8612_v52, 7  ;;  %v8614_v20 = vrot.slane %v8591_v58, 7  ;;  %v6540_v55 = vpop.permute.xlu1 %878  ;;  %v6545_v16 = vcombine.low %v6303_v6, %v3150_v44  ;;  %v8619_v6 = vld [vmem:[#allocation32_spill] sm:$0xff] }
 0x13c   : > { %v1236_v17 = vrot.slane %v8610_v54, 2  ;;  %v1272_v13 = vsel %vm5038_vm6, %v1270_v57, %v8611_v24  ;;  %8615 = vst [vmem:[#allocation46_spill] sm:$0xff] %v6540_v55  ;;  %v6542_v54 = vpop.permute.xlu0 %860  ;;  %v8618_v51 = vrot.slane %v8598_v9, 7  ;;  %v8258_v24 = vrot.slane %v6540_v55, 7  ;;  %1049 = vrot.lane.b32.xlu1 %v5740_v23, %s4830_s12 }
 0x13d   : > { %v1211_v45 = vrot.slane %v8613_v3, 2  ;;  %v1320_v11 = vrot.slane %v8614_v20, 2  ;;  %8616 = vst [vmem:[#allocation47_spill] sm:$0xff] %v6542_v54  ;;  %8617 = vst [vmem:[#allocation51_spill] sm:$0xff] %v6545_v16  ;;  %v8259_v52 = vrot.slane %v6542_v54, 7  ;;  %v2019_v3 = vcombine.low %v1163_v61, %v1188_v33  ;;  %1031 = vrot.lane.b32.xlu0 %v8565_v21, %s4830_s12 }
 0x13e   : > { %v1345_v48 = vrot.slane %v8618_v51, 2  ;;  %v2361_v20 = vcombine.low %v1272_v13, %v1297_v43  ;;  %v8620_v44 = vrot.slane %v8619_v6, 7  ;;  %v6573_v61 = vrot.slane %v4523_v56, %v5769_v49  ;;  %v8622_v43 = vld [vmem:[#allocation30_spill] sm:$0xff] }
 0x13f   : > { %v1322_v33 = vsel %vm5038_vm6, %v1320_v11, %v8259_v52  ;;  %v8623_v13 = vrot.slane %v8622_v43, 7  ;;  %v8624_v6 = vrot.slane %v6226_v39, 7  ;;  %v6584_v59 = vpop.permute.xlu1 %1009  ;;  %v8627_v52 = vrot.slane %v6228_v27, 7  ;;  %v8640_v27 = vld [vmem:[#allocation34_spill] sm:$0xff] }
 0x140   : > { %v6560_v51 = vsel %vm5038_vm6, %v1236_v17, %v8620_v44  ;;  %v1347_v57 = vsel %vm5038_vm6, %v1345_v48, %v8258_v24  ;;  %8621 = vst [vmem:[#allocation23_spill] sm:$0xff] %v6573_v61  ;;  %8625 = vst [vmem:[#allocation9_spill] sm:$0xff] %v6584_v59  ;;  %v6586_v11 = vpop.permute.xlu0 %991  ;;  %v8263_v43 = vrot.slane %v6584_v59, 7  ;;  %1085 = vrot.lane.b32.xlu1 %v5727_v25, %s4831_s21 }
 0x141   : > { %v6579_v17 = vsel %vm5038_vm6, %v1211_v45, %v8623_v13  ;;  %v1489_v48 = vrot.slane %v8624_v6, 2  ;;  %v2370_v24 = vcombine.low %v1322_v33, %v1347_v57  ;;  %8626 = vst [vmem:[#allocation25_spill] sm:$0xff] %v6586_v11  ;;  %v1464_v56 = vrot.slane %v8627_v52, 2  ;;  %v8628_v13 = vld [vmem:[#allocation61_spill] sm:$0xff]  ;;  %v8630_v6 = vld [vmem:[#allocation62_spill] sm:$0xff]  ;;  %1067 = vrot.lane.b32.xlu0 %v5631_v36, %s4831_s21 }
 0x142   : > { %v8264_v45 = vrot.slane %v6586_v11, 7  ;;  %v8629_v53 = vrot.slane %v8628_v13, 7  ;;  %v8631_v54 = vrot.slane %v8630_v6, 7  ;;  %v6598_v57 = vrot.slane %v2361_v20, %v5081_v18  ;;  %v8645_v20 = vld [vmem:[#allocation63_spill] sm:$0xff] }
 0x143   : > { %v6601_v33 = vrot.slane %v2370_v24, %v5081_v18  ;;  %v6606_v52 = vrot.slane %v2019_v3, %v5081_v18  ;;  %v8634_v24 = vrot.slane %v6271_v46, 7  ;;  %v6625_v6 = vpop.permute.xlu1 %1045  ;;  %v8641_v46 = vrot.slane %v8640_v27, 7 }
 0x144   : > { %v1286_v39 = vrot.slane %v8629_v53, 2  ;;  %v1261_v44 = vrot.slane %v8631_v54, 2  ;;  %8632 = vst [vmem:[#allocation11_spill] sm:$0xff] %v6598_v57  ;;  %v1491_v53 = vsel %vm5038_vm6, %v1489_v48, %v8263_v43  ;;  %v1466_v54 = vsel %vm5038_vm6, %v1464_v56, %v8264_v45  ;;  %8635 = vst [vmem:[#allocation49_spill] sm:$0xff] %v6625_v6  ;;  %v6627_v19 = vpop.permute.xlu0 %1027  ;;  %v8637_v48 = vld [vmem:[#allocation3_spill] sm:$0xff]  ;;  %1121 = vrot.lane.b32.xlu1 %v5740_v23, %s4831_s21 }
 0x145   : > { %8633 = vst [vmem:[#allocation48_spill] sm:$0xff] %v6601_v33  ;;  %v1539_v3 = vrot.slane %v8634_v24, 2  ;;  %v3376_v13 = vcombine.low %v6598_v57, %v6601_v33  ;;  %8636 = vst [vmem:[#allocation53_spill] sm:$0xff] %v6627_v19  ;;  %v8638_v43 = vcombine.high %v8533_v50, %v8533_v50  ;;  %v8639_v45 = vrot.slane %v6273_v35, 7  ;;  %v8642_v57 = vld [vmem:[#allocation35_spill] sm:$0xff]  ;;  %v8647_v35 = vld [vmem:[#allocation64_spill] sm:$0xff]  ;;  %1103 = vrot.lane.b32.xlu0 %v8565_v21, %s4831_s21 }
 0x146   : > { %v1288_v55 = vsel %vm5038_vm6, %v1286_v39, %v8641_v46  ;;  %v8643_v33 = vrot.slane %v8642_v57, 7  ;;  %v8646_v24 = vrot.slane %v8645_v20, 7  ;;  %v8648_v16 = vrot.slane %v8647_v35, 7  ;;  %v8655_v20 = vld [vmem:[#allocation58_spill] sm:$0xff] }
 0x147   : > { %v439_v56 = vrot.slane %v8638_v43, %v8637_v48  ;;  %v1514_v11 = vrot.slane %v8639_v45, 2  ;;  %v2181_v43 = vcombine.low %v1466_v54, %v1491_v53  ;;  %v8644_v45 = vcombine.high %v8534_v8, %v8534_v8 }
 0x148   : > { %v1263_v50 = vsel %vm5038_vm6, %v1261_v44, %v8643_v33  ;;  %v1336_v27 = vrot.slane %v8646_v24, 2  ;;  %v1311_v39 = vrot.slane %v8648_v16, 2  ;;  %v8649_v46 = vrot.slane %v6625_v6, 7  ;;  %v6669_v16 = vpop.permute.xlu1 %1081  ;;  %v6671_v54 = vpop.permute.xlu0 %1063  ;;  %1019 = vrot.lane.b32.xlu1 %v6484_v31, %s4830_s12 }
 0x149   : > { %v368_v59 = vrot.slane %v8644_v45, %v8637_v48  ;;  %v8650_v57 = vrot.slane %v6627_v19, 7  ;;  %v8651_v8 = vrot.slane %v6298_v42, 7  ;;  %8652 = vst [vmem:[#allocation52_spill] sm:$0xff] %v6669_v16  ;;  %8653 = vst [vmem:[#allocation33_spill] sm:$0xff] %v6671_v54  ;;  %v8672_v42 = vld [vmem:[#allocation65_spill] sm:$0xff]  ;;  %1001 = vrot.lane.b32.xlu0 %v6495_v12, %s4830_s12 }
 0x14a   : > { %v1541_v44 = vsel %vm5038_vm6, %v1539_v3, %v8649_v46  ;;  %v8654_v3 = vld [vmem:[#allocation57_spill] sm:$0xff] }
 0x14b   : > { %v1516_v25 = vsel %vm5038_vm6, %v1514_v11, %v8650_v57  ;;  %v1589_v33 = vrot.slane %v8651_v8, 2  ;;  %v8656_v24 = vcombine.low %v8654_v3, %v8655_v20  ;;  %v8658_v11 = vrot.slane %v6300_v47, 7  ;;  %v8662_v57 = vld [vmem:[#allocation37_spill] sm:$0xff] }
 0x14c   : > { %v2190_v35 = vcombine.low %v1516_v25, %v1541_v44  ;;  %v2037_v44 = vcombine.low %v1263_v50, %v1288_v55  ;;  %v6685_v25 = vrot.slane %v2181_v43, %v5081_v18  ;;  %v8663_v8 = vrot.slane %v8662_v57, 7 }
 0x14d   : > { %v6677_v45 = vrot.slane %v8656_v24, %v5769_v49  ;;  %v1564_v46 = vrot.slane %v8658_v11, 2  ;;  %v6693_v24 = vrot.slane %v3376_v13, %v5769_v49  ;;  %v8660_v11 = vld [vmem:[#allocation36_spill] sm:$0xff]  ;;  %v8664_v50 = vrot.slane %v6669_v16, 7 }
 0x14e   : > { %v6688_v53 = vrot.slane %v2190_v35, %v5081_v18  ;;  %v8661_v19 = vrot.slane %v8660_v11, 7  ;;  %v1313_v55 = vsel %vm5038_vm6, %v1311_v39, %v8663_v8  ;;  %v8665_v35 = vrot.slane %v6671_v54, 7  ;;  %v6717_v39 = vpop.permute.xlu1 %1117  ;;  %v6719_v8 = vpop.permute.xlu0 %1099 }
 0x14f   : > { %8657 = vst [vmem:[#allocation31_spill] sm:$0xff] %v6677_v45  ;;  %8659 = vst [vmem:[#allocation55_spill] sm:$0xff] %v6693_v24  ;;  %v1591_v43 = vsel %vm5038_vm6, %v1589_v33, %v8664_v50  ;;  %v8669_v33 = vcombine.high %v8535_v22, %v8535_v22  ;;  %v8282_v54 = vrot.slane %v6717_v39, 7  ;;  %v8281_v16 = vrot.slane %v6719_v8, 7 }
 0x150   : > { %v1338_v36 = vsel %vm5038_vm6, %v1336_v27, %v8661_v19  ;;  %v1566_v13 = vsel %vm5038_vm6, %v1564_v46, %v8665_v35  ;;  %v8666_v19 = vrot.slane %v6330_v10, 7  ;;  %v3196_v57 = vcombine.low %v6685_v25, %v6688_v53  ;;  %8667 = vst [vmem:[#allocation56_spill] sm:$0xff] %v6717_v39  ;;  %8668 = vst [vmem:[#allocation32_spill] sm:$0xff] %v6719_v8  ;;  %v8694_v39 = vld [vmem:[#allocation87_spill] sm:$0xff] }
 0x151   : > { %v581_v11 = vrot.slane %v8669_v33, %v8637_v48  ;;  %v8670_v46 = vcombine.high %v8536_v60, %v8536_v60  ;;  %v8671_v35 = vrot.slane %v6332_v0, 7  ;;  %v2046_v47 = vcombine.low %v1313_v55, %v1338_v36  ;;  %v8674_v33 = vld [vmem:[#allocation70_spill] sm:$0xff] }
 0x152   : > { %v1639_v27 = vrot.slane %v8666_v19, 2  ;;  %v8283_v10 = vrot.slane %v8672_v42, 7  ;;  %v2199_v22 = vcombine.low %v1566_v13, %v1591_v43  ;;  %v8673_v60 = vrot.slane %v6495_v12, 7  ;;  %v6767_v6 = vpop.permute.xlu0 %758 }
 0x153   : > { %v510_v50 = vrot.slane %v8670_v46, %v8637_v48  ;;  %v1614_v19 = vrot.slane %v8671_v35, 2  ;;  %v8675_v55 = vrot.slane %v6484_v31, 7  ;;  %v8676_v43 = vcombine.low %v6579_v17, %v6560_v51  ;;  %8678 = vst [vmem:[#allocation61_spill] sm:$0xff] %v6767_v6 }
 0x154   : > { %v1381_v48 = vsel %vm5038_vm6, %v6417_v26, %v8673_v60  ;;  %v1641_v35 = vsel %vm5038_vm6, %v1639_v27, %v8282_v54  ;;  %v6765_v60 = vpop.permute.xlu1 %776  ;;  %v6775_v46 = vrot.slane %v2037_v44, %v5081_v18  ;;  %v8688_v54 = vld [vmem:[#allocation86_spill] sm:$0xff]  ;;  %v8695_v0 = vrot.slane %v8694_v39, 7 }
 0x155   : > { %v1616_v36 = vsel %vm5038_vm6, %v1614_v19, %v8281_v16  ;;  %v1406_v26 = vsel %vm5038_vm6, %v6400_v41, %v8675_v55  ;;  %v6763_v13 = vrot.slane %v8676_v43, %v5081_v18  ;;  %8677 = vst [vmem:[#allocation30_spill] sm:$0xff] %v6765_v60  ;;  %v8679_v19 = vld [vmem:[#allocation4_spill] sm:$0xff]  ;;  %v8684_v43 = vld [vmem:[#allocation67_spill] sm:$0xff]  ;;  %v6839_v21 = vrot.slane %v3196_v57, %v5769_v49 }
 0x156   : > { %v2208_v27 = vcombine.low %v1616_v36, %v1641_v35  ;;  %v6770_v16 = vrot.slane %v439_v56, %v8679_v19  ;;  %v6778_v41 = vrot.slane %v368_v59, %v8679_v19  ;;  %v6781_v51 = vrot.slane %v581_v11, %v8679_v19  ;;  %v8682_v59 = vld [vmem:[#allocation68_spill] sm:$0xff]  ;;  %1037 = vrot.lane.b32.xlu0 %v8684_v43, %s4830_s12 }
 0x157   : > { %v6784_v17 = vrot.slane %v510_v50, %v8679_v19  ;;  %v6791_v56 = vsel %vm5038_vm6, %v6456_v37, %v8283_v10  ;;  %v6794_v35 = vrot.slane %v2199_v22, %v5081_v18  ;;  %1055 = vrot.lane.b32.xlu1 %v8682_v59, %s4830_s12  ;;  %v2703_v11 = vcombine.low %v1381_v48, %v1406_v26  ;;  %v8686_v48 = vld [vmem:[#allocation10_spill] sm:$0xff]  ;;  %v8692_v22 = vld [vmem:[#allocation39_spill] sm:$0xff] }
 0x158   : > { %8680 = vst [vmem:[#allocation62_spill] sm:$0xff] %v6781_v51  ;;  %v6797_v44 = vrot.slane %v2208_v27, %v5081_v18  ;;  %v6802_v50 = vrot.slane %v2046_v47, %v5081_v18  ;;  %v8683_v36 = vrot.slane %v8674_v33, 7  ;;  %v8685_v27 = vld [vmem:[#allocation72_spill] sm:$0xff]  ;;  %v8687_v26 = vrot.slane %v8686_v48, 7  ;;  %8697 = vst [vmem:[#allocation63_spill] sm:$0xff] %v6839_v21 }
 0x159   : > { %8681 = vst [vmem:[#allocation3_spill] sm:$0xff] %v6784_v17  ;;  %v8689_v10 = vrot.slane %v8688_v54, 7  ;;  %v8693_v55 = vrot.slane %v8692_v22, 7  ;;  %v1229_v23 = vrot.slane %v8695_v0, 2  ;;  %v8699_v0 = vrot.slane %v6765_v60, 7 }
 0x15a   : > { %v6809_v37 = vsel %vm5038_vm6, %v6441_v15, %v8683_v36  ;;  %v1204_v47 = vrot.slane %v8687_v26, 2  ;;  %v3197_v24 = vcombine.low %v6794_v35, %v6797_v44  ;;  %v6822_v15 = vpop.permute.xlu1 %812  ;;  %v6824_v36 = vpop.permute.xlu0 %794  ;;  %v8696_v26 = vld [vmem:[#allocation76_spill] sm:$0xff]  ;;  %1073 = vrot.lane.b32.xlu0 %v6495_v12, %s4831_s21  ;;  %v8701_v57 = vrot.slane %v8568_v1, 7 }
 0x15b   : > { %v1179_v45 = vrot.slane %v8689_v10, 2  ;;  %8690 = vst [vmem:[#allocation34_spill] sm:$0xff] %v6822_v15  ;;  %8691 = vst [vmem:[#allocation35_spill] sm:$0xff] %v6824_v36  ;;  %v1254_v8 = vrot.slane %v8693_v55, 2  ;;  %v8292_v19 = vrot.slane %v6822_v15, 7  ;;  %v8293_v48 = vrot.slane %v6824_v36, 7  ;;  %1091 = vrot.lane.b32.xlu1 %v6484_v31, %s4831_s21 }
 0x15c   : > { %v6836_v10 = vrot.slane %v2703_v11, %v5081_v18  ;;  %v6842_v22 = vrot.slane %v3197_v24, %v5769_v49  ;;  %v1206_v39 = vsel %vm5038_vm6, %v1204_v47, %v8699_v0  ;;  %v8700_v55 = vrot.slane %v6767_v6, 7  ;;  %v8707_v15 = vld [vmem:[#allocation89_spill] sm:$0xff] }
 0x15d   : > { %v1256_v11 = vsel %vm5038_vm6, %v1254_v8, %v8292_v19  ;;  %v1231_v24 = vsel %vm5038_vm6, %v1229_v23, %v8293_v48  ;;  %v1294_v47 = vsel %vm5038_vm6, %v6474_v4, %v8701_v57  ;;  %v8705_v48 = vld [vmem:[#allocation88_spill] sm:$0xff]  ;;  %v8708_v6 = vrot.slane %v8707_v15, 7  ;;  %v8712_v15 = vld [vmem:[#allocation73_spill] sm:$0xff] }
 0x15e   : > { %8698 = vst [vmem:[#allocation64_spill] sm:$0xff] %v6842_v22  ;;  %v1181_v54 = vsel %vm5038_vm6, %v1179_v45, %v8700_v55  ;;  %v8702_v45 = vrot.slane %v8598_v9, 7  ;;  %v2676_v0 = vcombine.low %v1231_v24, %v1256_v11  ;;  %v6872_v55 = vpop.permute.xlu1 %848  ;;  %v6874_v19 = vpop.permute.xlu0 %830  ;;  %v8706_v1 = vrot.slane %v8705_v48, 7  ;;  %1109 = vrot.lane.b32.xlu0 %v8684_v43, %s4831_s21  ;;  %v8731_v43 = vld [vmem:[#allocation97_spill] sm:$0xff] }
 0x15f   : > { %8703 = vst [vmem:[#allocation57_spill] sm:$0xff] %v6872_v55  ;;  %8704 = vst [vmem:[#allocation58_spill] sm:$0xff] %v6874_v19  ;;  %v1279_v4 = vrot.slane %v8708_v6, 2  ;;  %v8299_v9 = vrot.slane %v6872_v55, 7  ;;  %v8710_v24 = vrot.slane %v8591_v58, 7  ;;  %1127 = vrot.lane.b32.xlu1 %v8682_v59, %s4831_s21  ;;  %v8711_v6 = vld [vmem:[#allocation71_spill] sm:$0xff] }
 0x160   : > { %v1344_v8 = vsel %vm5038_vm6, %v6505_v40, %v8702_v45  ;;  %v1304_v36 = vrot.slane %v8706_v1, 2  ;;  %v8709_v40 = vrot.slane %v8696_v26, 7  ;;  %v2667_v45 = vcombine.low %v1181_v54, %v1206_v39  ;;  %v8730_v55 = vld [vmem:[#allocation96_spill] sm:$0xff] }
 0x161   : > { %v1319_v48 = vsel %vm5038_vm6, %v6509_v5, %v8710_v24  ;;  %v8713_v1 = vcombine.low %v8711_v6, %v8712_v15  ;;  %v8714_v57 = vrot.slane %v5987_v34, 7  ;;  %v8715_v54 = vrot.slane %v6874_v19, 7 }
 0x162   : > { %v1244_v11 = vsel %vm5038_vm6, %v6460_v30, %v8709_v40  ;;  %v2262_v30 = vcombine.low %v1319_v48, %v1344_v8  ;;  %v1306_v5 = vsel %vm5038_vm6, %v1304_v36, %v8299_v9  ;;  %v2235_v34 = vcombine.low %v6791_v56, %v6809_v37  ;;  %v6929_v24 = vpop.permute.xlu0 %866  ;;  %1129 = vrot.lane.b32.xlu0 %v6778_v41, %s4830_s12 }
 0x163   : > { %v6900_v23 = vrot.slane %v8713_v1, %v5081_v18  ;;  %v1269_v58 = vsel %vm5038_vm6, %v6478_v63, %v8714_v57  ;;  %v1281_v39 = vsel %vm5038_vm6, %v1279_v4, %v8715_v54  ;;  %v8716_v40 = vrot.slane %v8685_v27, 7  ;;  %v6927_v57 = vpop.permute.xlu1 %884  ;;  %8718 = vst [vmem:[#allocation37_spill] sm:$0xff] %v6929_v24  ;;  %1131 = vrot.lane.b32.xlu1 %v6770_v16, %s4830_s12 }
 0x164   : > { %v2253_v8 = vcombine.low %v1269_v58, %v1294_v47  ;;  %v6925_v36 = vrot.slane %v2676_v0, %v5081_v18  ;;  %8717 = vst [vmem:[#allocation36_spill] sm:$0xff] %v6927_v57  ;;  %v8719_v4 = vrot.slane %v6181_v29, 7  ;;  %v8720_v6 = vrot.slane %v6183_v38, 7  ;;  %v8721_v29 = vld [vmem:[#allocation85_spill] sm:$0xff]  ;;  %v8722_v58 = vld [vmem:[#allocation84_spill] sm:$0xff] }
 0x165   : > { %v1219_v63 = vsel %vm5038_vm6, %v6464_v32, %v8716_v40  ;;  %v8298_v37 = vrot.slane %v6927_v57, 7  ;;  %v8297_v15 = vrot.slane %v6929_v24, 7  ;;  %v6938_v32 = vrot.slane %v2667_v45, %v5081_v18 }
 0x166   : > { %v1354_v48 = vrot.slane %v8719_v4, 2  ;;  %v1329_v56 = vrot.slane %v8720_v6, 2  ;;  %v2244_v1 = vcombine.low %v1219_v63, %v1244_v11  ;;  %v2685_v47 = vcombine.low %v1281_v39, %v1306_v5  ;;  %v6967_v4 = vpop.permute.xlu0 %987  ;;  %1133 = vrot.lane.b32.xlu0 %v6784_v17, %s4830_s12 }
 0x167   : > { %v4554_v0 = vcombine.high %v6836_v10, %v6900_v23  ;;  %v4511_v54 = vcombine.high %v8722_v58, %v8721_v29  ;;  %v6947_v38 = vrot.slane %v2262_v30, %v5081_v18  ;;  %v2881_v5 = vcombine.low %v6606_v52, %v6763_v13  ;;  %v6965_v63 = vpop.permute.xlu1 %1005  ;;  %v8724_v29 = vld [vmem:[#allocation78_spill] sm:$0xff]  ;;  %v8725_v58 = vld [vmem:[#allocation77_spill] sm:$0xff]  ;;  %1135 = vrot.lane.b32.xlu1 %v6781_v51, %s4830_s12 }
 0x168   : > { %v1356_v11 = vsel %vm5038_vm6, %v1354_v48, %v8298_v37  ;;  %v1331_v45 = vsel %vm5038_vm6, %v1329_v56, %v8297_v15  ;;  %v4552_v39 = vcombine.high %v6938_v32, %v6925_v36  ;;  %v2897_v48 = vcombine.low %v6775_v46, %v6802_v50 }
 0x169   : > { %v2694_v40 = vcombine.low %v1331_v45, %v1356_v11  ;;  %v8723_v6 = vrot.slane %v8672_v42, 7  ;;  %v4510_v15 = vcombine.high %v8725_v58, %v8724_v29  ;;  %v2260_v37 = vrot.slane %v2253_v8, %v5081_v18 }
 0x16a   : > { %v6977_v9 = vrot.slane %v2235_v34, %v5081_v18  ;;  %v6980_v11 = vrot.slane %v2244_v1, %v5081_v18  ;;  %v6983_v45 = vrot.slane %v2685_v47, %v5081_v18  ;;  %v2953_v34 = vrot.slane %v4511_v54, %v5769_v49  ;;  %v7005_v21 = vpop.permute.xlu0 %1023  ;;  %1137 = vrot.lane.b32.xlu0 %v6778_v41, %s4831_s21 }
 0x16b   : > { %v1170_v56 = vrot.slane %v8723_v6, 2  ;;  %v6986_v30 = vrot.slane %v2694_v40, %v5081_v18  ;;  %v3230_v42 = vcombine.low %v2260_v37, %v6947_v38  ;;  %v8726_v8 = vcombine.high %v6359_v14, %v6365_v28  ;;  %v8727_v6 = vld [vmem:[#allocation108_spill] sm:$0xff]  ;;  %v7003_v22 = vpop.permute.xlu1 %1041  ;;  %1139 = vrot.lane.b32.xlu1 %v6770_v16, %s4831_s21 }
 0x16c   : > { %v4022_v47 = vrot.slane %v4554_v0, %v5769_v49  ;;  %v3900_v54 = vrot.slane %v4552_v39, %v5769_v49  ;;  %v4517_v24 = vcombine.high %v6775_v46, %v6802_v50  ;;  %v8729_v0 = vrot.slane %v8696_v26, 7  ;;  %v8734_v26 = vld [vmem:[#allocation102_spill] sm:$0xff] }
 0x16d   : > { %v3893_v1 = vrot.slane %v8726_v8, %v5769_v49  ;;  %v4553_v58 = vcombine.high %v6983_v45, %v6986_v30  ;;  %v8728_v8 = vrot.slane %v8685_v27, 7  ;;  %v2943_v29 = vrot.slane %v4510_v15, %v5769_v49 }
 0x16e   : > { %v1245_v40 = vrot.slane %v8729_v0, 2  ;;  %v3214_v19 = vcombine.low %v6977_v9, %v6980_v11  ;;  %v8733_v50 = vrot.slane %v8674_v33, 7  ;;  %v2961_v15 = vcombine.low %v2953_v34, %v8734_v26  ;;  %v7045_v60 = vpop.permute.xlu0 %1059  ;;  %v8739_v26 = vld [vmem:[#allocation98_spill] sm:$0xff]  ;;  %1141 = vrot.lane.b32.xlu0 %v6784_v17, %s4831_s21  ;;  %v8792_v17 = vld [vmem:[#allocation43_spill] sm:$0xff] }
 0x16f   : > { %v1220_v57 = vrot.slane %v8728_v8, 2  ;;  %v7022_v46 = vrot.slane %v4553_v58, %v5769_v49  ;;  %v7030_v39 = vrot.slane %v2897_v48, %v5769_v49  ;;  %v7033_v8 = vrot.slane %v3230_v42, %v5769_v49  ;;  %1143 = vrot.lane.b32.xlu1 %v6781_v51, %s4831_s21  ;;  %s281_s21 = scalar_lea.vmem %s8056_s3, %s4480_s10 }
 0x170   : > { %v1195_v27 = vrot.slane %v8733_v50, 2  ;;  %v8737_v0 = vrot.slane %v6429_v7, 7  ;;  %v8738_v59 = vrot.slane %v8727_v6, 7  ;;  %v7043_v50 = vpop.permute.xlu1 %1077  ;;  %v7047_v34 = vcombine.low %v3893_v1, %v3900_v54 }
 0x171   : > { %8732 = vst [vmem:[#allocation65_spill] sm:$0xff] %v7022_v46  ;;  %8735 = vst [vmem:[#allocation70_spill] sm:$0xff] %v7030_v39  ;;  %v4023_v48 = vcombine.low %v7022_v46, %v4022_v47  ;;  %v4529_v42 = vcombine.high %v2260_v37, %v6947_v38  ;;  %v2944_v12 = vcombine.low %v8739_v26, %v2943_v29  ;;  %v8743_v47 = vld [vmem:[#allocation95_spill] sm:$0xff]  ;;  %v8793_v51 = vrot.slane %v8792_v17, 7 }
 0x172   : > { %8736 = vst [vmem:[#allocation4_spill] sm:$0xff] %v7033_v8  ;;  %v1247_v58 = vsel %vm5038_vm6, %v1245_v40, %v8737_v0  ;;  %v1222_v33 = vsel %vm5038_vm6, %v1220_v57, %v8738_v59  ;;  %v2895_v31 = vrot.slane %v2881_v5, %v5769_v49  ;;  %v7054_v40 = vrot.slane %v4517_v24, %v5769_v49  ;;  %v8744_v26 = vld [vmem:[#allocation51_spill] sm:$0xff] }
 0x173   : > { %v8741_v0 = vrot.slane %v8730_v55, 7  ;;  %v8742_v57 = vrot.slane %v8731_v43, 7  ;;  %v3228_v37 = vrot.slane %v3214_v19, %v5769_v49  ;;  %v7068_v38 = vpack.i.bf16 %v4023_v48, %v7047_v34  ;;  %v8799_v17 = vld [vmem:[#allocation75_spill] sm:$0xff] }
 0x174   : > { %8740 = vst [vmem:[#allocation72_spill] sm:$0xff] %v7054_v40  ;;  %v4528_v24 = vcombine.high %v6977_v9, %v6980_v11  ;;  %v2352_v5 = vcombine.low %v1222_v33, %v1247_v58  ;;  %v3039_v29 = vcombine.low %v7030_v39, %v8743_v47  ;;  %v4526_v54 = vcombine.high %v6794_v35, %v6797_v44  ;;  %v7080_v19 = vpop.permute.xlu1 %1113  ;;  %v8746_v58 = vld [vmem:[#allocation103_spill] sm:$0xff] }
 0x175   : > { %v1197_v59 = vsel %vm5038_vm6, %v1195_v27, %v8741_v0  ;;  %v1172_v1 = vsel %vm5038_vm6, %v1170_v56, %v8742_v57  ;;  %v4536_v56 = vcombine.high %v8654_v3, %v8655_v20  ;;  %v7082_v27 = vpop.permute.xlu0 %1095  ;;  %v4654_v48 = vpack.i.bf16 %v2961_v15, %v2944_v12  ;;  %v8747_v0 = vld [vmem:[#allocation7_spill] sm:$0xff]  ;;  %v8748_v57 = vld [vmem:[#allocation6_spill] sm:$0xff] }
 0x176   : > { %v8745_v9 = vcombine.low %v6573_v61, %v6322_v2  ;;  %v3341_v33 = vcombine.low %v7033_v8, %v8746_v58  ;;  %v4547_v47 = vcombine.high %v8748_v57, %v8747_v0  ;;  %v2343_v3 = vcombine.low %v1172_v1, %v1197_v59  ;;  %v8749_v20 = vld [vmem:[#allocation14_spill] sm:$0xff]  ;;  %v8752_v2 = vld [vmem:[#allocation99_spill] sm:$0xff]  ;;  %v8755_v1 = vld [vmem:[#allocation100_spill] sm:$0xff] }
 0x177   : > { %v7093_v39 = vcombine.low %v8749_v20, %v2895_v31  ;;  %v7096_v35 = vrot.slane %v4529_v42, %v5769_v49  ;;  %v4525_v12 = vcombine.high %v6685_v25, %v6688_v53  ;;  %4655 = vrot.lane.b32.xlu1 %v4654_v48, %s4834_s22  ;;  %v7102_v44 = vcombine.low %v8752_v2, %v3228_v37  ;;  %v8757_v42 = vld [vmem:[#allocation90_spill] sm:$0xff]  ;;  %v8759_v20 = vld [vmem:[#allocation11_spill] sm:$0xff]  ;;  %v8760_v2 = vld [vmem:[#allocation104_spill] sm:$0xff] }
 0x178   : > { %v4649_v11 = vpack.i.bf16 %v8745_v9, %v8744_v26  ;;  %v8754_v15 = vcombine.high %v6606_v52, %v6763_v13  ;;  %v3117_v31 = vcombine.low %v7054_v40, %v8755_v1  ;;  %v8756_v9 = vld [vmem:[#allocation91_spill] sm:$0xff]  ;;  %v7113_v0 = vrot.slane %v2352_v5, %v5081_v18  ;;  %v7120_v52 = vpop.permute.xlu1 %993  ;;  %v8770_v8 = vld [vmem:[#allocation106_spill] sm:$0xff]  ;;  %v8788_v40 = vld [vmem:[#allocation20_spill] sm:$0xff] }
 0x179   : > { %8750 = vst [vmem:[#allocation10_spill] sm:$0xff] %v7093_v39  ;;  %8751 = vst [vmem:[#allocation86_spill] sm:$0xff] %v7096_v35  ;;  %v4546_v58 = vcombine.high %v8757_v42, %v8756_v9  ;;  %v4664_v53 = vpack.i.bf16 %v3039_v29, %v7093_v39  ;;  %v3296_v25 = vrot.slane %v4528_v24, %v5769_v49  ;;  %v7122_v13 = vpop.permute.xlu0 %985  ;;  %v8758_v29 = vld [vmem:[#allocation48_spill] sm:$0xff]  ;;  %v8766_v42 = vld [vmem:[#allocation45_spill] sm:$0xff] }
 0x17a   : > { %8753 = vst [vmem:[#allocation39_spill] sm:$0xff] %v7102_v44  ;;  %v2994_v59 = vrot.slane %v8754_v15, %v5769_v49  ;;  %4650 = vrot.lane.b32.xlu0 %v4649_v11, %s4834_s22  ;;  %v3834_v37 = vcombine.low %v6983_v45, %v6986_v30  ;;  %v4659_v48 = vpack.i.bf16 %v3341_v33, %v7102_v44  ;;  %v8762_v15 = vld [vmem:[#allocation15_spill] sm:$0xff]  ;;  %v8764_v33 = vld [vmem:[#allocation109_spill] sm:$0xff] }
 0x17b   : > { %v3279_v57 = vrot.slane %v4526_v54, %v5769_v49  ;;  %v3937_v5 = vcombine.low %v6836_v10, %v6900_v23  ;;  %v7129_v11 = vrot.slane %v2343_v3, %v5081_v18  ;;  %v4535_v24 = vcombine.high %v8759_v20, %v8758_v29  ;;  %4665 = vrot.lane.b32.xlu1 %v4664_v53, %s4835_s23  ;;  %v8765_v23 = vld [vmem:[#allocation17_spill] sm:$0xff] }
 0x17c   : > { %v3419_v30 = vcombine.low %v7096_v35, %v8760_v2  ;;  %v7136_v45 = vrot.slane %v4547_v47, %v5769_v49  ;;  %v8763_v1 = vrot.slane %v8762_v15, 7  ;;  %v3818_v10 = vcombine.low %v6938_v32, %v6925_v36  ;;  %v8768_v2 = vld [vmem:[#allocation101_spill] sm:$0xff]  ;;  %v1004_v32 = vpop.permute.xlu1 %1003 }
 0x17d   : > { %v7149_v3 = vcombine.low %v8765_v23, %v2994_v59  ;;  %v3272_v9 = vrot.slane %v4525_v12, %v5769_v49  ;;  %v4534_v47 = vcombine.high %v7129_v11, %v7113_v0  ;;  %v8767_v29 = vrot.slane %v8766_v42, 7  ;;  %v8773_v39 = vld [vmem:[#allocation21_spill] sm:$0xff] }
 0x17e   : > { %8761 = vst [vmem:[#allocation87_spill] sm:$0xff] %v7136_v45  ;;  %v7143_v54 = vsel %vm5038_vm6, %v8764_v33, %v8763_v1  ;;  %4660 = vrot.lane.b32.xlu0 %v4659_v48, %s4835_s23  ;;  %v3297_v15 = vcombine.low %v8768_v2, %v3296_v25  ;;  %v3754_v36 = vrot.slane %v4546_v58, %v5769_v49  ;;  %v7159_v1 = vpop.permute.xlu0 %997  ;;  %v8772_v25 = vld [vmem:[#allocation40_spill] sm:$0xff] }
 0x17f   : > { %v1423_v20 = vrot.slane %v8767_v29, 2  ;;  %v4674_v59 = vpack.i.bf16 %v3117_v31, %v7149_v3  ;;  %v3280_v53 = vcombine.low %v3272_v9, %v3279_v57  ;;  %v7163_v12 = vrot.slane %v3834_v37, %v5769_v49  ;;  %v8775_v57 = vld [vmem:[#allocation83_spill] sm:$0xff] }
 0x180   : > { %v3944_v33 = vrot.slane %v3937_v5, %v5769_v49  ;;  %v4669_v23 = vpack.i.bf16 %v3419_v30, %v3297_v15  ;;  %v3867_v29 = vcombine.low %v7136_v45, %v8770_v8  ;;  %v7169_v48 = vrot.slane %v4535_v24, %v5769_v49 }
 0x181   : > { %8769 = vst [vmem:[#allocation76_spill] sm:$0xff] %v7163_v12  ;;  %v3564_v58 = vrot.slane %v4536_v56, %v5769_v49  ;;  %v8774_v31 = vrot.slane %v8773_v39, 7  ;;  %4675 = vrot.lane.b32.xlu1 %v4674_v59, %s4836_s24  ;;  %v8776_v8 = vcombine.low %v6359_v14, %v6365_v28  ;;  %v3832_v56 = vrot.slane %v3818_v10, %v5769_v49  ;;  %v8778_v39 = vld [vmem:[#allocation105_spill] sm:$0xff] }
 0x182   : > { %8771 = vst [vmem:[#allocation88_spill] sm:$0xff] %v7169_v48  ;;  %v8777_v24 = vrot.slane %v6429_v7, 7  ;;  %4670 = vrot.lane.b32.xlu0 %v4669_v23, %s4836_s24  ;;  %v7191_v9 = vcombine.low %v8778_v39, %v3754_v36  ;;  %v3452_v44 = vrot.slane %v4534_v47, %v5769_v49  ;;  %v8783_v14 = vrot.slane %v8727_v6, 7  ;;  %v7202_v7 = vpop.permute.xlu1 %1015  ;;  %v8786_v39 = vld [vmem:[#allocation47_spill] sm:$0xff] }
 0x183   : > { %v7179_v37 = vsel %vm5038_vm6, %v8775_v57, %v8774_v31  ;;  %v3825_v5 = vrot.slane %v8776_v8, %v5769_v49  ;;  %v8780_v31 = vld [vmem:[#allocation26_spill] sm:$0xff]  ;;  %v8781_v57 = vld [vmem:[#allocation27_spill] sm:$0xff]  ;;  %v4684_v23 = vpack.i.bf16 %v3297_v15, %v3280_v53  ;;  %v3945_v36 = vcombine.low %v7163_v12, %v3944_v33  ;;  %v8794_v53 = vld [vmem:[#allocation44_spill] sm:$0xff] }
 0x184   : > { %v1248_v30 = vrot.slane %v8777_v24, 2  ;;  %8779 = vst [vmem:[#allocation89_spill] sm:$0xff] %v7191_v9  ;;  %v8782_v2 = vcombine.high %v8780_v31, %v8781_v57  ;;  %v1223_v28 = vrot.slane %v8783_v14, 2  ;;  %v8784_v8 = vld [vmem:[#allocation46_spill] sm:$0xff]  ;;  %v7204_v24 = vpop.permute.xlu0 %1011  ;;  %v8787_v45 = vrot.slane %v8786_v39, 7 }
 0x185   : > { %v8785_v10 = vrot.slane %v8784_v8, 7  ;;  %v4679_v6 = vpack.i.bf16 %v3867_v29, %v7191_v9  ;;  %v3565_v14 = vcombine.low %v7169_v48, %v3564_v58  ;;  %v8790_v8 = vld [vmem:[#allocation42_spill] sm:$0xff]  ;;  %v1273_v15 = vrot.slane %v8793_v51, 2  ;;  %4685 = vrot.lane.b32.xlu1 %v4684_v23, %s4834_s22 }
 0x186   : > { %v3445_v59 = vrot.slane %v8782_v2, %v5769_v49  ;;  %v1323_v61 = vrot.slane %v8787_v45, 2  ;;  %v8789_v2 = vrot.slane %v8788_v40, 7  ;;  %v8795_v33 = vcombine.low %v8766_v42, %v8794_v53 }
 0x187   : > { %v1348_v46 = vrot.slane %v8785_v10, 2  ;;  %v8791_v10 = vrot.slane %v8790_v8, 7  ;;  %v7226_v40 = vcombine.low %v3825_v5, %v3832_v56  ;;  %v8798_v58 = vrot.slane %v8731_v43, 7  ;;  %4680 = vrot.lane.b32.xlu0 %v4679_v6, %s4834_s22 }
 0x188   : > { %v1425_v47 = vsel %vm5038_vm6, %v1423_v20, %v8789_v2  ;;  %v7223_v45 = vrot.slane %v8795_v33, %v5081_v18  ;;  %v8797_v20 = vrot.slane %v8730_v55, 7  ;;  %v4502_v2 = vrot.slane %v1004_v32, 9  ;;  %v8803_v55 = vld [vmem:[#allocation38_spill] sm:$0xff]  ;;  %v7247_v32 = vpop.permute.xlu1 %1029  ;;  %v1022_v6 = vpop.permute.xlu0 %1021 }
 0x189   : > { %v1298_v35 = vrot.slane %v8791_v10, 2  ;;  %8796 = vst [vmem:[#allocation71_spill] sm:$0xff] %v7226_v40  ;;  %v1173_v39 = vrot.slane %v8798_v58, 2  ;;  %v7233_v51 = vcombine.low %v3445_v59, %v3452_v44  ;;  %v8800_v8 = vrot.slane %v8799_v17, 7  ;;  %v8801_v10 = vld [vmem:[#allocation74_spill] sm:$0xff]  ;;  %v8805_v59 = vld [vmem:[#allocation16_spill] sm:$0xff] }
 0x18a   : > { %v1198_v29 = vrot.slane %v8797_v20, 2  ;;  %v8802_v23 = vrot.slane %v8801_v10, 7  ;;  %v8804_v56 = vrot.slane %v8803_v55, 7  ;;  %v4694_v44 = vpack.i.bf16 %v3945_v36, %v7226_v40  ;;  %v8807_v58 = vld [vmem:[#allocation82_spill] sm:$0xff] }
 0x18b   : > { %v1250_v42 = vsel %vm5038_vm6, %v1248_v30, %v8800_v8  ;;  %v8806_v53 = vrot.slane %v8805_v59, 7  ;;  %v1484_v33 = vrot.slane %v6965_v63, 7  ;;  %v4501_v20 = vrot.slane %v7122_v13, 9  ;;  %v8809_v8 = vld [vmem:[#allocation81_spill] sm:$0xff] }
 0x18c   : > { %v1225_v5 = vsel %vm5038_vm6, %v1223_v28, %v8802_v23  ;;  %v1350_v43 = vsel %vm5038_vm6, %v1348_v46, %v8804_v56  ;;  %v4689_v28 = vpack.i.bf16 %v3565_v14, %v7233_v51  ;;  %v8808_v17 = vrot.slane %v8807_v58, 7  ;;  %4695 = vrot.lane.b32.xlu1 %v4694_v44, %s4835_s23  ;;  %v7277_v44 = vpop.permute.xlu0 %1033 }
 0x18d   : > { %v1325_v30 = vsel %vm5038_vm6, %v1323_v61, %v8806_v53  ;;  %v8810_v10 = vrot.slane %v8809_v8, 7  ;;  %v2496_v23 = vcombine.low %v1425_v47, %v7179_v37  ;;  %v1459_v61 = vrot.slane %v6967_v4, 7  ;;  %v8811_v37 = vld [vmem:[#allocation107_spill] sm:$0xff]  ;;  %v1040_v47 = vpop.permute.xlu1 %1039 }
 0x18e   : > { %v1300_v46 = vsel %vm5038_vm6, %v1298_v35, %v8808_v17  ;;  %v1534_v63 = vrot.slane %v7003_v22, 7  ;;  %v1509_v13 = vrot.slane %v7005_v21, 7  ;;  %v1485_v14 = vsel %vm5038_vm6, %v4502_v2, %v1484_v33  ;;  %4690 = vrot.lane.b32.xlu0 %v4689_v28, %s4834_s22  ;;  %v8812_v22 = vld [vmem:[#allocation69_spill] sm:$0xff]  ;;  %v8814_v2 = vld [vmem:[#allocation66_spill] sm:$0xff] }
 0x18f   : > { %v1275_v36 = vsel %vm5038_vm6, %v1273_v15, %v8810_v10  ;;  %v4503_v55 = vrot.slane %v1022_v6, 9  ;;  %v3359_v35 = vcombine.low %v8780_v31, %v8781_v57  ;;  %v2460_v15 = vcombine.low %v1225_v5, %v1250_v42 }
 0x190   : > { %v2478_v56 = vcombine.low %v1325_v30, %v1350_v43  ;;  %v3515_v4 = vcombine.low %v8811_v37, %v7223_v45  ;;  %v8813_v59 = vrot.slane %v8812_v22, 7  ;;  %v8815_v6 = vrot.slane %v8814_v2, 7 }
 0x191   : > { %v1460_v31 = vsel %vm5038_vm6, %v4501_v20, %v1459_v61  ;;  %v4504_v57 = vrot.slane %v1040_v47, 9  ;;  %v2469_v42 = vcombine.low %v1275_v36, %v1300_v46  ;;  %v8816_v43 = vcombine.low %v7143_v54, %v8772_v25  ;;  %v7302_v36 = vpop.permute.xlu1 %1051  ;;  %v7304_v54 = vpop.permute.xlu0 %1047  ;;  %v8817_v47 = vld [vmem:[#allocation8_spill] sm:$0xff] }
 0x192   : > { %v1200_v21 = vsel %vm5038_vm6, %v1198_v29, %v8813_v59  ;;  %v1175_v53 = vsel %vm5038_vm6, %v1173_v39, %v8815_v6  ;;  %v1965_v5 = vcombine.low %v1460_v31, %v1485_v14  ;;  %v2503_v28 = vrot.slane %v2496_v23, %v5081_v18 }
 0x193   : > { %v2494_v30 = vrot.slane %v8816_v43, %v5081_v18  ;;  %v1536_v58 = vrot.slane %v1534_v63, 2  ;;  %v1511_v29 = vrot.slane %v1509_v13, 2  ;;  %v1510_v17 = vsel %vm5038_vm6, %v4503_v55, %v1509_v13 }
 0x194   : > { %v1535_v39 = vsel %vm5038_vm6, %v4504_v57, %v1534_v63  ;;  %v2451_v8 = vcombine.low %v1175_v53, %v1200_v21  ;;  %v2467_v20 = vrot.slane %v2460_v15, %v5081_v18  ;;  %v7300_v46 = vrot.slane %v2478_v56, %v5081_v18 }
 0x195   : > { %v1974_v10 = vcombine.low %v1510_v17, %v1535_v39  ;;  %v1486_v25 = vrot.slane %v1484_v33, 2  ;;  %v1461_v23 = vrot.slane %v1459_v61, 2  ;;  %v8322_v14 = vrot.slane %v7080_v19, 7  ;;  %v8819_v61 = vld [vmem:[#allocation92_spill] sm:$0xff]  ;;  %v7331_v31 = vpop.permute.xlu1 %1065  ;;  %v7333_v57 = vpop.permute.xlu0 %1057 }
 0x196   : > { %v8323_v13 = vrot.slane %v7082_v27, 7  ;;  %v3360_v63 = vcombine.low %v7129_v11, %v7113_v0  ;;  %v2476_v55 = vrot.slane %v2469_v42, %v5081_v18  ;;  %v7312_v15 = vrot.slane %v1965_v5, %v5081_v18  ;;  %v8821_v5 = vld [vmem:[#allocation5_spill] sm:$0xff] }
 0x197   : > { %v7315_v56 = vrot.slane %v1974_v10, %v5081_v18  ;;  %v8818_v22 = vrot.slane %v8817_v47, 7  ;;  %v8820_v59 = vrot.slane %v8819_v61, 7  ;;  %v8325_v0 = vrot.slane %v7043_v50, 7 }
 0x198   : > { %v8324_v11 = vrot.slane %v7045_v60, 7  ;;  %v2458_v2 = vrot.slane %v2451_v8, %v5081_v18  ;;  %v3532_v6 = vcombine.low %v2476_v55, %v7300_v46  ;;  %v3635_v42 = vcombine.low %v2494_v30, %v2503_v28 }
 0x199   : > { %v1538_v33 = vsel %vm5038_vm6, %v1536_v58, %v8818_v22  ;;  %v1513_v21 = vsel %vm5038_vm6, %v1511_v29, %v8820_v59  ;;  %v8822_v43 = vrot.slane %v8821_v5, 7  ;;  %v8823_v29 = vld [vmem:[#allocation22_spill] sm:$0xff]  ;;  %v1636_v8 = vrot.slane %v8322_v14, 2  ;;  %v7355_v53 = vpop.permute.xlu0 %1069 }
 0x19a   : > { %v8824_v17 = vrot.slane %v8823_v29, 7  ;;  %v1611_v10 = vrot.slane %v8323_v13, 2  ;;  %v3516_v47 = vcombine.low %v2458_v2, %v2467_v20  ;;  %v4539_v22 = vcombine.high %v8811_v37, %v7223_v45 }
 0x19b   : > { %v1488_v58 = vsel %vm5038_vm6, %v1486_v25, %v8822_v43  ;;  %v2082_v61 = vcombine.low %v1513_v21, %v1538_v33  ;;  %v4542_v59 = vcombine.high %v2494_v30, %v2503_v28  ;;  %v1586_v25 = vrot.slane %v8325_v0, 2  ;;  %v8825_v30 = vld [vmem:[#allocation12_spill] sm:$0xff]  ;;  %v8827_v21 = vld [vmem:[#allocation13_spill] sm:$0xff] }
 0x19c   : > { %v1463_v39 = vsel %vm5038_vm6, %v1461_v23, %v8824_v17  ;;  %v1561_v5 = vrot.slane %v8324_v11, 2  ;;  %v3367_v23 = vrot.slane %v3359_v35, %v5769_v49  ;;  %v3374_v43 = vrot.slane %v3360_v63, %v5769_v49  ;;  %v1076_v17 = vpop.permute.xlu1 %1075 }
 0x19d   : > { %v2073_v29 = vcombine.low %v1463_v39, %v1488_v58  ;;  %v3523_v14 = vrot.slane %v3515_v4, %v5769_v49  ;;  %v3642_v45 = vrot.slane %v3635_v42, %v5769_v49  ;;  %v4540_v37 = vcombine.high %v2458_v2, %v2467_v20  ;;  %v8830_v39 = vld [vmem:[#allocation93_spill] sm:$0xff] }
 0x19e   : > { %v8826_v28 = vrot.slane %v8825_v30, 7  ;;  %v8828_v13 = vrot.slane %v8827_v21, 7  ;;  %v7368_v63 = vrot.slane %v3532_v6, %v5769_v49  ;;  %v7371_v58 = vrot.slane %v2082_v61, %v5081_v18  ;;  %v8832_v6 = vld [vmem:[#allocation94_spill] sm:$0xff]  ;;  %v8836_v21 = vld [vmem:[#allocation25_spill] sm:$0xff] }
 0x19f   : > { %v3530_v4 = vrot.slane %v3516_v47, %v5769_v49  ;;  %v7375_v20 = vrot.slane %v4539_v22, %v5769_v49  ;;  %v7378_v2 = vrot.slane %v4542_v59, %v5769_v49  ;;  %v4541_v42 = vcombine.high %v2476_v55, %v7300_v46  ;;  %v8834_v47 = vld [vmem:[#allocation9_spill] sm:$0xff] }
 0x1a0   : > { %v1638_v33 = vsel %vm5038_vm6, %v1636_v8, %v8826_v28  ;;  %v1613_v35 = vsel %vm5038_vm6, %v1611_v10, %v8828_v13  ;;  %8829 = vst [vmem:[#allocation73_spill] sm:$0xff] %v7368_v63  ;;  %v8831_v8 = vrot.slane %v8830_v39, 7  ;;  %v8833_v10 = vrot.slane %v8832_v6, 7  ;;  %v7398_v39 = vpop.permute.xlu1 %1087 }
 0x1a1   : > { %v7389_v30 = vcombine.low %v3367_v23, %v3374_v43  ;;  %v8835_v22 = vrot.slane %v8834_v47, 7  ;;  %v8837_v59 = vrot.slane %v8836_v21, 7  ;;  %v7396_v46 = vrot.slane %v2073_v29, %v5081_v18  ;;  %v8843_v21 = vld [vmem:[#allocation52_spill] sm:$0xff] }
 0x1a2   : > { %v1588_v13 = vsel %vm5038_vm6, %v1586_v25, %v8831_v8  ;;  %v1563_v61 = vsel %vm5038_vm6, %v1561_v5, %v8833_v10  ;;  %v2100_v55 = vcombine.low %v1613_v35, %v1638_v33  ;;  %v7400_v25 = vpop.permute.xlu0 %1083  ;;  %v8838_v8 = vld [vmem:[#allocation49_spill] sm:$0xff]  ;;  %v3643_v10 = vcombine.low %v7368_v63, %v3642_v45 }
 0x1a3   : > { %v1492_v28 = vrot.slane %v8835_v22, 2  ;;  %v1467_v11 = vrot.slane %v8837_v59, 2  ;;  %v8839_v6 = vrot.slane %v8838_v8, 7  ;;  %v8840_v5 = vld [vmem:[#allocation53_spill] sm:$0xff]  ;;  %v7408_v47 = vrot.slane %v4540_v37, %v5769_v49 }
 0x1a4   : > { %v8841_v23 = vrot.slane %v8840_v5, 7  ;;  %v3040_v29 = vcombine.low %v7396_v46, %v7371_v58  ;;  %v2091_v22 = vcombine.low %v1563_v61, %v1588_v13  ;;  %v7413_v35 = vcombine.low %v3523_v14, %v3530_v4  ;;  %v8845_v45 = vld [vmem:[#allocation33_spill] sm:$0xff]  ;;  %v7428_v4 = vpop.permute.xlu1 %1101 }
 0x1a5   : > { %v1542_v0 = vrot.slane %v8839_v6, 2  ;;  %v8844_v59 = vrot.slane %v8843_v21, 7  ;;  %v4506_v5 = vrot.slane %v1076_v17, 9  ;;  %v8846_v37 = vrot.slane %v8845_v45, 7  ;;  %v8847_v21 = vld [vmem:[#allocation56_spill] sm:$0xff] }
 0x1a6   : > { %v1517_v43 = vrot.slane %v8841_v23, 2  ;;  %8842 = vst [vmem:[#allocation85_spill] sm:$0xff] %v7413_v35  ;;  %v7419_v23 = vrot.slane %v4541_v42, %v5769_v49  ;;  %v7424_v12 = vrot.slane %v2100_v55, %v5081_v18  ;;  %v1094_v61 = vpop.permute.xlu0 %1093  ;;  %v8849_v17 = vld [vmem:[#allocation32_spill] sm:$0xff]  ;;  %v4505_v40 = vrot.slane %v7333_v57, 9 }
 0x1a7   : > { %v1592_v8 = vrot.slane %v8844_v59, 2  ;;  %v1567_v63 = vrot.slane %v8846_v37, 2  ;;  %v8848_v59 = vrot.slane %v8847_v21, 7  ;;  %v8850_v33 = vrot.slane %v8849_v17, 7 }
 0x1a8   : > { %v7436_v45 = vpack.i.bf16 %v3643_v10, %v7413_v35  ;;  %v7441_v37 = vrot.slane %v2091_v22, %v5081_v18  ;;  %v8851_v14 = vrot.slane %v7304_v54, 7  ;;  %v8853_v10 = vrot.slane %v7043_v50, 7 }
 0x1a9   : > { %v1642_v6 = vrot.slane %v8848_v59, 2  ;;  %v1617_v42 = vrot.slane %v8850_v33, 2  ;;  %v7448_v59 = vrot.slane %v3040_v29, %v5769_v49  ;;  %v8852_v33 = vrot.slane %v7204_v24, 7 }
 0x1aa   : > { %v1544_v21 = vsel %vm5038_vm6, %v1542_v0, %v8851_v14  ;;  %v1585_v17 = vsel %vm5038_vm6, %v4506_v5, %v8853_v10  ;;  %v4507_v55 = vrot.slane %v1094_v61, 9  ;;  %v3041_v13 = vcombine.low %v7441_v37, %v7424_v12  ;;  %v7470_v5 = vpop.permute.xlu0 %1105 }
 0x1ab   : > { %v1494_v57 = vsel %vm5038_vm6, %v1492_v28, %v8852_v33  ;;  %v8854_v0 = vrot.slane %v7120_v52, 7  ;;  %v8855_v28 = vrot.slane %v7247_v32, 7  ;;  %v1112_v33 = vpop.permute.xlu1 %1111  ;;  %v8333_v61 = vrot.slane %v7331_v31, 7 }
 0x1ac   : > { %v8856_v22 = vrot.slane %v7045_v60, 7  ;;  %v4508_v48 = vrot.slane %v1112_v33, 9  ;;  %v8858_v60 = vrot.slane %v7082_v27, 7  ;;  %v7501_v27 = vrot.slane %v3041_v13, %v5769_v49 }
 0x1ad   : > { %v1469_v29 = vsel %vm5038_vm6, %v1467_v11, %v8854_v0  ;;  %v1519_v50 = vsel %vm5038_vm6, %v1517_v43, %v8855_v28  ;;  %v8332_v0 = vrot.slane %v7202_v7, 7  ;;  %v8857_v43 = vrot.slane %v7400_v25, 7 }
 0x1ae   : > { %v2298_v10 = vcombine.low %v1519_v50, %v1544_v21  ;;  %v1560_v35 = vsel %vm5038_vm6, %v4505_v40, %v8856_v22  ;;  %v2289_v14 = vcombine.low %v1469_v29, %v1494_v57  ;;  %v8334_v28 = vrot.slane %v7428_v4, 7 }
 0x1af   : > { %v1983_v9 = vcombine.low %v1560_v35, %v1585_v17  ;;  %v1594_v21 = vsel %vm5038_vm6, %v1592_v8, %v8857_v43  ;;  %v1610_v40 = vsel %vm5038_vm6, %v4507_v55, %v8858_v60  ;;  %v8859_v22 = vrot.slane %v7080_v19, 7  ;;  %v7496_v33 = vpop.permute.xlu1 %1123  ;;  %v7498_v8 = vpop.permute.xlu0 %1119 }
 0x1b0   : > { %v8860_v57 = vrot.slane %v7159_v1, 7  ;;  %v8336_v17 = vrot.slane %v7277_v44, 7  ;;  %v4513_v55 = vcombine.high %v7312_v15, %v7315_v56  ;;  %v7506_v19 = vrot.slane %v2298_v10, %v5081_v18 }
 0x1b1   : > { %v1635_v50 = vsel %vm5038_vm6, %v4508_v48, %v8859_v22  ;;  %v1569_v48 = vsel %vm5038_vm6, %v1567_v63, %v8333_v61  ;;  %v8335_v43 = vrot.slane %v7498_v8, 7  ;;  %v1501_v60 = vrot.slane %v8332_v0, 2 }
 0x1b2   : > { %v1476_v35 = vrot.slane %v8860_v57, 2  ;;  %v1992_v29 = vcombine.low %v1610_v40, %v1635_v50  ;;  %v1990_v40 = vrot.slane %v1983_v9, %v5081_v18  ;;  %v2307_v13 = vcombine.low %v1569_v48, %v1594_v21 }
 0x1b3   : > { %v7518_v50 = vrot.slane %v2289_v14, %v5081_v18  ;;  %v8337_v10 = vrot.slane %v7302_v36, 7  ;;  %v1619_v63 = vsel %vm5038_vm6, %v1617_v42, %v8334_v28  ;;  %v1644_v57 = vsel %vm5038_vm6, %v1642_v6, %v8335_v43  ;;  %v7531_v14 = vpop.permute.xlu1 %1017  ;;  %v7533_v0 = vpop.permute.xlu0 %999 }
 0x1b4   : > { %v1999_v22 = vrot.slane %v1992_v29, %v5081_v18  ;;  %v1526_v9 = vrot.slane %v8336_v17, 2  ;;  %v2316_v48 = vcombine.low %v1619_v63, %v1644_v57  ;;  %8861 = vst [vmem:[#allocation84_spill] sm:$0xff] %v7531_v14  ;;  %8862 = vst [vmem:[#allocation78_spill] sm:$0xff] %v7533_v0  ;;  %v8339_v42 = vrot.slane %v7531_v14, 7 }
 0x1b5   : > { %v3342_v61 = vcombine.low %v7518_v50, %v7506_v19  ;;  %v8340_v28 = vrot.slane %v7533_v0, 7  ;;  %v2970_v11 = vrot.slane %v4513_v55, %v5769_v49  ;;  %v2314_v6 = vrot.slane %v2307_v13, %v5081_v18 }
 0x1b6   : > { %v2864_v21 = vcombine.low %v1990_v40, %v1999_v22  ;;  %v4514_v29 = vcombine.high %v1990_v40, %v1999_v22  ;;  %v2323_v40 = vrot.slane %v2316_v48, %v5081_v18  ;;  %v8863_v63 = vcombine.low %v7312_v15, %v7315_v56 }
 0x1b7   : > { %v1551_v17 = vrot.slane %v8337_v10, 2  ;;  %v1503_v55 = vsel %vm5038_vm6, %v1501_v60, %v8339_v42  ;;  %v1478_v13 = vsel %vm5038_vm6, %v1476_v35, %v8340_v28  ;;  %v7564_v56 = vpop.permute.xlu1 %1053  ;;  %v7566_v48 = vpop.permute.xlu0 %1035  ;;  %v3350_v60 = vrot.slane %v3342_v61, %v5769_v49 }
 0x1b8   : > { %v7542_v43 = vrot.slane %v2864_v21, %v5769_v49  ;;  %v2977_v22 = vrot.slane %v4514_v29, %v5769_v49  ;;  %v7550_v57 = vrot.slane %v8863_v63, %v5769_v49  ;;  %v3343_v15 = vcombine.low %v2314_v6, %v2323_v40 }
 0x1b9   : > { %v1552_v10 = vrot.slane %v7564_v56, 7  ;;  %v8344_v14 = vrot.slane %v7566_v48, 7  ;;  %v4532_v35 = vcombine.high %v2314_v6, %v2323_v40  ;;  %v2613_v28 = vcombine.low %v1478_v13, %v1503_v55 }
 0x1ba   : > { %v2978_v63 = vcombine.low %v2970_v11, %v2977_v22  ;;  %v3357_v29 = vrot.slane %v3343_v15, %v5769_v49  ;;  %v4531_v0 = vcombine.high %v7518_v50, %v7506_v19  ;;  %v3056_v6 = vcombine.low %v7448_v59, %v7501_v27 }
 0x1bb   : > { %v1553_v11 = vsel %vm5038_vm6, %v1551_v17, %v1552_v10  ;;  %v1528_v61 = vsel %vm5038_vm6, %v1526_v9, %v8344_v14  ;;  %v8865_v22 = vrot.slane %v7398_v39, 7  ;;  %v7591_v50 = vpop.permute.xlu1 %1089  ;;  %v7593_v13 = vpop.permute.xlu0 %1071  ;;  %v1624_v15 = vrot.slane %v7470_v5, 7 }
 0x1bc   : > { %v4699_v21 = vpack.i.bf16 %v7149_v3, %v2978_v63  ;;  %v8864_v3 = vrot.slane %v7355_v53, 7  ;;  %v2622_v19 = vcombine.low %v1528_v61, %v1553_v11  ;;  %v3358_v17 = vcombine.low %v3350_v60, %v3357_v29 }
 0x1bd   : > { %v1601_v55 = vrot.slane %v8865_v22, 2  ;;  %v1649_v9 = vrot.slane %v7496_v33, 7  ;;  %v8343_v59 = vrot.slane %v7591_v50, 7  ;;  %v8342_v27 = vrot.slane %v7593_v13, 7 }
 0x1be   : > { %v1576_v40 = vrot.slane %v8864_v3, 2  ;;  %4700 = vrot.lane.b32.xlu0 %v4699_v21, %s4834_s22  ;;  %v2620_v63 = vrot.slane %v2613_v28, %v5081_v18  ;;  %v2629_v3 = vrot.slane %v2622_v19, %v5081_v18  ;;  %v4704_v11 = vpack.i.bf16 %v7389_v30, %v3358_v17 }
 0x1bf   : > { %v3435_v61 = vrot.slane %v4532_v35, %v5769_v49  ;;  %v1603_v21 = vsel %vm5038_vm6, %v1601_v55, %v8343_v59  ;;  %v3721_v60 = vcombine.low %v7419_v23, %v7378_v2  ;;  %v8866_v28 = vcombine.high %v7441_v37, %v7424_v12  ;;  %v7618_v35 = vpop.permute.xlu1 %1125  ;;  %v7621_v17 = vpop.permute.xlu0 %1107 }
 0x1c0   : > { %v1578_v29 = vsel %vm5038_vm6, %v1576_v40, %v8342_v27  ;;  %v3800_v19 = vcombine.low %v2620_v63, %v2629_v3  ;;  %4705 = vrot.lane.b32.xlu1 %v4704_v11, %s4835_s23  ;;  %v3428_v40 = vrot.slane %v4531_v0, %v5769_v49  ;;  %v8867_v2 = vcombine.high %v7396_v46, %v7371_v58  ;;  %v8868_v27 = vld [vmem:[#allocation54_spill] sm:$0xff] }
 0x1c1   : > { %v3133_v22 = vrot.slane %v8866_v28, %v5769_v49  ;;  %v1626_v12 = vrot.slane %v1624_v15, 2  ;;  %v1651_v37 = vrot.slane %v1649_v9, 2  ;;  %v8345_v11 = vrot.slane %v7618_v35, 7 }
 0x1c2   : > { %4710 = vrot.lane.b32.xlu0 %v7436_v45, %s4835_s23  ;;  %v3126_v55 = vrot.slane %v8867_v2, %v5769_v49  ;;  %v1627_v28 = vrot.slane %v7621_v17, 7  ;;  %v2631_v42 = vcombine.low %v1578_v29, %v1603_v21  ;;  %v4719_v45 = vpack.i.bf16 %v8868_v27, %v3056_v6 }
 0x1c3   : > { %v3436_v59 = vcombine.low %v3428_v40, %v3435_v61  ;;  %v7639_v0 = vcombine.low %v7375_v20, %v7408_v47  ;;  %v1653_v58 = vsel %vm5038_vm6, %v1651_v37, %v8345_v11  ;;  %v1014_v21 = vpop.permute.xlu1 %1013  ;;  %v8869_v47 = vrot.slane %v7120_v52, 7  ;;  %v996_v11 = vpop.permute.xlu0 %995 }
 0x1c4   : > { %v1628_v46 = vsel %vm5038_vm6, %v1626_v12, %v1627_v28  ;;  %v3134_v2 = vcombine.low %v3126_v55, %v3133_v22  ;;  %4715 = vrot.lane.b32.xlu1 %v7068_v38, %s4836_s24  ;;  %v8870_v61 = vrot.slane %v7204_v24, 7  ;;  %v4549_v40 = vcombine.high %v2620_v63, %v2629_v3 }
 0x1c5   : > { %v2640_v14 = vcombine.low %v1628_v46, %v1653_v58  ;;  %v4729_v20 = vpack.i.bf16 %v3721_v60, %v7639_v0  ;;  %v1470_v6 = vrot.slane %v8869_v47, 2  ;;  %v1496_v37 = vrot.slane %v1014_v21, 7 }
 0x1c6   : > { %4720 = vrot.lane.b32.xlu0 %v4719_v45, %s4835_s23  ;;  %v1495_v29 = vrot.slane %v8870_v61, 2  ;;  %v2638_v22 = vrot.slane %v2631_v42, %v5081_v18  ;;  %v1471_v12 = vrot.slane %v996_v11, 7  ;;  %v4724_v38 = vpack.i.bf16 %v7233_v51, %v3436_v59 }
 0x1c7   : > { %v2647_v55 = vrot.slane %v2640_v14, %v5081_v18  ;;  %v4734_v60 = vpack.i.bf16 %v8744_v26, %v3134_v2  ;;  %v8871_v52 = vrot.slane %v7247_v32, 7  ;;  %v1050_v3 = vpop.permute.xlu1 %1049  ;;  %v8872_v51 = vrot.slane %v7304_v54, 7  ;;  %v1032_v59 = vpop.permute.xlu0 %1031 }
 0x1c8   : > { %v1497_v45 = vsel %vm5038_vm6, %v1495_v29, %v1496_v37  ;;  %v1472_v63 = vsel %vm5038_vm6, %v1470_v6, %v1471_v12  ;;  %4725 = vrot.lane.b32.xlu1 %v4724_v38, %s4836_s24  ;;  %v7672_v42 = vrot.slane %v3800_v19, %v5769_v49  ;;  %v1546_v26 = vrot.slane %v1050_v3, 7 }
 0x1c9   : > { %v1520_v58 = vrot.slane %v8871_v52, 2  ;;  %v3801_v24 = vcombine.low %v2638_v22, %v2647_v55  ;;  %v4550_v46 = vcombine.high %v2638_v22, %v2647_v55  ;;  %v1545_v14 = vrot.slane %v8872_v51, 2 }
 0x1ca   : > { %4730 = vrot.lane.b32.xlu0 %v4729_v20, %s4836_s24  ;;  %v3876_v32 = vrot.slane %v4549_v40, %v5769_v49  ;;  %v2397_v2 = vcombine.low %v1472_v63, %v1497_v45  ;;  %v1521_v21 = vrot.slane %v1032_v59, 7  ;;  %v8873_v6 = vrot.slane %v7331_v31, 7 }
 0x1cb   : > { %v7676_v11 = vrot.slane %v3801_v24, %v5769_v49  ;;  %v3883_v47 = vrot.slane %v4550_v46, %v5769_v49  ;;  %v1547_v54 = vsel %vm5038_vm6, %v1545_v14, %v1546_v26  ;;  %v1548_v61 = vrot.slane %v1546_v26, 2  ;;  %v1086_v22 = vpop.permute.xlu1 %1085  ;;  %v1068_v24 = vpop.permute.xlu0 %1067 }
 0x1cc   : > { %v1570_v20 = vrot.slane %v8873_v6, 2  ;;  %v1522_v19 = vsel %vm5038_vm6, %v1520_v58, %v1521_v21  ;;  %v1523_v29 = vrot.slane %v1521_v21, 2  ;;  %4735 = vrot.lane.b32.xlu1 %v4734_v60, %s4836_s24  ;;  %v1498_v38 = vrot.slane %v1496_v37, 2 }
 0x1cd   : > { %v3884_v40 = vcombine.low %v3876_v32, %v3883_v47  ;;  %v3816_v55 = vcombine.low %v7672_v42, %v7676_v11  ;;  %v1473_v45 = vrot.slane %v1471_v12, 2  ;;  %v2406_v52 = vcombine.low %v1522_v19, %v1547_v54  ;;  %v8943_v42 = vld [vmem:[#allocation85_spill] sm:$0xff] }
 0x1ce   : > { %v1596_v31 = vrot.slane %v1086_v22, 7  ;;  %v8874_v46 = vrot.slane %v7400_v25, 7  ;;  %v2404_v3 = vrot.slane %v2397_v2, %v5081_v18  ;;  %v1571_v51 = vrot.slane %v1068_v24, 7 }
 0x1cf   : > { %v4739_v58 = vpack.i.bf16 %v7047_v34, %v3884_v40  ;;  %v8875_v14 = vrot.slane %v7302_v36, 7  ;;  %v8876_v26 = vrot.slane %v7277_v44, 7  ;;  %v2413_v12 = vrot.slane %v2406_v52, %v5081_v18  ;;  %v1122_v2 = vpop.permute.xlu1 %1121  ;;  %v1104_v19 = vpop.permute.xlu0 %1103 }
 0x1d0   : > { %v1595_v63 = vrot.slane %v8874_v46, 2  ;;  %v1598_v59 = vrot.slane %v1596_v31, 2  ;;  %v1572_v32 = vsel %vm5038_vm6, %v1570_v20, %v1571_v51  ;;  %v1573_v34 = vrot.slane %v1571_v51, 2  ;;  %v8883_v51 = vld [vmem:[#allocation62_spill] sm:$0xff] }
 0x1d1   : > { %v1550_v60 = vsel %vm5038_vm6, %v1548_v61, %v8875_v14  ;;  %v1525_v37 = vsel %vm5038_vm6, %v1523_v29, %v8876_v26  ;;  %4740 = vrot.lane.b32.xlu0 %v4739_v58, %s4834_s22  ;;  %v8877_v36 = vrot.slane %v7428_v4, 7  ;;  %v8878_v44 = vrot.slane %v7202_v7, 7  ;;  %v8884_v26 = vld [vmem:[#allocation3_spill] sm:$0xff] }
 0x1d2   : > { %v1597_v25 = vsel %vm5038_vm6, %v1595_v63, %v1596_v31  ;;  %v8879_v6 = vrot.slane %v7159_v1, 7  ;;  %v3498_v61 = vcombine.low %v2404_v3, %v2413_v12  ;;  %v8880_v20 = vrot.slane %v7498_v8, 7 }
 0x1d3   : > { %v1620_v21 = vrot.slane %v8877_v36, 2  ;;  %v1500_v47 = vsel %vm5038_vm6, %v1498_v38, %v8878_v44  ;;  %v2514_v22 = vcombine.low %v1525_v37, %v1550_v60  ;;  %v1646_v40 = vrot.slane %v1122_v2, 7  ;;  %v7735_v60 = vpop.permute.xlu0 %1001 }
 0x1d4   : > { %v1475_v54 = vsel %vm5038_vm6, %v1473_v45, %v8879_v6  ;;  %v1645_v29 = vrot.slane %v8880_v20, 2  ;;  %v1621_v52 = vrot.slane %v1104_v19, 7  ;;  %v1659_v4 = vrot.slane %v6770_v16, 7  ;;  %v7731_v16 = vpop.permute.xlu1 %1019  ;;  %v8888_v20 = vld [vmem:[#allocation67_spill] sm:$0xff] }
 0x1d5   : > { %v8881_v7 = vrot.slane %v7398_v39, 7  ;;  %v8882_v1 = vrot.slane %v7355_v53, 7  ;;  %v2415_v31 = vcombine.low %v1572_v32, %v1597_v25  ;;  %v2505_v24 = vcombine.low %v1475_v54, %v1500_v47 }
 0x1d6   : > { %v1647_v8 = vsel %vm5038_vm6, %v1645_v29, %v1646_v40  ;;  %v1648_v46 = vrot.slane %v1646_v40, 2  ;;  %v1622_v63 = vsel %vm5038_vm6, %v1620_v21, %v1621_v52  ;;  %v1657_v39 = vrot.slane %v6778_v41, 7  ;;  %v8885_v21 = vld [vmem:[#allocation41_spill] sm:$0xff] }
 0x1d7   : > { %v1600_v38 = vsel %vm5038_vm6, %v1598_v59, %v8881_v7  ;;  %v1575_v45 = vsel %vm5038_vm6, %v1573_v34, %v8882_v1  ;;  %v1663_v58 = vrot.slane %v8883_v51, 7  ;;  %v1623_v14 = vrot.slane %v1621_v52, 2  ;;  %v1038_v19 = vpop.permute.xlu0 %1037 }
 0x1d8   : > { %v2424_v53 = vcombine.low %v1622_v63, %v1647_v8  ;;  %v1661_v37 = vrot.slane %v8884_v26, 7  ;;  %v7739_v59 = vrot.slane %v2514_v22, %v5081_v18  ;;  %v2523_v25 = vcombine.low %v1575_v45, %v1600_v38  ;;  %v1056_v6 = vpop.permute.xlu1 %1055  ;;  %v8889_v45 = vld [vmem:[#allocation30_spill] sm:$0xff]  ;;  %v8891_v63 = vld [vmem:[#allocation61_spill] sm:$0xff]  ;;  %v8893_v26 = vld [vmem:[#allocation84_spill] sm:$0xff] }
 0x1d9   : > { %v1650_v32 = vsel %vm5038_vm6, %v1648_v46, %v1649_v9  ;;  %v4537_v34 = vcombine.high %v2404_v3, %v2413_v12  ;;  %v2422_v41 = vrot.slane %v2415_v31, %v5081_v18  ;;  %v1625_v2 = vsel %vm5038_vm6, %v1623_v14, %v1624_v15  ;;  %v8886_v9 = vld [vmem:[#allocation50_spill] sm:$0xff]  ;;  %v8887_v12 = vld [vmem:[#allocation68_spill] sm:$0xff] }
 0x1da   : > { %v2431_v36 = vrot.slane %v2424_v53, %v5081_v18  ;;  %v1660_v44 = vsel %vm5038_vm6, %v8885_v21, %v1659_v4  ;;  %v7755_v47 = vrot.slane %v2505_v24, %v5081_v18  ;;  %v2532_v33 = vcombine.low %v1625_v2, %v1650_v32 }
 0x1db   : > { %v1658_v3 = vsel %vm5038_vm6, %v8886_v9, %v1657_v39  ;;  %v1664_v5 = vsel %vm5038_vm6, %v8887_v12, %v1663_v58  ;;  %v1662_v29 = vsel %vm5038_vm6, %v8888_v20, %v1661_v37  ;;  %v7769_v40 = vrot.slane %v2523_v25, %v5081_v18  ;;  %v1074_v58 = vpop.permute.xlu0 %1073 }
 0x1dc   : > { %v3499_v15 = vcombine.low %v2422_v41, %v2431_v36  ;;  %v4538_v54 = vcombine.high %v2422_v41, %v2431_v36  ;;  %v3644_v22 = vcombine.low %v7755_v47, %v7739_v59  ;;  %v7772_v52 = vrot.slane %v2532_v33, %v5081_v18  ;;  %v1092_v46 = vpop.permute.xlu1 %1091 }
 0x1dd   : > { %v7775_v4 = vrot.slane %v3498_v61, %v5769_v49  ;;  %v3574_v38 = vrot.slane %v4537_v34, %v5769_v49  ;;  %v8890_v31 = vrot.slane %v8889_v45, 7  ;;  %v8892_v39 = vrot.slane %v8891_v63, 7  ;;  %v8899_v45 = vld [vmem:[#allocation24_spill] sm:$0xff] }
 0x1de   : > { %v7778_v7 = vrot.slane %v3499_v15, %v5769_v49  ;;  %v3581_v1 = vrot.slane %v4538_v54, %v5769_v49  ;;  %v3645_v8 = vcombine.low %v7769_v40, %v7772_v52  ;;  %v2757_v14 = vcombine.low %v1658_v3, %v1660_v44 }
 0x1df   : > { %v1668_v24 = vrot.slane %v8890_v31, 2  ;;  %v1665_v51 = vrot.slane %v8892_v39, 2  ;;  %v8894_v37 = vrot.slane %v8893_v26, 7  ;;  %v3652_v32 = vrot.slane %v3644_v22, %v5769_v49 }
 0x1e0   : > { %v3582_v61 = vcombine.low %v3574_v38, %v3581_v1  ;;  %v3514_v53 = vcombine.low %v7775_v4, %v7778_v7  ;;  %v3659_v34 = vrot.slane %v3645_v8, %v5769_v49  ;;  %v2766_v41 = vcombine.low %v1662_v29, %v1664_v5  ;;  %v1128_v15 = vpop.permute.xlu1 %1127  ;;  %v8900_v8 = vld [vmem:[#allocation78_spill] sm:$0xff] }
 0x1e1   : > { %v1504_v25 = vrot.slane %v8894_v37, 2  ;;  %v1554_v2 = vrot.slane %v1552_v10, 2  ;;  %v1605_v36 = vrot.slane %v1092_v46, 7  ;;  %v1580_v21 = vrot.slane %v1074_v58, 7 }
 0x1e2   : > { %v4744_v33 = vpack.i.bf16 %v7639_v0, %v3582_v61  ;;  %v8895_v44 = vrot.slane %v7566_v48, 7  ;;  %v1555_v3 = vrot.slane %v1056_v6, 7  ;;  %v1530_v12 = vrot.slane %v1038_v19, 7  ;;  %v1110_v0 = vpop.permute.xlu0 %1109 }
 0x1e3   : > { %v3660_v54 = vcombine.low %v3652_v32, %v3659_v34  ;;  %v8896_v20 = vrot.slane %v7591_v50, 7  ;;  %v8897_v38 = vrot.slane %v7593_v13, 7  ;;  %v8898_v56 = vrot.slane %v7618_v35, 7 }
 0x1e4   : > { %v1529_v9 = vrot.slane %v8895_v44, 2  ;;  %v1655_v29 = vrot.slane %v1128_v15, 7  ;;  %4745 = vrot.lane.b32.xlu1 %v4744_v33, %s4834_s22  ;;  %v1629_v48 = vrot.slane %v1627_v28, 2  ;;  %v1505_v6 = vrot.slane %v7731_v16, 7  ;;  %v1132_v63 = vpop.permute.xlu1 %1131 }
 0x1e5   : > { %v1604_v22 = vrot.slane %v8896_v20, 2  ;;  %v1579_v5 = vrot.slane %v8897_v38, 2  ;;  %v1654_v10 = vrot.slane %v8898_v56, 2  ;;  %v1480_v19 = vrot.slane %v7735_v60, 7  ;;  %v8905_v38 = vld [vmem:[#allocation35_spill] sm:$0xff] }
 0x1e6   : > { %v1630_v1 = vrot.slane %v1110_v0, 7  ;;  %v4754_v31 = vpack.i.bf16 %v8899_v45, %v3660_v54  ;;  %v8901_v46 = vrot.slane %v8900_v8, 7  ;;  %v1556_v28 = vsel %vm5038_vm6, %v1554_v2, %v1555_v3  ;;  %v1130_v61 = vpop.permute.xlu0 %1129  ;;  %v8902_v3 = vld [vmem:[#allocation34_spill] sm:$0xff] }
 0x1e7   : > { %v1606_v50 = vsel %vm5038_vm6, %v1604_v22, %v1605_v36  ;;  %v1581_v13 = vsel %vm5038_vm6, %v1579_v5, %v1580_v21  ;;  %v1656_v35 = vsel %vm5038_vm6, %v1654_v10, %v1655_v29  ;;  %v1531_v16 = vsel %vm5038_vm6, %v1529_v9, %v1530_v12  ;;  %v8904_v22 = vld [vmem:[#allocation86_spill] sm:$0xff] }
 0x1e8   : > { %v1479_v17 = vrot.slane %v8901_v46, 2  ;;  %v1631_v60 = vsel %vm5038_vm6, %v1629_v48, %v1630_v1  ;;  %v1669_v58 = vrot.slane %v1132_v63, 7  ;;  %4755 = vrot.lane.b32.xlu1 %v4754_v31, %s4835_s23  ;;  %v2764_v26 = vrot.slane %v2757_v14, %v5081_v18  ;;  %v1136_v14 = vpop.permute.xlu1 %1135  ;;  %v8907_v48 = vld [vmem:[#allocation57_spill] sm:$0xff]  ;;  %v8909_v1 = vld [vmem:[#allocation58_spill] sm:$0xff]  ;;  %v8911_v46 = vld [vmem:[#allocation36_spill] sm:$0xff] }
 0x1e9   : > { %v2748_v39 = vcombine.low %v1631_v60, %v1656_v35  ;;  %v2773_v37 = vrot.slane %v2766_v41, %v5081_v18  ;;  %v1506_v32 = vsel %vm5038_vm6, %v1504_v25, %v1505_v6  ;;  %v2739_v2 = vcombine.low %v1581_v13, %v1606_v50 }
 0x1ea   : > { %v1481_v34 = vsel %vm5038_vm6, %v1479_v17, %v1480_v19  ;;  %v1666_v36 = vrot.slane %v1130_v61, 7  ;;  %v2730_v21 = vcombine.low %v1531_v16, %v1556_v28  ;;  %v1670_v33 = vsel %vm5038_vm6, %v1668_v24, %v1669_v58  ;;  %v1134_v20 = vpop.permute.xlu0 %1133  ;;  %v8913_v58 = vld [vmem:[#allocation72_spill] sm:$0xff]  ;;  %v8914_v61 = vld [vmem:[#allocation37_spill] sm:$0xff] }
 0x1eb   : > { %v2755_v44 = vrot.slane %v2748_v39, %v5081_v18  ;;  %v8903_v41 = vrot.slane %v8902_v3, 7  ;;  %v2721_v15 = vcombine.low %v1481_v34, %v1506_v32  ;;  %v1675_v54 = vrot.slane %v1136_v14, 7 }
 0x1ec   : > { %v1667_v9 = vsel %vm5038_vm6, %v1665_v51, %v1666_v36  ;;  %3314 = vrot.lane.b32.xlu1 %v8904_v22, %s4834_s22  ;;  %v8906_v5 = vrot.slane %v8905_v38, 7  ;;  %v2746_v24 = vrot.slane %v2739_v2, %v5081_v18  ;;  %v1672_v10 = vrot.slane %v1134_v20, 7  ;;  %v1140_v8 = vpop.permute.xlu1 %1139 }
 0x1ed   : > { %v1674_v12 = vrot.slane %v8903_v41, 2  ;;  %v2775_v25 = vcombine.low %v1667_v9, %v1670_v33  ;;  %v3963_v29 = vcombine.low %v2764_v26, %v2773_v37  ;;  %v2737_v51 = vrot.slane %v2730_v21, %v5081_v18 }
 0x1ee   : > { %v1671_v56 = vrot.slane %v8906_v5, 2  ;;  %v8908_v6 = vrot.slane %v8907_v48, 7  ;;  %v8910_v50 = vrot.slane %v8909_v1, 7  ;;  %v3947_v35 = vcombine.low %v2746_v24, %v2755_v44  ;;  %v1138_v39 = vpop.permute.xlu0 %1137  ;;  %v8916_v5 = vld [vmem:[#allocation60_spill] sm:$0xff]  ;;  %v8917_v1 = vld [vmem:[#allocation23_spill] sm:$0xff] }
 0x1ef   : > { %v1676_v0 = vsel %vm5038_vm6, %v1674_v12, %v1675_v54  ;;  %v8912_v17 = vrot.slane %v8911_v46, 7  ;;  %v2728_v16 = vrot.slane %v2721_v15, %v5081_v18  ;;  %v1681_v63 = vrot.slane %v1140_v8, 7 }
 0x1f0   : > { %v1680_v19 = vrot.slane %v8908_v6, 2  ;;  %v1677_v13 = vrot.slane %v8910_v50, 2  ;;  %v1673_v31 = vsel %vm5038_vm6, %v1671_v56, %v1672_v10  ;;  %3012 = vrot.lane.b32.xlu1 %v8913_v58, %s4834_s22  ;;  %v8915_v32 = vrot.slane %v8914_v61, 7  ;;  %v1144_v54 = vpop.permute.xlu1 %1143 }
 0x1f1   : > { %v1686_v28 = vrot.slane %v8912_v17, 2  ;;  %v2784_v60 = vcombine.low %v1673_v31, %v1676_v0  ;;  %v1678_v2 = vrot.slane %v1138_v39, 7  ;;  %v3971_v36 = vrot.slane %v3963_v29, %v5769_v49 }
 0x1f2   : > { %v1683_v34 = vrot.slane %v8915_v32, 2  ;;  %v4557_v21 = vcombine.high %v2764_v26, %v2773_v37  ;;  %v3946_v33 = vcombine.low %v2728_v16, %v2737_v51  ;;  %v2782_v9 = vrot.slane %v2775_v25, %v5081_v18  ;;  %v1142_v25 = vpop.permute.xlu0 %1141 }
 0x1f3   : > { %v2791_v14 = vrot.slane %v2784_v60, %v5081_v18  ;;  %v1682_v3 = vsel %vm5038_vm6, %v1680_v19, %v1681_v63  ;;  %v4544_v41 = vcombine.high %v7769_v40, %v7772_v52  ;;  %v4556_v12 = vcombine.high %v2746_v24, %v2755_v44 }
 0x1f4   : > { %v1679_v15 = vsel %vm5038_vm6, %v1677_v13, %v1678_v2  ;;  %v3961_v20 = vrot.slane %v3947_v35, %v5769_v49  ;;  %v1687_v38 = vrot.slane %v1144_v54, 7  ;;  %3090 = vrot.lane.b32.xlu1 %v8916_v5, %s4835_s23  ;;  %v4543_v56 = vcombine.high %v7755_v47, %v7739_v59  ;;  %v4656_v6 = vpop.permute.xlu1 %4655  ;;  %v8922_v54 = vld [vmem:[#allocation80_spill] sm:$0xff] }
 0x1f5   : > { %v3964_v22 = vcombine.low %v2782_v9, %v2791_v14  ;;  %v4558_v26 = vcombine.high %v2782_v9, %v2791_v14  ;;  %v2793_v37 = vcombine.low %v1679_v15, %v1682_v3  ;;  %v4555_v10 = vcombine.high %v2728_v16, %v2737_v51  ;;  %v8918_v14 = vld [vmem:[#allocation19_spill] sm:$0xff]  ;;  %v8919_v3 = vld [vmem:[#allocation18_spill] sm:$0xff] }
 0x1f6   : > { %v1684_v40 = vrot.slane %v1142_v25, 7  ;;  %v4049_v52 = vrot.slane %v4557_v21, %v5769_v49  ;;  %v1688_v44 = vsel %vm5038_vm6, %v1686_v28, %v1687_v38  ;;  %v3954_v24 = vrot.slane %v3946_v33, %v5769_v49  ;;  %v4651_v51 = vpop.permute.xlu0 %4650  ;;  %v8921_v15 = vld [vmem:[#allocation79_spill] sm:$0xff] }
 0x1f7   : > { %v3978_v29 = vrot.slane %v3964_v22, %v5769_v49  ;;  %v4056_v0 = vrot.slane %v4558_v26, %v5769_v49  ;;  %v4039_v19 = vrot.slane %v4556_v12, %v5769_v49  ;;  %v3737_v59 = vrot.slane %v4544_v41, %v5769_v49  ;;  %v8924_v26 = vld [vmem:[#allocation89_spill] sm:$0xff] }
 0x1f8   : > { %v1685_v48 = vsel %vm5038_vm6, %v1683_v34, %v1684_v40  ;;  %3168 = vrot.lane.b32.xlu1 %v8917_v1, %s4836_s24  ;;  %v3962_v50 = vcombine.low %v3954_v24, %v3961_v20  ;;  %v4032_v35 = vrot.slane %v4555_v10, %v5769_v49  ;;  %v3730_v31 = vrot.slane %v4543_v56, %v5769_v49  ;;  %v4666_v60 = vpop.permute.xlu1 %4665  ;;  %v8925_v10 = vld [vmem:[#allocation29_spill] sm:$0xff] }
 0x1f9   : > { %v2802_v47 = vcombine.low %v1685_v48, %v1688_v44  ;;  %v3979_v13 = vcombine.low %v3971_v36, %v3978_v29  ;;  %v2800_v62 = vrot.slane %v2793_v37, %v5081_v18  ;;  %v4057_v17 = vcombine.low %v4049_v52, %v4056_v0  ;;  %v8926_v52 = vld [vmem:[#allocation59_spill] sm:$0xff] }
 0x1fa   : > { %v4658_v28 = vunpack.i.h.bf16 %v4656_v6  ;;  %v4657_v16 = vunpack.i.l.bf16 %v4656_v6  ;;  %v4040_v63 = vcombine.low %v4032_v35, %v4039_v19  ;;  %v3738_v39 = vcombine.low %v3730_v31, %v3737_v59  ;;  %v4661_v32 = vpop.permute.xlu0 %4660  ;;  %v8929_v35 = vld [vmem:[#allocation55_spill] sm:$0xff] }
 0x1fb   : > { %v2809_v8 = vrot.slane %v2802_v47, %v5081_v18  ;;  %v4749_v46 = vpack.i.bf16 %v3979_v13, %v3962_v50  ;;  %v4653_v58 = vunpack.i.h.bf16 %v4651_v51  ;;  %v4652_v61 = vunpack.i.l.bf16 %v4651_v51  ;;  %v8928_v50 = vld [vmem:[#allocation87_spill] sm:$0xff] }
 0x1fc   : > { %3616 = vrot.lane.b32.xlu1 %v7419_v23, %s4834_s22  ;;  %v4668_v36 = vunpack.i.h.bf16 %v4666_v60  ;;  %v4667_v21 = vunpack.i.l.bf16 %v4666_v60  ;;  %v4663_v18 = vunpack.i.h.bf16 %v4661_v32  ;;  %v4662_v33 = vunpack.i.l.bf16 %v4661_v32  ;;  %v4676_v22 = vpop.permute.xlu1 %4675 }
 0x1fd   : > { %4750 = vrot.lane.b32.xlu0 %v4749_v46, %s4835_s23  ;;  %v3980_v34 = vcombine.low %v2800_v62, %v2809_v8  ;;  %v4559_v2 = vcombine.high %v2800_v62, %v2809_v8  ;;  %v4759_v9 = vpack.i.bf16 %v4057_v17, %v4040_v63  ;;  %v8920_v41 = vcombine.low %v8918_v14, %v8919_v3  ;;  %v8930_v62 = vld [vmem:[#allocation88_spill] sm:$0xff]  ;;  %v8931_v8 = vld [vmem:[#allocation65_spill] sm:$0xff]  ;;  %v8932_v14 = vld [vmem:[#allocation39_spill] sm:$0xff] }
 0x1fe   : > { %v8923_v20 = vcombine.low %v8921_v15, %v8922_v54  ;;  %v4764_v37 = vpack.i.bf16 %v8924_v26, %v3738_v39  ;;  %v4678_v38 = vunpack.i.h.bf16 %v4676_v22  ;;  %v4677_v25 = vunpack.i.l.bf16 %v4676_v22  ;;  %v4671_v56 = vpop.permute.xlu0 %4670 }
 0x1ff   : > { %v4083_v12 = vsel %vm4081_vm7, %v8920_v41, %v4658_v28  ;;  %v4099_v40 = vsel %vm4081_vm7, %v8868_v27, %v4652_v61  ;;  %v8927_v44 = vcombine.low %v8916_v5, %v8926_v52  ;;  %v4673_v29 = vunpack.i.h.bf16 %v4671_v56  ;;  %v8934_v41 = vld [vmem:[#allocation64_spill] sm:$0xff] }
 0x200   : > { %v4082_v23 = vsel %vm4081_vm7, %v8923_v20, %v4657_v16  ;;  %3694 = vrot.lane.b32.xlu1 %v8925_v10, %s4835_s23  ;;  %v4672_v0 = vunpack.i.l.bf16 %v4671_v56  ;;  %v4089_v6 = vsel %vm4087_vm8, %v4083_v12, %v4668_v36  ;;  %v4104_v19 = vsel %vm4087_vm8, %v4099_v40, %v4662_v33  ;;  %v4686_v16 = vpop.permute.xlu1 %4685 }
 0x201   : > { %4760 = vrot.lane.b32.xlu0 %v4759_v9, %s4836_s24  ;;  %v4100_v24 = vsel %vm4081_vm7, %v8927_v44, %v4653_v58  ;;  %v4088_v48 = vsel %vm4087_vm8, %v4082_v23, %v4667_v21  ;;  %v4095_v51 = vsel %vm4093_vm9, %v4089_v6, %v4678_v38  ;;  %v4837_v31 = vmov 0.0   ;;  %v8938_v44 = vld [vmem:[#allocation31_spill] sm:$0xff] }
 0x202   : > { %v4105_v59 = vsel %vm4087_vm8, %v4100_v24, %v4663_v18  ;;  %v4094_v47 = vsel %vm4093_vm9, %v4088_v48, %v4677_v25  ;;  %v4109_v27 = vsel %vm4093_vm9, %v4104_v19, %v4672_v0  ;;  %4226 = vmatprep.mubr.f32.mxu0 %v4837_v31  ;;  %4297 = vmatprep.mubr.f32.mxu1 %v4837_v31  ;;  %v4681_v28 = vpop.permute.xlu0 %4680  ;;  %v4688_v58 = vunpack.i.h.bf16 %v4686_v16  ;;  %v8936_v25 = vld [vmem:[#allocation28_spill] sm:$0xff] }
 0x203   : > { %v4110_v5 = vsel %vm4093_vm9, %v4105_v59, %v4673_v29  ;;  %v4570_v1 = vpack.c.bf16 %v4095_v51, %v4094_v47  ;;  %v3987_v46 = vrot.slane %v3980_v34, %v5769_v49  ;;  %v4065_v17 = vrot.slane %v4559_v2, %v5769_v49  ;;  %v8933_v2 = vld [vmem:[#allocation63_spill] sm:$0xff] }
 0x204   : > { %3772 = vrot.lane.b32.xlu1 %v8928_v50, %s4836_s24  ;;  %v4568_v13 = vpack.c.bf16 %v4110_v5, %v4109_v27  ;;  %v4696_v63 = vpop.permute.xlu1 %4695  ;;  %v4687_v61 = vunpack.i.l.bf16 %v4686_v16  ;;  %v4682_v32 = vunpack.i.l.bf16 %v4681_v28  ;;  %v4683_v18 = vunpack.i.h.bf16 %v4681_v28 }
 0x205   : > { %4765 = vrot.lane.b32.xlu0 %v4764_v37, %s4836_s24  ;;  %v4697_v33 = vunpack.i.l.bf16 %v4696_v63  ;;  %v4698_v9 = vunpack.i.h.bf16 %v4696_v63  ;;  %v4102_v3 = vsel %vm4081_vm7, %v8932_v14, %v4688_v58  ;;  %v8935_v12 = vcombine.low %v8933_v2, %v8934_v41 }
 0x206   : > { %4569 = vmatprep.subr.bf16.mxu0 %v4568_v13  ;;  %v4691_v60 = vpop.permute.xlu0 %4690  ;;  %v4129_v26 = vsel %vm4081_vm7, %v8899_v45, %v4682_v32  ;;  %v8937_v56 = vcombine.low %v8925_v10, %v8936_v25  ;;  %v8939_v24 = vcombine.low %v8929_v35, %v8938_v44  ;;  %v8940_v32 = vld [vmem:[#allocation10_spill] sm:$0xff] }
 0x207   : > { %4571 = vmatpush1.bf16.msra.mxu0 %v4570_v1  ;;  %v4693_v34 = vunpack.i.h.bf16 %v4691_v60  ;;  %v4692_v49 = vunpack.i.l.bf16 %v4691_v60  ;;  %v4101_v15 = vsel %vm4081_vm7, %v8935_v12, %v4687_v61  ;;  %v4134_v52 = vsel %vm4087_vm8, %v4129_v26, %v4697_v33 }
 0x208   : > { %v4130_v40 = vsel %vm4081_vm7, %v8937_v56, %v4683_v18 }
 0x209   : > { %3392 = vrot.lane.b32.xlu0 %v8929_v35, %s4835_s23  ;;  %v4115_v29 = vsel %vm4081_vm7, %v8939_v24, %v4693_v34  ;;  %v4135_v6 = vsel %vm4087_vm8, %v4130_v40, %v4698_v9  ;;  %v4114_v45 = vsel %vm4081_vm7, %v7389_v30, %v4692_v49 }
 0x20d   : > { %3470 = vrot.lane.b32.xlu0 %v8930_v62, %s4836_s24 }
 0x211   : > { %3918 = vrot.lane.b32.xlu0 %v8931_v8, %s4834_s22 }
 0x215   : > { %3996 = vrot.lane.b32.xlu0 %v3987_v46, %s4835_s23 }
 0x219   : > { %4074 = vrot.lane.b32.xlu0 %v4065_v17, %s4836_s24 }
 0x230   : > { %v4701_v39 = vpop.permute.xlu0 %4700 }
 0x231   : > { %v4703_v19 = vunpack.i.h.bf16 %v4701_v39  ;;  %v4702_v47 = vunpack.i.l.bf16 %v4701_v39 }
 0x232   : > { %v4706_v36 = vpop.permute.xlu1 %4705 }
 0x233   : > { %v4708_v54 = vunpack.i.h.bf16 %v4706_v36  ;;  %v4707_v20 = vunpack.i.l.bf16 %v4706_v36  ;;  %v4085_v36 = vsel %vm4081_vm7, %v8940_v32, %v4703_v19 }
 0x234   : > { %v4711_v21 = vpop.permute.xlu0 %4710 }
 0x235   : > { %v4713_v0 = vunpack.i.h.bf16 %v4711_v21  ;;  %v4712_v48 = vunpack.i.l.bf16 %v4711_v21  ;;  %v4107_v51 = vsel %vm4087_vm8, %v4102_v3, %v4708_v54  ;;  %v4106_v27 = vsel %vm4087_vm8, %v4101_v15, %v4707_v20 }
 0x236   : > { %v4716_v23 = vpop.permute.xlu1 %4715  ;;  %v8941_v21 = vcombine.low %v7550_v57, %v7542_v43 }
 0x237   : > { %v4718_v37 = vunpack.i.h.bf16 %v4716_v23  ;;  %v4717_v38 = vunpack.i.l.bf16 %v4716_v23  ;;  %v4119_v30 = vsel %vm4087_vm8, %v4114_v45, %v4712_v48  ;;  %v4120_v17 = vsel %vm4087_vm8, %v4115_v29, %v4713_v0 }
 0x238   : > { %v4721_v22 = vpop.permute.xlu0 %4720  ;;  %v4084_v18 = vsel %vm4081_vm7, %v8941_v21, %v4702_v47 }
 0x239   : > { %v4139_v59 = vsel %vm4093_vm9, %v4134_v52, %v4717_v38  ;;  %v4140_v10 = vsel %vm4093_vm9, %v4135_v6, %v4718_v37  ;;  %v4723_v8 = vunpack.i.h.bf16 %v4721_v22  ;;  %v4722_v46 = vunpack.i.l.bf16 %v4721_v22  ;;  %v8942_v38 = vld [vmem:[#allocation71_spill] sm:$0xff] }
 0x23a   : > { %v4726_v5 = vpop.permute.xlu1 %4725  ;;  %v4576_v50 = vpack.c.bf16 %v4140_v10, %v4139_v59 }
 0x23b   : > { %v4728_v13 = vunpack.i.h.bf16 %v4726_v5  ;;  %v4727_v35 = vunpack.i.l.bf16 %v4726_v5  ;;  %v4091_v34 = vsel %vm4087_vm8, %v4085_v36, %v4723_v8  ;;  %v4090_v14 = vsel %vm4087_vm8, %v4084_v18, %v4722_v46  ;;  %v8944_v8 = vld [vmem:[#allocation4_spill] sm:$0xff]  ;;  %v8947_v18 = vld [vmem:[#allocation73_spill] sm:$0xff] }
 0x23c   : > { %v4731_v1 = vpop.permute.xlu0 %4730  ;;  %4577 = vmatprep.subr.bf16.mxu1 %v4576_v50  ;;  %v8946_v36 = vld [vmem:[#allocation76_spill] sm:$0xff] }
 0x23d   : > { %v4733_v31 = vunpack.i.h.bf16 %v4731_v1  ;;  %v4732_v62 = vunpack.i.l.bf16 %v4731_v1  ;;  %v4111_v28 = vsel %vm4093_vm9, %v4106_v27, %v4727_v35  ;;  %v4112_v16 = vsel %vm4093_vm9, %v4107_v51, %v4728_v13 }
 0x23e   : > { %v4736_v39 = vpop.permute.xlu1 %4735  ;;  %v4572_v58 = vpack.c.bf16 %v4112_v16, %v4111_v28 }
 0x23f   : > { %v4124_v60 = vsel %vm4093_vm9, %v4119_v30, %v4732_v62  ;;  %v4125_v63 = vsel %vm4093_vm9, %v4120_v17, %v4733_v31  ;;  %v4738_v33 = vunpack.i.h.bf16 %v4736_v39  ;;  %v4737_v9 = vunpack.i.l.bf16 %v4736_v39 }
 0x240   : > { %v4578_v61 = vpack.c.bf16 %v4125_v63, %v4124_v60  ;;  %4573 = vmatprep.subr.bf16.mxu0 %v4572_v58  ;;  %v4144_v60 = vld [vmem:[%s8054_s1] sm:$0xff] }
 0x241   : > { %v4096_v3 = vsel %vm4093_vm9, %v4090_v14, %v4737_v9  ;;  %v4097_v49 = vsel %vm4093_vm9, %v4091_v34, %v4738_v33 }
 0x242   : > { %4579 = vmatpush1.bf16.msra.mxu1 %v4578_v61  ;;  %v4574_v2 = vpack.c.bf16 %v4097_v49, %v4096_v3 }
 0x243   : > { %v4741_v43 = vpop.permute.xlu0 %4740 }
 0x244   : > { %4575 = vmatpush1.bf16.msra.mxu0 %v4574_v2  ;;  %v4743_v54 = vunpack.i.h.bf16 %v4741_v43  ;;  %v4742_v20 = vunpack.i.l.bf16 %v4741_v43 }
 0x246   : > { %v4132_v25 = vsel %vm4081_vm7, %v8942_v38, %v4743_v54  ;;  %v4131_v56 = vsel %vm4081_vm7, %v3816_v55, %v4742_v20 }
 0x256   : > { %v4746_v41 = vpop.permute.xlu1 %4745 }
 0x257   : > { %v4748_v52 = vunpack.i.h.bf16 %v4746_v41  ;;  %v4747_v44 = vunpack.i.l.bf16 %v4746_v41 }
 0x259   : > { %v4117_v11 = vsel %vm4081_vm7, %v8943_v42, %v4748_v52  ;;  %v4116_v55 = vsel %vm4081_vm7, %v3514_v53, %v4747_v44  ;;  %v8945_v53 = vld [vmem:[#allocation70_spill] sm:$0xff] }
 0x25a   : > { %v4756_v12 = vpop.permute.xlu1 %4755 }
 0x25b   : > { %v4758_v0 = vunpack.i.h.bf16 %v4756_v12  ;;  %v4757_v48 = vunpack.i.l.bf16 %v4756_v12 }
 0x25d   : > { %v4122_v1 = vsel %vm4087_vm8, %v4117_v11, %v4758_v0  ;;  %v4121_v50 = vsel %vm4087_vm8, %v4116_v55, %v4757_v48 }
 0x25e   : > { %v3315_v15 = vpop.permute.xlu1 %3314 }
 0x25f   : > { %v4103_v4 = vsel %vm4081_vm7, %v8944_v8, %v3315_v15 }
 0x262   : > { %v3013_v57 = vpop.permute.xlu1 %3012 }
 0x263   : > { %v4086_v46 = vsel %vm4081_vm7, %v8945_v53, %v3013_v57 }
 0x266   : > { %v3091_v37 = vpop.permute.xlu1 %3090 }
 0x267   : > { %v4092_v28 = vsel %vm4087_vm8, %v4086_v46, %v3091_v37 }
 0x26a   : > { %v3169_v51 = vpop.permute.xlu1 %3168 }
 0x26b   : > { %v4098_v63 = vsel %vm4093_vm9, %v4092_v28, %v3169_v51 }
 0x26e   : > { %v3617_v7 = vpop.permute.xlu1 %3616 }
 0x26f   : > { %v4751_v23 = vpop.permute.xlu0 %4750  ;;  %v4118_v33 = vsel %vm4081_vm7, %v8947_v18, %v3617_v7 }
 0x270   : > { %v4753_v22 = vunpack.i.h.bf16 %v4751_v23  ;;  %v4752_v26 = vunpack.i.l.bf16 %v4751_v23 }
 0x272   : > { %v4136_v6 = vsel %vm4087_vm8, %v4131_v56, %v4752_v26  ;;  %v4137_v45 = vsel %vm4087_vm8, %v4132_v25, %v4753_v22  ;;  %v3695_v58 = vpop.permute.xlu1 %3694 }
 0x273   : > { %v4761_v40 = vpop.permute.xlu0 %4760  ;;  %v4123_v14 = vsel %vm4087_vm8, %v4118_v33, %v3695_v58 }
 0x274   : > { %v4763_v24 = vunpack.i.h.bf16 %v4761_v40  ;;  %v4762_v29 = vunpack.i.l.bf16 %v4761_v40 }
 0x276   : > { %v4141_v19 = vsel %vm4093_vm9, %v4136_v6, %v4762_v29  ;;  %v4142_v59 = vsel %vm4093_vm9, %v4137_v45, %v4763_v24  ;;  %v3773_v32 = vpop.permute.xlu1 %3772 }
 0x277   : > { %v4766_v10 = vpop.permute.xlu0 %4765  ;;  %v4580_v47 = vpack.c.bf16 %v4142_v59, %v4141_v19  ;;  %v4128_v49 = vsel %vm4093_vm9, %v4123_v14, %v3773_v32 }
 0x278   : > { %v4768_v27 = vunpack.i.h.bf16 %v4766_v10  ;;  %v4767_v5 = vunpack.i.l.bf16 %v4766_v10 }
 0x279   : > { %4581 = vmatprep.subr.bf16.mxu1 %v4580_v47 }
 0x27a   : > { %v4126_v13 = vsel %vm4093_vm9, %v4121_v50, %v4767_v5  ;;  %v4127_v35 = vsel %vm4093_vm9, %v4122_v1, %v4768_v27 }
 0x27b   : > { %v3393_v31 = vpop.permute.xlu0 %3392  ;;  %v4582_v62 = vpack.c.bf16 %v4127_v35, %v4126_v13 }
 0x27c   : > { %v4108_v30 = vsel %vm4087_vm8, %v4103_v4, %v3393_v31 }
 0x27d   : > { %4583 = vmatpush1.bf16.msra.mxu1 %v4582_v62 }
 0x27f   : > { %v3471_v17 = vpop.permute.xlu0 %3470 }
 0x280   : > { %v4113_v16 = vsel %vm4093_vm9, %v4108_v30, %v3471_v17 }
 0x281   : > { %4560 = vmatprep.subr.msk.mxu0 %vm4149_vm10, %v4113_v16 }
 0x282   : > { %4561 = vmatpush1.msk.msra.mxu0 %vm4149_vm10, %v4098_v63 }
 0x283   : > { %v3919_v39 = vpop.permute.xlu0 %3918  ;;  %4562 = vmatmul.mubr.msk.f32.vlgmr.msra.gmra.mrb[0].mxu0 %vm4145_vm11, %v4144_v60 }
 0x284   : > { %v4133_v21 = vsel %vm4081_vm7, %v8946_v36, %v3919_v39 }
 0x287   : > { %v3997_v61 = vpop.permute.xlu0 %3996 }
 0x288   : > { %v4138_v9 = vsel %vm4087_vm8, %v4133_v21, %v3997_v61 }
 0x28b   : > { %v4075_v34 = vpop.permute.xlu0 %4074 }
 0x28c   : > { %v4143_v3 = vsel %vm4093_vm9, %v4138_v9, %v4075_v34 }
 0x28d   : > { %4563 = vmatprep.subr.msk.mxu1 %vm4149_vm10, %v4143_v3 }
 0x28e   : > { %4564 = vmatpush1.msk.msra.mxu1 %vm4149_vm10, %v4128_v49 }
 0x28f   : > { %4565 = vmatmul.mubr.msk.f32.vlgmr.msra.gmra.mrb[0].mxu1 %vm4145_vm11, %v4144_v60 }
 0x356   : > { %v4228_v2 = vpop.f32.mrb[0].mxu0 }
 0x357   : > { %4304 = vst [vmem:[%s272_s7] sm:$0xff] %v4228_v2  ;;  %v4313_v41 = vmul.f32 %v4228_v2, %v4228_v2  ;;  %v4230_v12 = vpop.f32.mrb[1].mxu0 }
 0x358   : > { %4305 = vst [vmem:[%s272_s7 + $0x8] sm:$0xff] %v4230_v12  ;;  %v4308_v15 = vadd.f32 %v4230_v12, %v4228_v2  ;;  %v4314_v43 = vmul.f32 %v4230_v12, %v4230_v12 }
 0x35a   : > { %v4317_v57 = vadd.f32 %v4314_v43, %v4313_v41 }
 0x362   : > { %v4299_v54 = vpop.f32.mrb[0].mxu1 }
 0x363   : > { %4306 = vst [vmem:[%s272_s7 + $0x10] sm:$0xff] %v4299_v54  ;;  %v4309_v20 = vadd.f32 %v4308_v15, %v4299_v54  ;;  %v4315_v23 = vmul.f32 %v4299_v54, %v4299_v54  ;;  %v4301_v22 = vpop.f32.mrb[1].mxu1 }
 0x364   : > { %4307 = vst [vmem:[%s272_s7 + $0x18] sm:$0xff] %v4301_v22  ;;  %v4316_v26 = vmul.f32 %v4301_v22, %v4301_v22 }
 0x365   : > { %v4318_v37 = vadd.f32 %v4317_v57, %v4315_v23  ;;  %v4310_v38 = vadd.f32 %v4309_v20, %v4301_v22 }
 0x367   : > { %v4319_v25 = vadd.f32 %v4318_v37, %v4316_v26  ;;  %4311 = vadd.xlane.f32.xlu0 %v4310_v38 }
 0x369   : > { %4320 = vadd.xlane.f32.xlu1 %v4319_v25 }
 0x3f4   : > { %v4312_v56 = vpop.xlane.xlu0 %4311 }
 0x3f6   : > { %v4321_v40 = vpop.xlane.xlu1 %4320 }
 0x3f7   : > { %v4323_v52 = vsel %vm4322_vm12, %v4312_v56, %v4321_v40 }
 0x3f8   : > { %4325 = vst.msk [vmem:[%s281_s21] sm:$0xff] %vm4324_vm13, %v4323_v52 }
 0x3f9 PF: > { %s14_s18 = sadd.s32 1, %s4827_s18   ;;  %s8948_s12 = smov %s4807_s13 }
 0x3fa   : > { %p11_p13 = scmp.ge.s32.totalorder %s14_s18, 6   ;;  %s8949_s13 = smov %s4909_s25 }
 0x3fb   : > { %s8950_s14 = smov %s4819_s16  ;;  %s8951_s15 = smov %s4823_s17 }
 0x3fc   : > { %s8952_s16 = smov %s8955_s19  ;;  %s8953_s17 = smov %s8959_s20 }
 0x3fd   :  { %13 = sbr.rel (!%p11_p13) target bundleno = 4 (0x4), region = 113 }

</bundles_post_ra>
